<compile_context>
chip_gen: v6e
topology: v6e:2x2x1
jax: 0.10.0
libtpu: 0.0.40
codegen_flags: <defaults>
</compile_context>

<pallas_src>
import numpy as np
import jax
import jax.numpy as jnp
from jax.experimental import pallas as pl
from jax.experimental.pallas import tpu as pltpu

_WIDTH = 0.25  # fdmobilenet_wd4
_CHANNELS = [[32], [64], [128, 128], [256, 256], [512, 512, 512, 512, 512, 1024]]
_OUT_STAGES = (1, 2, 3)  # stage2, stage3, stage4
_BN_EPS = 1e-5


# ---------------------------------------------------------------------------
# deterministic parameters (BN in eval mode folded into conv weight / bias)
# ---------------------------------------------------------------------------

def init_params(key):
    ch = [[int(c * _WIDTH) for c in st] for st in _CHANNELS]
    init_c, stage_ch = ch[0][0], ch[1:]
    keys = iter(jax.random.split(key, 64))

    def convbn(shape_w, cout):
        k1, k2, k3, k4, k5 = jax.random.split(next(keys), 5)
        w = jax.random.normal(k1, shape_w, jnp.float32) * 0.1
        gamma = jax.random.uniform(k2, (cout,), jnp.float32, minval=0.5, maxval=1.5)
        beta = jax.random.normal(k3, (cout,), jnp.float32) * 0.1
        mean = jax.random.normal(k4, (cout,), jnp.float32) * 0.1
        var = jax.random.uniform(k5, (cout,), jnp.float32, minval=0.5, maxval=1.5)
        scale = gamma * jax.lax.rsqrt(var + _BN_EPS)
        return w * scale, beta - mean * scale  # BN folded

    params = {"init": convbn((3, 3, 3, init_c), init_c)}
    stages = []
    cin = init_c
    for st in stage_ch:
        units = []
        for cout in st:
            dw = convbn((3, 3, cin), cin)     # depthwise (kh, kw, C)
            pw = convbn((cin, cout), cout)    # pointwise (Cin, Cout)
            units.append((dw, pw))
            cin = cout
        stages.append(units)
    params["stages"] = stages
    return params


# ---------------------------------------------------------------------------
# trace-time helpers (pure numpy / cheap wrapper-side XLA on the raw input)
# ---------------------------------------------------------------------------

def _shift_matrices(H, W, stride):
    """Per-tap (Ho*Wo, H*W) 0/1 matrices realising one tap of a padded 3x3 conv."""
    Ho = (H - 1) // stride + 1
    Wo = (W - 1) // stride + 1
    mats = []
    for ky in range(3):
        for kx in range(3):
            S = np.zeros((Ho * Wo, H * W), np.float32)
            for oy in range(Ho):
                iy = oy * stride + ky - 1
                if not (0 <= iy < H):
                    continue
                for ox in range(Wo):
                    ix = ox * stride + kx - 1
                    if 0 <= ix < W:
                        S[oy * Wo + ox, iy * W + ix] = 1.0
            mats.append(S)
    return Ho, Wo, mats


def _init_patches(x_nhwc, stride=2):
    """im2col of the network input for the init 3x3/s2 conv: (N, Ho*Wo, 9*Cin)."""
    N, H, W, Cin = x_nhwc.shape
    Ho = (H - 1) // stride + 1
    Wo = (W - 1) // stride + 1
    xp = jnp.pad(x_nhwc, ((0, 0), (1, 1), (1, 1), (0, 0)))
    taps = [xp[:, ky:ky + stride * (Ho - 1) + 1:stride,
               kx:kx + stride * (Wo - 1) + 1:stride, :]
            for ky in range(3) for kx in range(3)]
    patches = jnp.concatenate(taps, axis=-1)           # (N, Ho, Wo, 9*Cin)
    return patches.reshape(N, Ho * Wo, 9 * Cin), Ho, Wo


# ---------------------------------------------------------------------------
# fully fused forward pass (one pallas_call for the whole backbone)
# ---------------------------------------------------------------------------

def fdmobilenet_forward(params, x_nchw):
    N, _, H, W = x_nchw.shape
    x_nhwc = jnp.transpose(x_nchw, (0, 2, 3, 1)).astype(jnp.float32)
    patches, cur_h, cur_w = _init_patches(x_nhwc, stride=2)

    flat_inputs, in_specs = [], []

    def add_input(arr, batched=False):
        idx = len(flat_inputs)
        flat_inputs.append(arr)
        if batched:   # batch dim squeezed, indexed by the grid
            in_specs.append(pl.BlockSpec((None,) + tuple(arr.shape[1:]),
                                         lambda i, r=arr.ndim - 1: (i,) + (0,) * r))
        else:         # constant index map -> resident in VMEM across grid steps
            in_specs.append(pl.BlockSpec(tuple(arr.shape),
                                         lambda i, r=arr.ndim: (0,) * r))
        return idx

    # ---- static op plan built at trace time ----
    ops = []
    w0, b0 = params["init"]
    c0 = w0.shape[-1]
    ops.append(("mm", add_input(patches, batched=True),
                add_input(w0.reshape(-1, c0)), add_input(b0.reshape(1, c0))))

    out_dims = []
    cur_c = c0
    for si, units in enumerate(params["stages"]):
        for ui, ((dw_w, dw_b), (pw_w, pw_b)) in enumerate(units):
            stride = 2 if ui == 0 else 1              # first_stage_stride=True
            ho, wo, mats = _shift_matrices(cur_h, cur_w, stride)
            mo = ho * wo
            stacked, taps = [], []
            for t, s in enumerate(mats):
                if not s.any():
                    continue                           # tap entirely in zero padding
                if s.shape[0] == s.shape[1] and np.array_equal(
                        s, np.eye(s.shape[0], dtype=np.float32)):
                    taps.append(("id", t, 0))          # un-shifted center tap
                elif s.shape[0] == 1 and int((s != 0).sum()) == 1:
                    taps.append(("row", t, int(np.argmax(s[0]))))  # single-row pick
                else:
                    taps.append(("mat", t, len(stacked)))
                    stacked.append(s)
            s_idx = add_input(jnp.asarray(np.stack(stacked))) if stacked else -1
            ops.append(("dw", taps, s_idx,
                        add_input(dw_w.reshape(9, 1, cur_c)),
                        add_input(dw_b.reshape(1, cur_c)), mo, cur_c))
            cur_h, cur_w, cur_c = ho, wo, pw_w.shape[-1]
            ops.append(("mm_act", add_input(pw_w),
                        add_input(pw_b.reshape(1, cur_c))))
        if si in _OUT_STAGES:
            ops.append(("out", len(out_dims)))
            out_dims.append((cur_h, cur_w, cur_c))

    n_in = len(flat_inputs)

    def kernel(*refs):
        in_refs, out_refs = refs[:n_in], refs[n_in:]
        cur = None
        for op in ops:
            kind = op[0]
            if kind == "mm":                           # init conv (im2col, K=27)
                _, pi, wi, bi = op
                cur = jnp.maximum(
                    jnp.dot(in_refs[pi][...], in_refs[wi][...],
                            preferred_element_type=jnp.float32)
                    + in_refs[bi][...], 0.0)
            elif kind == "mm_act":                     # pointwise 1x1 conv
                _, wi, bi = op
                cur = jnp.maximum(
                    jnp.dot(cur, in_refs[wi][...],
                            preferred_element_type=jnp.float32)
                    + in_refs[bi][...], 0.0)
            elif kind == "dw":                         # depthwise 3x3 conv
                _, taps, s_idx, wi, bi, mo, c = op
                acc = jnp.broadcast_to(in_refs[bi][...], (mo, c))  # bias as init
                for mode, t, aux in taps:
                    if mode == "id":
                        g = cur
                    elif mode == "row":
                        g = cur[aux:aux + 1, :]
                    else:
                        g = jnp.dot(in_refs[s_idx][aux], cur,
                                    preferred_element_type=jnp.float32)
                    acc = acc + g * in_refs[wi][t]
                cur = jnp.maximum(acc, 0.0)
            else:                                      # stage output
                out_refs[op[1]][...] = cur

    out_shape = tuple(jax.ShapeDtypeStruct((N, h * w, c), jnp.float32)
                      for (h, w, c) in out_dims)
    out_specs = tuple(pl.BlockSpec((None, h * w, c), lambda i: (i, 0, 0))
                      for (h, w, c) in out_dims)

    outs = pl.pallas_call(
        kernel,
        grid=(N,),                                     # batch-parallel (2 TCs on v7x)
        in_specs=in_specs,
        out_specs=out_specs,
        out_shape=out_shape,
        compiler_params=pltpu.CompilerParams(
            dimension_semantics=("parallel",)),
    )(*flat_inputs)

    # boundary layout fix-up (tiny): (N, H*W, C) -> NCHW
    return tuple(
        jnp.transpose(o.reshape(N, h, w, c), (0, 3, 1, 2))
        for o, (h, w, c) in zip(outs, out_dims))


# ---------------------------------------------------------------------------

if __name__ == "__main__":
    key = jax.random.PRNGKey(0)
    pkey, xkey = jax.random.split(key)
    params = init_params(pkey)
    x = jax.random.normal(xkey, (2, 3, 32, 32), jnp.float32)  # NCHW input

    outs = jax.jit(fdmobilenet_forward)(params, x)
    outs = jax.block_until_ready(outs)

    expected = [(2, 32, 4, 4), (2, 64, 2, 2), (2, 256, 1, 1)]
    assert len(outs) == 3
    for o, es in zip(outs, expected):
        assert o.shape == es, (o.shape, es)
        assert o.dtype == jnp.float32
        assert bool(jnp.all(jnp.isfinite(o)))

    print("KERNEL_OK")
</pallas_src>

<mosaic_0001>
module attributes {stable_mosaic.version = 11 : i64} {
  func.func @kernel(%arg0: i32, %arg1: memref<1x256x27xf32, #tpu.memory_space<vmem>>, %arg2: memref<27x8xf32, #tpu.memory_space<vmem>>, %arg3: memref<1x8xf32, #tpu.memory_space<vmem>>, %arg4: memref<9x64x256xf32, #tpu.memory_space<vmem>>, %arg5: memref<9x1x8xf32, #tpu.memory_space<vmem>>, %arg6: memref<1x8xf32, #tpu.memory_space<vmem>>, %arg7: memref<8x16xf32, #tpu.memory_space<vmem>>, %arg8: memref<1x16xf32, #tpu.memory_space<vmem>>, %arg9: memref<9x16x64xf32, #tpu.memory_space<vmem>>, %arg10: memref<9x1x16xf32, #tpu.memory_space<vmem>>, %arg11: memref<1x16xf32, #tpu.memory_space<vmem>>, %arg12: memref<16x32xf32, #tpu.memory_space<vmem>>, %arg13: memref<1x32xf32, #tpu.memory_space<vmem>>, %arg14: memref<8x16x16xf32, #tpu.memory_space<vmem>>, %arg15: memref<9x1x32xf32, #tpu.memory_space<vmem>>, %arg16: memref<1x32xf32, #tpu.memory_space<vmem>>, %arg17: memref<32x32xf32, #tpu.memory_space<vmem>>, %arg18: memref<1x32xf32, #tpu.memory_space<vmem>>, %arg19: memref<9x4x16xf32, #tpu.memory_space<vmem>>, %arg20: memref<9x1x32xf32, #tpu.memory_space<vmem>>, %arg21: memref<1x32xf32, #tpu.memory_space<vmem>>, %arg22: memref<32x64xf32, #tpu.memory_space<vmem>>, %arg23: memref<1x64xf32, #tpu.memory_space<vmem>>, %arg24: memref<8x4x4xf32, #tpu.memory_space<vmem>>, %arg25: memref<9x1x64xf32, #tpu.memory_space<vmem>>, %arg26: memref<1x64xf32, #tpu.memory_space<vmem>>, %arg27: memref<64x64xf32, #tpu.memory_space<vmem>>, %arg28: memref<1x64xf32, #tpu.memory_space<vmem>>, %arg29: memref<9x1x64xf32, #tpu.memory_space<vmem>>, %arg30: memref<1x64xf32, #tpu.memory_space<vmem>>, %arg31: memref<64x128xf32, #tpu.memory_space<vmem>>, %arg32: memref<1x128xf32, #tpu.memory_space<vmem>>, %arg33: memref<9x1x128xf32, #tpu.memory_space<vmem>>, %arg34: memref<1x128xf32, #tpu.memory_space<vmem>>, %arg35: memref<128x128xf32, #tpu.memory_space<vmem>>, %arg36: memref<1x128xf32, #tpu.memory_space<vmem>>, %arg37: memref<9x1x128xf32, #tpu.memory_space<vmem>>, %arg38: memref<1x128xf32, #tpu.memory_space<vmem>>, %arg39: memref<128x128xf32, #tpu.memory_space<vmem>>, %arg40: memref<1x128xf32, #tpu.memory_space<vmem>>, %arg41: memref<9x1x128xf32, #tpu.memory_space<vmem>>, %arg42: memref<1x128xf32, #tpu.memory_space<vmem>>, %arg43: memref<128x128xf32, #tpu.memory_space<vmem>>, %arg44: memref<1x128xf32, #tpu.memory_space<vmem>>, %arg45: memref<9x1x128xf32, #tpu.memory_space<vmem>>, %arg46: memref<1x128xf32, #tpu.memory_space<vmem>>, %arg47: memref<128x128xf32, #tpu.memory_space<vmem>>, %arg48: memref<1x128xf32, #tpu.memory_space<vmem>>, %arg49: memref<9x1x128xf32, #tpu.memory_space<vmem>>, %arg50: memref<1x128xf32, #tpu.memory_space<vmem>>, %arg51: memref<128x256xf32, #tpu.memory_space<vmem>>, %arg52: memref<1x256xf32, #tpu.memory_space<vmem>>, %arg53: memref<1x16x32xf32, #tpu.memory_space<vmem>>, %arg54: memref<1x4x64xf32, #tpu.memory_space<vmem>>, %arg55: memref<1x1x256xf32, #tpu.memory_space<vmem>>) attributes {dimension_semantics = [#tpu.dimension_semantics<parallel>], iteration_bounds = array<i64: 2>, scalar_prefetch = 0 : i64, scratch_operands = 0 : i64, tpu.core_type = #tpu.core_type<tc>, window_params = [{transform_indices = @transform_0, window_bounds = array<i64: 1, 256, 27>}, {pipeline_mode = #tpu.pipeline_mode<synchronous>, transform_indices = @transform_1, window_bounds = array<i64: 27, 8>}, {pipeline_mode = #tpu.pipeline_mode<synchronous>, transform_indices = @transform_2, window_bounds = array<i64: 1, 8>}, {pipeline_mode = #tpu.pipeline_mode<synchronous>, transform_indices = @transform_3, window_bounds = array<i64: 9, 64, 256>}, {pipeline_mode = #tpu.pipeline_mode<synchronous>, transform_indices = @transform_4, window_bounds = array<i64: 9, 1, 8>}, {pipeline_mode = #tpu.pipeline_mode<synchronous>, transform_indices = @transform_5, window_bounds = array<i64: 1, 8>}, {pipeline_mode = #tpu.pipeline_mode<synchronous>, transform_indices = @transform_6, window_bounds = array<i64: 8, 16>}, {pipeline_mode = #tpu.pipeline_mode<synchronous>, transform_indices = @transform_7, window_bounds = array<i64: 1, 16>}, {pipeline_mode = #tpu.pipeline_mode<synchronous>, transform_indices = @transform_8, window_bounds = array<i64: 9, 16, 64>}, {pipeline_mode = #tpu.pipeline_mode<synchronous>, transform_indices = @transform_9, window_bounds = array<i64: 9, 1, 16>}, {pipeline_mode = #tpu.pipeline_mode<synchronous>, transform_indices = @transform_10, window_bounds = array<i64: 1, 16>}, {pipeline_mode = #tpu.pipeline_mode<synchronous>, transform_indices = @transform_11, window_bounds = array<i64: 16, 32>}, {pipeline_mode = #tpu.pipeline_mode<synchronous>, transform_indices = @transform_12, window_bounds = array<i64: 1, 32>}, {pipeline_mode = #tpu.pipeline_mode<synchronous>, transform_indices = @transform_13, window_bounds = array<i64: 8, 16, 16>}, {pipeline_mode = #tpu.pipeline_mode<synchronous>, transform_indices = @transform_14, window_bounds = array<i64: 9, 1, 32>}, {pipeline_mode = #tpu.pipeline_mode<synchronous>, transform_indices = @transform_15, window_bounds = array<i64: 1, 32>}, {pipeline_mode = #tpu.pipeline_mode<synchronous>, transform_indices = @transform_16, window_bounds = array<i64: 32, 32>}, {pipeline_mode = #tpu.pipeline_mode<synchronous>, transform_indices = @transform_17, window_bounds = array<i64: 1, 32>}, {pipeline_mode = #tpu.pipeline_mode<synchronous>, transform_indices = @transform_18, window_bounds = array<i64: 9, 4, 16>}, {pipeline_mode = #tpu.pipeline_mode<synchronous>, transform_indices = @transform_19, window_bounds = array<i64: 9, 1, 32>}, {pipeline_mode = #tpu.pipeline_mode<synchronous>, transform_indices = @transform_20, window_bounds = array<i64: 1, 32>}, {pipeline_mode = #tpu.pipeline_mode<synchronous>, transform_indices = @transform_21, window_bounds = array<i64: 32, 64>}, {pipeline_mode = #tpu.pipeline_mode<synchronous>, transform_indices = @transform_22, window_bounds = array<i64: 1, 64>}, {pipeline_mode = #tpu.pipeline_mode<synchronous>, transform_indices = @transform_23, window_bounds = array<i64: 8, 4, 4>}, {pipeline_mode = #tpu.pipeline_mode<synchronous>, transform_indices = @transform_24, window_bounds = array<i64: 9, 1, 64>}, {pipeline_mode = #tpu.pipeline_mode<synchronous>, transform_indices = @transform_25, window_bounds = array<i64: 1, 64>}, {pipeline_mode = #tpu.pipeline_mode<synchronous>, transform_indices = @transform_26, window_bounds = array<i64: 64, 64>}, {pipeline_mode = #tpu.pipeline_mode<synchronous>, transform_indices = @transform_27, window_bounds = array<i64: 1, 64>}, {pipeline_mode = #tpu.pipeline_mode<synchronous>, transform_indices = @transform_28, window_bounds = array<i64: 9, 1, 64>}, {pipeline_mode = #tpu.pipeline_mode<synchronous>, transform_indices = @transform_29, window_bounds = array<i64: 1, 64>}, {pipeline_mode = #tpu.pipeline_mode<synchronous>, transform_indices = @transform_30, window_bounds = array<i64: 64, 128>}, {pipeline_mode = #tpu.pipeline_mode<synchronous>, transform_indices = @transform_31, window_bounds = array<i64: 1, 128>}, {pipeline_mode = #tpu.pipeline_mode<synchronous>, transform_indices = @transform_32, window_bounds = array<i64: 9, 1, 128>}, {pipeline_mode = #tpu.pipeline_mode<synchronous>, transform_indices = @transform_33, window_bounds = array<i64: 1, 128>}, {pipeline_mode = #tpu.pipeline_mode<synchronous>, transform_indices = @transform_34, window_bounds = array<i64: 128, 128>}, {pipeline_mode = #tpu.pipeline_mode<synchronous>, transform_indices = @transform_35, window_bounds = array<i64: 1, 128>}, {pipeline_mode = #tpu.pipeline_mode<synchronous>, transform_indices = @transform_36, window_bounds = array<i64: 9, 1, 128>}, {pipeline_mode = #tpu.pipeline_mode<synchronous>, transform_indices = @transform_37, window_bounds = array<i64: 1, 128>}, {pipeline_mode = #tpu.pipeline_mode<synchronous>, transform_indices = @transform_38, window_bounds = array<i64: 128, 128>}, {pipeline_mode = #tpu.pipeline_mode<synchronous>, transform_indices = @transform_39, window_bounds = array<i64: 1, 128>}, {pipeline_mode = #tpu.pipeline_mode<synchronous>, transform_indices = @transform_40, window_bounds = array<i64: 9, 1, 128>}, {pipeline_mode = #tpu.pipeline_mode<synchronous>, transform_indices = @transform_41, window_bounds = array<i64: 1, 128>}, {pipeline_mode = #tpu.pipeline_mode<synchronous>, transform_indices = @transform_42, window_bounds = array<i64: 128, 128>}, {pipeline_mode = #tpu.pipeline_mode<synchronous>, transform_indices = @transform_43, window_bounds = array<i64: 1, 128>}, {pipeline_mode = #tpu.pipeline_mode<synchronous>, transform_indices = @transform_44, window_bounds = array<i64: 9, 1, 128>}, {pipeline_mode = #tpu.pipeline_mode<synchronous>, transform_indices = @transform_45, window_bounds = array<i64: 1, 128>}, {pipeline_mode = #tpu.pipeline_mode<synchronous>, transform_indices = @transform_46, window_bounds = array<i64: 128, 128>}, {pipeline_mode = #tpu.pipeline_mode<synchronous>, transform_indices = @transform_47, window_bounds = array<i64: 1, 128>}, {pipeline_mode = #tpu.pipeline_mode<synchronous>, transform_indices = @transform_48, window_bounds = array<i64: 9, 1, 128>}, {pipeline_mode = #tpu.pipeline_mode<synchronous>, transform_indices = @transform_49, window_bounds = array<i64: 1, 128>}, {pipeline_mode = #tpu.pipeline_mode<synchronous>, transform_indices = @transform_50, window_bounds = array<i64: 128, 256>}, {pipeline_mode = #tpu.pipeline_mode<synchronous>, transform_indices = @transform_51, window_bounds = array<i64: 1, 256>}, {transform_indices = @transform_52, window_bounds = array<i64: 1, 16, 32>}, {transform_indices = @transform_53, window_bounds = array<i64: 1, 4, 64>}, {transform_indices = @transform_54, window_bounds = array<i64: 1, 1, 256>}]} {
    %c0 = arith.constant 0 : index
    %c0_0 = arith.constant 0 : index
    %c0_1 = arith.constant 0 : index
    %0 = vector.load %arg1[%c0, %c0_0, %c0_1] : memref<1x256x27xf32, #tpu.memory_space<vmem>>, vector<1x256x27xf32>
    %1 = vector.shape_cast %0 : vector<1x256x27xf32> to vector<256x27xf32>
    %c0_2 = arith.constant 0 : index
    %c0_3 = arith.constant 0 : index
    %2 = vector.load %arg2[%c0_2, %c0_3] : memref<27x8xf32, #tpu.memory_space<vmem>>, vector<27x8xf32>
    %cst = arith.constant dense<0.000000e+00> : vector<256x8xf32>
    %3 = tpu.matmul %1, %2, %cst {dimension_numbers = #tpu.dot_dimension_numbers<[1], [0], [0], [1], [0, 0, 1, 1], [], []>} : vector<256x27xf32>, vector<27x8xf32>, vector<256x8xf32> -> vector<256x8xf32>
    %c0_4 = arith.constant 0 : index
    %c0_5 = arith.constant 0 : index
    %4 = vector.load %arg3[%c0_4, %c0_5] : memref<1x8xf32, #tpu.memory_space<vmem>>, vector<1x8xf32>
    %5 = vector.broadcast %4 : vector<1x8xf32> to vector<256x8xf32>
    %6 = arith.addf %3, %5 : vector<256x8xf32>
    %cst_6 = arith.constant 0.000000e+00 : f32
    %7 = vector.broadcast %cst_6 : f32 to vector<256x8xf32>
    %8 = arith.maximumf %6, %7 : vector<256x8xf32>
    %c0_7 = arith.constant 0 : index
    %c0_8 = arith.constant 0 : index
    %9 = vector.load %arg6[%c0_7, %c0_8] : memref<1x8xf32, #tpu.memory_space<vmem>>, vector<1x8xf32>
    %10 = vector.shape_cast %9 : vector<1x8xf32> to vector<1x8xf32>
    %11 = vector.broadcast %10 : vector<1x8xf32> to vector<64x8xf32>
    %c0_9 = arith.constant 0 : index
    %c0_10 = arith.constant 0 : index
    %c0_11 = arith.constant 0 : index
    %12 = vector.load %arg4[%c0_9, %c0_10, %c0_11] : memref<9x64x256xf32, #tpu.memory_space<vmem>>, vector<1x64x256xf32>
    %13 = vector.shape_cast %12 : vector<1x64x256xf32> to vector<64x256xf32>
    %cst_12 = arith.constant dense<0.000000e+00> : vector<64x8xf32>
    %14 = tpu.matmul %13, %8, %cst_12 {dimension_numbers = #tpu.dot_dimension_numbers<[1], [0], [0], [1], [0, 0, 1, 1], [], []>} : vector<64x256xf32>, vector<256x8xf32>, vector<64x8xf32> -> vector<64x8xf32>
    %c0_13 = arith.constant 0 : index
    %c0_14 = arith.constant 0 : index
    %c0_15 = arith.constant 0 : index
    %15 = vector.load %arg5[%c0_13, %c0_14, %c0_15] : memref<9x1x8xf32, #tpu.memory_space<vmem>>, vector<1x1x8xf32>
    %16 = vector.shape_cast %15 : vector<1x1x8xf32> to vector<1x8xf32>
    %17 = vector.broadcast %16 : vector<1x8xf32> to vector<64x8xf32>
    %18 = arith.mulf %14, %17 : vector<64x8xf32>
    %19 = arith.addf %11, %18 : vector<64x8xf32>
    %c1 = arith.constant 1 : index
    %c0_16 = arith.constant 0 : index
    %c0_17 = arith.constant 0 : index
    %20 = vector.load %arg4[%c1, %c0_16, %c0_17] : memref<9x64x256xf32, #tpu.memory_space<vmem>>, vector<1x64x256xf32>
    %21 = vector.shape_cast %20 : vector<1x64x256xf32> to vector<64x256xf32>
    %cst_18 = arith.constant dense<0.000000e+00> : vector<64x8xf32>
    %22 = tpu.matmul %21, %8, %cst_18 {dimension_numbers = #tpu.dot_dimension_numbers<[1], [0], [0], [1], [0, 0, 1, 1], [], []>} : vector<64x256xf32>, vector<256x8xf32>, vector<64x8xf32> -> vector<64x8xf32>
    %c1_19 = arith.constant 1 : index
    %c0_20 = arith.constant 0 : index
    %c0_21 = arith.constant 0 : index
    %23 = vector.load %arg5[%c1_19, %c0_20, %c0_21] : memref<9x1x8xf32, #tpu.memory_space<vmem>>, vector<1x1x8xf32>
    %24 = vector.shape_cast %23 : vector<1x1x8xf32> to vector<1x8xf32>
    %25 = vector.broadcast %24 : vector<1x8xf32> to vector<64x8xf32>
    %26 = arith.mulf %22, %25 : vector<64x8xf32>
    %27 = arith.addf %19, %26 : vector<64x8xf32>
    %c2 = arith.constant 2 : index
    %c0_22 = arith.constant 0 : index
    %c0_23 = arith.constant 0 : index
    %28 = vector.load %arg4[%c2, %c0_22, %c0_23] : memref<9x64x256xf32, #tpu.memory_space<vmem>>, vector<1x64x256xf32>
    %29 = vector.shape_cast %28 : vector<1x64x256xf32> to vector<64x256xf32>
    %cst_24 = arith.constant dense<0.000000e+00> : vector<64x8xf32>
    %30 = tpu.matmul %29, %8, %cst_24 {dimension_numbers = #tpu.dot_dimension_numbers<[1], [0], [0], [1], [0, 0, 1, 1], [], []>} : vector<64x256xf32>, vector<256x8xf32>, vector<64x8xf32> -> vector<64x8xf32>
    %c2_25 = arith.constant 2 : index
    %c0_26 = arith.constant 0 : index
    %c0_27 = arith.constant 0 : index
    %31 = vector.load %arg5[%c2_25, %c0_26, %c0_27] : memref<9x1x8xf32, #tpu.memory_space<vmem>>, vector<1x1x8xf32>
    %32 = vector.shape_cast %31 : vector<1x1x8xf32> to vector<1x8xf32>
    %33 = vector.broadcast %32 : vector<1x8xf32> to vector<64x8xf32>
    %34 = arith.mulf %30, %33 : vector<64x8xf32>
    %35 = arith.addf %27, %34 : vector<64x8xf32>
    %c3 = arith.constant 3 : index
    %c0_28 = arith.constant 0 : index
    %c0_29 = arith.constant 0 : index
    %36 = vector.load %arg4[%c3, %c0_28, %c0_29] : memref<9x64x256xf32, #tpu.memory_space<vmem>>, vector<1x64x256xf32>
    %37 = vector.shape_cast %36 : vector<1x64x256xf32> to vector<64x256xf32>
    %cst_30 = arith.constant dense<0.000000e+00> : vector<64x8xf32>
    %38 = tpu.matmul %37, %8, %cst_30 {dimension_numbers = #tpu.dot_dimension_numbers<[1], [0], [0], [1], [0, 0, 1, 1], [], []>} : vector<64x256xf32>, vector<256x8xf32>, vector<64x8xf32> -> vector<64x8xf32>
    %c3_31 = arith.constant 3 : index
    %c0_32 = arith.constant 0 : index
    %c0_33 = arith.constant 0 : index
    %39 = vector.load %arg5[%c3_31, %c0_32, %c0_33] : memref<9x1x8xf32, #tpu.memory_space<vmem>>, vector<1x1x8xf32>
    %40 = vector.shape_cast %39 : vector<1x1x8xf32> to vector<1x8xf32>
    %41 = vector.broadcast %40 : vector<1x8xf32> to vector<64x8xf32>
    %42 = arith.mulf %38, %41 : vector<64x8xf32>
    %43 = arith.addf %35, %42 : vector<64x8xf32>
    %c4 = arith.constant 4 : index
    %c0_34 = arith.constant 0 : index
    %c0_35 = arith.constant 0 : index
    %44 = vector.load %arg4[%c4, %c0_34, %c0_35] : memref<9x64x256xf32, #tpu.memory_space<vmem>>, vector<1x64x256xf32>
    %45 = vector.shape_cast %44 : vector<1x64x256xf32> to vector<64x256xf32>
    %cst_36 = arith.constant dense<0.000000e+00> : vector<64x8xf32>
    %46 = tpu.matmul %45, %8, %cst_36 {dimension_numbers = #tpu.dot_dimension_numbers<[1], [0], [0], [1], [0, 0, 1, 1], [], []>} : vector<64x256xf32>, vector<256x8xf32>, vector<64x8xf32> -> vector<64x8xf32>
    %c4_37 = arith.constant 4 : index
    %c0_38 = arith.constant 0 : index
    %c0_39 = arith.constant 0 : index
    %47 = vector.load %arg5[%c4_37, %c0_38, %c0_39] : memref<9x1x8xf32, #tpu.memory_space<vmem>>, vector<1x1x8xf32>
    %48 = vector.shape_cast %47 : vector<1x1x8xf32> to vector<1x8xf32>
    %49 = vector.broadcast %48 : vector<1x8xf32> to vector<64x8xf32>
    %50 = arith.mulf %46, %49 : vector<64x8xf32>
    %51 = arith.addf %43, %50 : vector<64x8xf32>
    %c5 = arith.constant 5 : index
    %c0_40 = arith.constant 0 : index
    %c0_41 = arith.constant 0 : index
    %52 = vector.load %arg4[%c5, %c0_40, %c0_41] : memref<9x64x256xf32, #tpu.memory_space<vmem>>, vector<1x64x256xf32>
    %53 = vector.shape_cast %52 : vector<1x64x256xf32> to vector<64x256xf32>
    %cst_42 = arith.constant dense<0.000000e+00> : vector<64x8xf32>
    %54 = tpu.matmul %53, %8, %cst_42 {dimension_numbers = #tpu.dot_dimension_numbers<[1], [0], [0], [1], [0, 0, 1, 1], [], []>} : vector<64x256xf32>, vector<256x8xf32>, vector<64x8xf32> -> vector<64x8xf32>
    %c5_43 = arith.constant 5 : index
    %c0_44 = arith.constant 0 : index
    %c0_45 = arith.constant 0 : index
    %55 = vector.load %arg5[%c5_43, %c0_44, %c0_45] : memref<9x1x8xf32, #tpu.memory_space<vmem>>, vector<1x1x8xf32>
    %56 = vector.shape_cast %55 : vector<1x1x8xf32> to vector<1x8xf32>
    %57 = vector.broadcast %56 : vector<1x8xf32> to vector<64x8xf32>
    %58 = arith.mulf %54, %57 : vector<64x8xf32>
    %59 = arith.addf %51, %58 : vector<64x8xf32>
    %c6 = arith.constant 6 : index
    %c0_46 = arith.constant 0 : index
    %c0_47 = arith.constant 0 : index
    %60 = vector.load %arg4[%c6, %c0_46, %c0_47] : memref<9x64x256xf32, #tpu.memory_space<vmem>>, vector<1x64x256xf32>
    %61 = vector.shape_cast %60 : vector<1x64x256xf32> to vector<64x256xf32>
    %cst_48 = arith.constant dense<0.000000e+00> : vector<64x8xf32>
    %62 = tpu.matmul %61, %8, %cst_48 {dimension_numbers = #tpu.dot_dimension_numbers<[1], [0], [0], [1], [0, 0, 1, 1], [], []>} : vector<64x256xf32>, vector<256x8xf32>, vector<64x8xf32> -> vector<64x8xf32>
    %c6_49 = arith.constant 6 : index
    %c0_50 = arith.constant 0 : index
    %c0_51 = arith.constant 0 : index
    %63 = vector.load %arg5[%c6_49, %c0_50, %c0_51] : memref<9x1x8xf32, #tpu.memory_space<vmem>>, vector<1x1x8xf32>
    %64 = vector.shape_cast %63 : vector<1x1x8xf32> to vector<1x8xf32>
    %65 = vector.broadcast %64 : vector<1x8xf32> to vector<64x8xf32>
    %66 = arith.mulf %62, %65 : vector<64x8xf32>
    %67 = arith.addf %59, %66 : vector<64x8xf32>
    %c7 = arith.constant 7 : index
    %c0_52 = arith.constant 0 : index
    %c0_53 = arith.constant 0 : index
    %68 = vector.load %arg4[%c7, %c0_52, %c0_53] : memref<9x64x256xf32, #tpu.memory_space<vmem>>, vector<1x64x256xf32>
    %69 = vector.shape_cast %68 : vector<1x64x256xf32> to vector<64x256xf32>
    %cst_54 = arith.constant dense<0.000000e+00> : vector<64x8xf32>
    %70 = tpu.matmul %69, %8, %cst_54 {dimension_numbers = #tpu.dot_dimension_numbers<[1], [0], [0], [1], [0, 0, 1, 1], [], []>} : vector<64x256xf32>, vector<256x8xf32>, vector<64x8xf32> -> vector<64x8xf32>
    %c7_55 = arith.constant 7 : index
    %c0_56 = arith.constant 0 : index
    %c0_57 = arith.constant 0 : index
    %71 = vector.load %arg5[%c7_55, %c0_56, %c0_57] : memref<9x1x8xf32, #tpu.memory_space<vmem>>, vector<1x1x8xf32>
    %72 = vector.shape_cast %71 : vector<1x1x8xf32> to vector<1x8xf32>
    %73 = vector.broadcast %72 : vector<1x8xf32> to vector<64x8xf32>
    %74 = arith.mulf %70, %73 : vector<64x8xf32>
    %75 = arith.addf %67, %74 : vector<64x8xf32>
    %c8 = arith.constant 8 : index
    %c0_58 = arith.constant 0 : index
    %c0_59 = arith.constant 0 : index
    %76 = vector.load %arg4[%c8, %c0_58, %c0_59] : memref<9x64x256xf32, #tpu.memory_space<vmem>>, vector<1x64x256xf32>
    %77 = vector.shape_cast %76 : vector<1x64x256xf32> to vector<64x256xf32>
    %cst_60 = arith.constant dense<0.000000e+00> : vector<64x8xf32>
    %78 = tpu.matmul %77, %8, %cst_60 {dimension_numbers = #tpu.dot_dimension_numbers<[1], [0], [0], [1], [0, 0, 1, 1], [], []>} : vector<64x256xf32>, vector<256x8xf32>, vector<64x8xf32> -> vector<64x8xf32>
    %c8_61 = arith.constant 8 : index
    %c0_62 = arith.constant 0 : index
    %c0_63 = arith.constant 0 : index
    %79 = vector.load %arg5[%c8_61, %c0_62, %c0_63] : memref<9x1x8xf32, #tpu.memory_space<vmem>>, vector<1x1x8xf32>
    %80 = vector.shape_cast %79 : vector<1x1x8xf32> to vector<1x8xf32>
    %81 = vector.broadcast %80 : vector<1x8xf32> to vector<64x8xf32>
    %82 = arith.mulf %78, %81 : vector<64x8xf32>
    %83 = arith.addf %75, %82 : vector<64x8xf32>
    %cst_64 = arith.constant 0.000000e+00 : f32
    %84 = vector.broadcast %cst_64 : f32 to vector<64x8xf32>
    %85 = arith.maximumf %83, %84 : vector<64x8xf32>
    %c0_65 = arith.constant 0 : index
    %c0_66 = arith.constant 0 : index
    %86 = vector.load %arg7[%c0_65, %c0_66] : memref<8x16xf32, #tpu.memory_space<vmem>>, vector<8x16xf32>
    %cst_67 = arith.constant dense<0.000000e+00> : vector<64x16xf32>
    %87 = tpu.matmul %85, %86, %cst_67 {dimension_numbers = #tpu.dot_dimension_numbers<[1], [0], [0], [1], [0, 0, 1, 1], [], []>} : vector<64x8xf32>, vector<8x16xf32>, vector<64x16xf32> -> vector<64x16xf32>
    %c0_68 = arith.constant 0 : index
    %c0_69 = arith.constant 0 : index
    %88 = vector.load %arg8[%c0_68, %c0_69] : memref<1x16xf32, #tpu.memory_space<vmem>>, vector<1x16xf32>
    %89 = vector.broadcast %88 : vector<1x16xf32> to vector<64x16xf32>
    %90 = arith.addf %87, %89 : vector<64x16xf32>
    %cst_70 = arith.constant 0.000000e+00 : f32
    %91 = vector.broadcast %cst_70 : f32 to vector<64x16xf32>
    %92 = arith.maximumf %90, %91 : vector<64x16xf32>
    %c0_71 = arith.constant 0 : index
    %c0_72 = arith.constant 0 : index
    %93 = vector.load %arg11[%c0_71, %c0_72] : memref<1x16xf32, #tpu.memory_space<vmem>>, vector<1x16xf32>
    %94 = vector.shape_cast %93 : vector<1x16xf32> to vector<1x16xf32>
    %95 = vector.broadcast %94 : vector<1x16xf32> to vector<16x16xf32>
    %c0_73 = arith.constant 0 : index
    %c0_74 = arith.constant 0 : index
    %c0_75 = arith.constant 0 : index
    %96 = vector.load %arg9[%c0_73, %c0_74, %c0_75] : memref<9x16x64xf32, #tpu.memory_space<vmem>>, vector<1x16x64xf32>
    %97 = vector.shape_cast %96 : vector<1x16x64xf32> to vector<16x64xf32>
    %cst_76 = arith.constant dense<0.000000e+00> : vector<16x16xf32>
    %98 = tpu.matmul %97, %92, %cst_76 {dimension_numbers = #tpu.dot_dimension_numbers<[1], [0], [0], [1], [0, 0, 1, 1], [], []>} : vector<16x64xf32>, vector<64x16xf32>, vector<16x16xf32> -> vector<16x16xf32>
    %c0_77 = arith.constant 0 : index
    %c0_78 = arith.constant 0 : index
    %c0_79 = arith.constant 0 : index
    %99 = vector.load %arg10[%c0_77, %c0_78, %c0_79] : memref<9x1x16xf32, #tpu.memory_space<vmem>>, vector<1x1x16xf32>
    %100 = vector.shape_cast %99 : vector<1x1x16xf32> to vector<1x16xf32>
    %101 = vector.broadcast %100 : vector<1x16xf32> to vector<16x16xf32>
    %102 = arith.mulf %98, %101 : vector<16x16xf32>
    %103 = arith.addf %95, %102 : vector<16x16xf32>
    %c1_80 = arith.constant 1 : index
    %c0_81 = arith.constant 0 : index
    %c0_82 = arith.constant 0 : index
    %104 = vector.load %arg9[%c1_80, %c0_81, %c0_82] : memref<9x16x64xf32, #tpu.memory_space<vmem>>, vector<1x16x64xf32>
    %105 = vector.shape_cast %104 : vector<1x16x64xf32> to vector<16x64xf32>
    %cst_83 = arith.constant dense<0.000000e+00> : vector<16x16xf32>
    %106 = tpu.matmul %105, %92, %cst_83 {dimension_numbers = #tpu.dot_dimension_numbers<[1], [0], [0], [1], [0, 0, 1, 1], [], []>} : vector<16x64xf32>, vector<64x16xf32>, vector<16x16xf32> -> vector<16x16xf32>
    %c1_84 = arith.constant 1 : index
    %c0_85 = arith.constant 0 : index
    %c0_86 = arith.constant 0 : index
    %107 = vector.load %arg10[%c1_84, %c0_85, %c0_86] : memref<9x1x16xf32, #tpu.memory_space<vmem>>, vector<1x1x16xf32>
    %108 = vector.shape_cast %107 : vector<1x1x16xf32> to vector<1x16xf32>
    %109 = vector.broadcast %108 : vector<1x16xf32> to vector<16x16xf32>
    %110 = arith.mulf %106, %109 : vector<16x16xf32>
    %111 = arith.addf %103, %110 : vector<16x16xf32>
    %c2_87 = arith.constant 2 : index
    %c0_88 = arith.constant 0 : index
    %c0_89 = arith.constant 0 : index
    %112 = vector.load %arg9[%c2_87, %c0_88, %c0_89] : memref<9x16x64xf32, #tpu.memory_space<vmem>>, vector<1x16x64xf32>
    %113 = vector.shape_cast %112 : vector<1x16x64xf32> to vector<16x64xf32>
    %cst_90 = arith.constant dense<0.000000e+00> : vector<16x16xf32>
    %114 = tpu.matmul %113, %92, %cst_90 {dimension_numbers = #tpu.dot_dimension_numbers<[1], [0], [0], [1], [0, 0, 1, 1], [], []>} : vector<16x64xf32>, vector<64x16xf32>, vector<16x16xf32> -> vector<16x16xf32>
    %c2_91 = arith.constant 2 : index
    %c0_92 = arith.constant 0 : index
    %c0_93 = arith.constant 0 : index
    %115 = vector.load %arg10[%c2_91, %c0_92, %c0_93] : memref<9x1x16xf32, #tpu.memory_space<vmem>>, vector<1x1x16xf32>
    %116 = vector.shape_cast %115 : vector<1x1x16xf32> to vector<1x16xf32>
    %117 = vector.broadcast %116 : vector<1x16xf32> to vector<16x16xf32>
    %118 = arith.mulf %114, %117 : vector<16x16xf32>
    %119 = arith.addf %111, %118 : vector<16x16xf32>
    %c3_94 = arith.constant 3 : index
    %c0_95 = arith.constant 0 : index
    %c0_96 = arith.constant 0 : index
    %120 = vector.load %arg9[%c3_94, %c0_95, %c0_96] : memref<9x16x64xf32, #tpu.memory_space<vmem>>, vector<1x16x64xf32>
    %121 = vector.shape_cast %120 : vector<1x16x64xf32> to vector<16x64xf32>
    %cst_97 = arith.constant dense<0.000000e+00> : vector<16x16xf32>
    %122 = tpu.matmul %121, %92, %cst_97 {dimension_numbers = #tpu.dot_dimension_numbers<[1], [0], [0], [1], [0, 0, 1, 1], [], []>} : vector<16x64xf32>, vector<64x16xf32>, vector<16x16xf32> -> vector<16x16xf32>
    %c3_98 = arith.constant 3 : index
    %c0_99 = arith.constant 0 : index
    %c0_100 = arith.constant 0 : index
    %123 = vector.load %arg10[%c3_98, %c0_99, %c0_100] : memref<9x1x16xf32, #tpu.memory_space<vmem>>, vector<1x1x16xf32>
    %124 = vector.shape_cast %123 : vector<1x1x16xf32> to vector<1x16xf32>
    %125 = vector.broadcast %124 : vector<1x16xf32> to vector<16x16xf32>
    %126 = arith.mulf %122, %125 : vector<16x16xf32>
    %127 = arith.addf %119, %126 : vector<16x16xf32>
    %c4_101 = arith.constant 4 : index
    %c0_102 = arith.constant 0 : index
    %c0_103 = arith.constant 0 : index
    %128 = vector.load %arg9[%c4_101, %c0_102, %c0_103] : memref<9x16x64xf32, #tpu.memory_space<vmem>>, vector<1x16x64xf32>
    %129 = vector.shape_cast %128 : vector<1x16x64xf32> to vector<16x64xf32>
    %cst_104 = arith.constant dense<0.000000e+00> : vector<16x16xf32>
    %130 = tpu.matmul %129, %92, %cst_104 {dimension_numbers = #tpu.dot_dimension_numbers<[1], [0], [0], [1], [0, 0, 1, 1], [], []>} : vector<16x64xf32>, vector<64x16xf32>, vector<16x16xf32> -> vector<16x16xf32>
    %c4_105 = arith.constant 4 : index
    %c0_106 = arith.constant 0 : index
    %c0_107 = arith.constant 0 : index
    %131 = vector.load %arg10[%c4_105, %c0_106, %c0_107] : memref<9x1x16xf32, #tpu.memory_space<vmem>>, vector<1x1x16xf32>
    %132 = vector.shape_cast %131 : vector<1x1x16xf32> to vector<1x16xf32>
    %133 = vector.broadcast %132 : vector<1x16xf32> to vector<16x16xf32>
    %134 = arith.mulf %130, %133 : vector<16x16xf32>
    %135 = arith.addf %127, %134 : vector<16x16xf32>
    %c5_108 = arith.constant 5 : index
    %c0_109 = arith.constant 0 : index
    %c0_110 = arith.constant 0 : index
    %136 = vector.load %arg9[%c5_108, %c0_109, %c0_110] : memref<9x16x64xf32, #tpu.memory_space<vmem>>, vector<1x16x64xf32>
    %137 = vector.shape_cast %136 : vector<1x16x64xf32> to vector<16x64xf32>
    %cst_111 = arith.constant dense<0.000000e+00> : vector<16x16xf32>
    %138 = tpu.matmul %137, %92, %cst_111 {dimension_numbers = #tpu.dot_dimension_numbers<[1], [0], [0], [1], [0, 0, 1, 1], [], []>} : vector<16x64xf32>, vector<64x16xf32>, vector<16x16xf32> -> vector<16x16xf32>
    %c5_112 = arith.constant 5 : index
    %c0_113 = arith.constant 0 : index
    %c0_114 = arith.constant 0 : index
    %139 = vector.load %arg10[%c5_112, %c0_113, %c0_114] : memref<9x1x16xf32, #tpu.memory_space<vmem>>, vector<1x1x16xf32>
    %140 = vector.shape_cast %139 : vector<1x1x16xf32> to vector<1x16xf32>
    %141 = vector.broadcast %140 : vector<1x16xf32> to vector<16x16xf32>
    %142 = arith.mulf %138, %141 : vector<16x16xf32>
    %143 = arith.addf %135, %142 : vector<16x16xf32>
    %c6_115 = arith.constant 6 : index
    %c0_116 = arith.constant 0 : index
    %c0_117 = arith.constant 0 : index
    %144 = vector.load %arg9[%c6_115, %c0_116, %c0_117] : memref<9x16x64xf32, #tpu.memory_space<vmem>>, vector<1x16x64xf32>
    %145 = vector.shape_cast %144 : vector<1x16x64xf32> to vector<16x64xf32>
    %cst_118 = arith.constant dense<0.000000e+00> : vector<16x16xf32>
    %146 = tpu.matmul %145, %92, %cst_118 {dimension_numbers = #tpu.dot_dimension_numbers<[1], [0], [0], [1], [0, 0, 1, 1], [], []>} : vector<16x64xf32>, vector<64x16xf32>, vector<16x16xf32> -> vector<16x16xf32>
    %c6_119 = arith.constant 6 : index
    %c0_120 = arith.constant 0 : index
    %c0_121 = arith.constant 0 : index
    %147 = vector.load %arg10[%c6_119, %c0_120, %c0_121] : memref<9x1x16xf32, #tpu.memory_space<vmem>>, vector<1x1x16xf32>
    %148 = vector.shape_cast %147 : vector<1x1x16xf32> to vector<1x16xf32>
    %149 = vector.broadcast %148 : vector<1x16xf32> to vector<16x16xf32>
    %150 = arith.mulf %146, %149 : vector<16x16xf32>
    %151 = arith.addf %143, %150 : vector<16x16xf32>
    %c7_122 = arith.constant 7 : index
    %c0_123 = arith.constant 0 : index
    %c0_124 = arith.constant 0 : index
    %152 = vector.load %arg9[%c7_122, %c0_123, %c0_124] : memref<9x16x64xf32, #tpu.memory_space<vmem>>, vector<1x16x64xf32>
    %153 = vector.shape_cast %152 : vector<1x16x64xf32> to vector<16x64xf32>
    %cst_125 = arith.constant dense<0.000000e+00> : vector<16x16xf32>
    %154 = tpu.matmul %153, %92, %cst_125 {dimension_numbers = #tpu.dot_dimension_numbers<[1], [0], [0], [1], [0, 0, 1, 1], [], []>} : vector<16x64xf32>, vector<64x16xf32>, vector<16x16xf32> -> vector<16x16xf32>
    %c7_126 = arith.constant 7 : index
    %c0_127 = arith.constant 0 : index
    %c0_128 = arith.constant 0 : index
    %155 = vector.load %arg10[%c7_126, %c0_127, %c0_128] : memref<9x1x16xf32, #tpu.memory_space<vmem>>, vector<1x1x16xf32>
    %156 = vector.shape_cast %155 : vector<1x1x16xf32> to vector<1x16xf32>
    %157 = vector.broadcast %156 : vector<1x16xf32> to vector<16x16xf32>
    %158 = arith.mulf %154, %157 : vector<16x16xf32>
    %159 = arith.addf %151, %158 : vector<16x16xf32>
    %c8_129 = arith.constant 8 : index
    %c0_130 = arith.constant 0 : index
    %c0_131 = arith.constant 0 : index
    %160 = vector.load %arg9[%c8_129, %c0_130, %c0_131] : memref<9x16x64xf32, #tpu.memory_space<vmem>>, vector<1x16x64xf32>
    %161 = vector.shape_cast %160 : vector<1x16x64xf32> to vector<16x64xf32>
    %cst_132 = arith.constant dense<0.000000e+00> : vector<16x16xf32>
    %162 = tpu.matmul %161, %92, %cst_132 {dimension_numbers = #tpu.dot_dimension_numbers<[1], [0], [0], [1], [0, 0, 1, 1], [], []>} : vector<16x64xf32>, vector<64x16xf32>, vector<16x16xf32> -> vector<16x16xf32>
    %c8_133 = arith.constant 8 : index
    %c0_134 = arith.constant 0 : index
    %c0_135 = arith.constant 0 : index
    %163 = vector.load %arg10[%c8_133, %c0_134, %c0_135] : memref<9x1x16xf32, #tpu.memory_space<vmem>>, vector<1x1x16xf32>
    %164 = vector.shape_cast %163 : vector<1x1x16xf32> to vector<1x16xf32>
    %165 = vector.broadcast %164 : vector<1x16xf32> to vector<16x16xf32>
    %166 = arith.mulf %162, %165 : vector<16x16xf32>
    %167 = arith.addf %159, %166 : vector<16x16xf32>
    %cst_136 = arith.constant 0.000000e+00 : f32
    %168 = vector.broadcast %cst_136 : f32 to vector<16x16xf32>
    %169 = arith.maximumf %167, %168 : vector<16x16xf32>
    %c0_137 = arith.constant 0 : index
    %c0_138 = arith.constant 0 : index
    %170 = vector.load %arg12[%c0_137, %c0_138] : memref<16x32xf32, #tpu.memory_space<vmem>>, vector<16x32xf32>
    %cst_139 = arith.constant dense<0.000000e+00> : vector<16x32xf32>
    %171 = tpu.matmul %169, %170, %cst_139 {dimension_numbers = #tpu.dot_dimension_numbers<[1], [0], [0], [1], [0, 0, 1, 1], [], []>} : vector<16x16xf32>, vector<16x32xf32>, vector<16x32xf32> -> vector<16x32xf32>
    %c0_140 = arith.constant 0 : index
    %c0_141 = arith.constant 0 : index
    %172 = vector.load %arg13[%c0_140, %c0_141] : memref<1x32xf32, #tpu.memory_space<vmem>>, vector<1x32xf32>
    %173 = vector.broadcast %172 : vector<1x32xf32> to vector<16x32xf32>
    %174 = arith.addf %171, %173 : vector<16x32xf32>
    %cst_142 = arith.constant 0.000000e+00 : f32
    %175 = vector.broadcast %cst_142 : f32 to vector<16x32xf32>
    %176 = arith.maximumf %174, %175 : vector<16x32xf32>
    %c0_143 = arith.constant 0 : index
    %c0_144 = arith.constant 0 : index
    %177 = vector.load %arg16[%c0_143, %c0_144] : memref<1x32xf32, #tpu.memory_space<vmem>>, vector<1x32xf32>
    %178 = vector.shape_cast %177 : vector<1x32xf32> to vector<1x32xf32>
    %179 = vector.broadcast %178 : vector<1x32xf32> to vector<16x32xf32>
    %c0_145 = arith.constant 0 : index
    %c0_146 = arith.constant 0 : index
    %c0_147 = arith.constant 0 : index
    %180 = vector.load %arg14[%c0_145, %c0_146, %c0_147] : memref<8x16x16xf32, #tpu.memory_space<vmem>>, vector<1x16x16xf32>
    %181 = vector.shape_cast %180 : vector<1x16x16xf32> to vector<16x16xf32>
    %cst_148 = arith.constant dense<0.000000e+00> : vector<16x32xf32>
    %182 = tpu.matmul %181, %176, %cst_148 {dimension_numbers = #tpu.dot_dimension_numbers<[1], [0], [0], [1], [0, 0, 1, 1], [], []>} : vector<16x16xf32>, vector<16x32xf32>, vector<16x32xf32> -> vector<16x32xf32>
    %c0_149 = arith.constant 0 : index
    %c0_150 = arith.constant 0 : index
    %c0_151 = arith.constant 0 : index
    %183 = vector.load %arg15[%c0_149, %c0_150, %c0_151] : memref<9x1x32xf32, #tpu.memory_space<vmem>>, vector<1x1x32xf32>
    %184 = vector.shape_cast %183 : vector<1x1x32xf32> to vector<1x32xf32>
    %185 = vector.broadcast %184 : vector<1x32xf32> to vector<16x32xf32>
    %186 = arith.mulf %182, %185 : vector<16x32xf32>
    %187 = arith.addf %179, %186 : vector<16x32xf32>
    %c1_152 = arith.constant 1 : index
    %c0_153 = arith.constant 0 : index
    %c0_154 = arith.constant 0 : index
    %188 = vector.load %arg14[%c1_152, %c0_153, %c0_154] : memref<8x16x16xf32, #tpu.memory_space<vmem>>, vector<1x16x16xf32>
    %189 = vector.shape_cast %188 : vector<1x16x16xf32> to vector<16x16xf32>
    %cst_155 = arith.constant dense<0.000000e+00> : vector<16x32xf32>
    %190 = tpu.matmul %189, %176, %cst_155 {dimension_numbers = #tpu.dot_dimension_numbers<[1], [0], [0], [1], [0, 0, 1, 1], [], []>} : vector<16x16xf32>, vector<16x32xf32>, vector<16x32xf32> -> vector<16x32xf32>
    %c1_156 = arith.constant 1 : index
    %c0_157 = arith.constant 0 : index
    %c0_158 = arith.constant 0 : index
    %191 = vector.load %arg15[%c1_156, %c0_157, %c0_158] : memref<9x1x32xf32, #tpu.memory_space<vmem>>, vector<1x1x32xf32>
    %192 = vector.shape_cast %191 : vector<1x1x32xf32> to vector<1x32xf32>
    %193 = vector.broadcast %192 : vector<1x32xf32> to vector<16x32xf32>
    %194 = arith.mulf %190, %193 : vector<16x32xf32>
    %195 = arith.addf %187, %194 : vector<16x32xf32>
    %c2_159 = arith.constant 2 : index
    %c0_160 = arith.constant 0 : index
    %c0_161 = arith.constant 0 : index
    %196 = vector.load %arg14[%c2_159, %c0_160, %c0_161] : memref<8x16x16xf32, #tpu.memory_space<vmem>>, vector<1x16x16xf32>
    %197 = vector.shape_cast %196 : vector<1x16x16xf32> to vector<16x16xf32>
    %cst_162 = arith.constant dense<0.000000e+00> : vector<16x32xf32>
    %198 = tpu.matmul %197, %176, %cst_162 {dimension_numbers = #tpu.dot_dimension_numbers<[1], [0], [0], [1], [0, 0, 1, 1], [], []>} : vector<16x16xf32>, vector<16x32xf32>, vector<16x32xf32> -> vector<16x32xf32>
    %c2_163 = arith.constant 2 : index
    %c0_164 = arith.constant 0 : index
    %c0_165 = arith.constant 0 : index
    %199 = vector.load %arg15[%c2_163, %c0_164, %c0_165] : memref<9x1x32xf32, #tpu.memory_space<vmem>>, vector<1x1x32xf32>
    %200 = vector.shape_cast %199 : vector<1x1x32xf32> to vector<1x32xf32>
    %201 = vector.broadcast %200 : vector<1x32xf32> to vector<16x32xf32>
    %202 = arith.mulf %198, %201 : vector<16x32xf32>
    %203 = arith.addf %195, %202 : vector<16x32xf32>
    %c3_166 = arith.constant 3 : index
    %c0_167 = arith.constant 0 : index
    %c0_168 = arith.constant 0 : index
    %204 = vector.load %arg14[%c3_166, %c0_167, %c0_168] : memref<8x16x16xf32, #tpu.memory_space<vmem>>, vector<1x16x16xf32>
    %205 = vector.shape_cast %204 : vector<1x16x16xf32> to vector<16x16xf32>
    %cst_169 = arith.constant dense<0.000000e+00> : vector<16x32xf32>
    %206 = tpu.matmul %205, %176, %cst_169 {dimension_numbers = #tpu.dot_dimension_numbers<[1], [0], [0], [1], [0, 0, 1, 1], [], []>} : vector<16x16xf32>, vector<16x32xf32>, vector<16x32xf32> -> vector<16x32xf32>
    %c3_170 = arith.constant 3 : index
    %c0_171 = arith.constant 0 : index
    %c0_172 = arith.constant 0 : index
    %207 = vector.load %arg15[%c3_170, %c0_171, %c0_172] : memref<9x1x32xf32, #tpu.memory_space<vmem>>, vector<1x1x32xf32>
    %208 = vector.shape_cast %207 : vector<1x1x32xf32> to vector<1x32xf32>
    %209 = vector.broadcast %208 : vector<1x32xf32> to vector<16x32xf32>
    %210 = arith.mulf %206, %209 : vector<16x32xf32>
    %211 = arith.addf %203, %210 : vector<16x32xf32>
    %c4_173 = arith.constant 4 : index
    %c0_174 = arith.constant 0 : index
    %c0_175 = arith.constant 0 : index
    %212 = vector.load %arg15[%c4_173, %c0_174, %c0_175] : memref<9x1x32xf32, #tpu.memory_space<vmem>>, vector<1x1x32xf32>
    %213 = vector.shape_cast %212 : vector<1x1x32xf32> to vector<1x32xf32>
    %214 = vector.broadcast %213 : vector<1x32xf32> to vector<16x32xf32>
    %215 = arith.mulf %176, %214 : vector<16x32xf32>
    %216 = arith.addf %211, %215 : vector<16x32xf32>
    %c4_176 = arith.constant 4 : index
    %c0_177 = arith.constant 0 : index
    %c0_178 = arith.constant 0 : index
    %217 = vector.load %arg14[%c4_176, %c0_177, %c0_178] : memref<8x16x16xf32, #tpu.memory_space<vmem>>, vector<1x16x16xf32>
    %218 = vector.shape_cast %217 : vector<1x16x16xf32> to vector<16x16xf32>
    %cst_179 = arith.constant dense<0.000000e+00> : vector<16x32xf32>
    %219 = tpu.matmul %218, %176, %cst_179 {dimension_numbers = #tpu.dot_dimension_numbers<[1], [0], [0], [1], [0, 0, 1, 1], [], []>} : vector<16x16xf32>, vector<16x32xf32>, vector<16x32xf32> -> vector<16x32xf32>
    %c5_180 = arith.constant 5 : index
    %c0_181 = arith.constant 0 : index
    %c0_182 = arith.constant 0 : index
    %220 = vector.load %arg15[%c5_180, %c0_181, %c0_182] : memref<9x1x32xf32, #tpu.memory_space<vmem>>, vector<1x1x32xf32>
    %221 = vector.shape_cast %220 : vector<1x1x32xf32> to vector<1x32xf32>
    %222 = vector.broadcast %221 : vector<1x32xf32> to vector<16x32xf32>
    %223 = arith.mulf %219, %222 : vector<16x32xf32>
    %224 = arith.addf %216, %223 : vector<16x32xf32>
    %c5_183 = arith.constant 5 : index
    %c0_184 = arith.constant 0 : index
    %c0_185 = arith.constant 0 : index
    %225 = vector.load %arg14[%c5_183, %c0_184, %c0_185] : memref<8x16x16xf32, #tpu.memory_space<vmem>>, vector<1x16x16xf32>
    %226 = vector.shape_cast %225 : vector<1x16x16xf32> to vector<16x16xf32>
    %cst_186 = arith.constant dense<0.000000e+00> : vector<16x32xf32>
    %227 = tpu.matmul %226, %176, %cst_186 {dimension_numbers = #tpu.dot_dimension_numbers<[1], [0], [0], [1], [0, 0, 1, 1], [], []>} : vector<16x16xf32>, vector<16x32xf32>, vector<16x32xf32> -> vector<16x32xf32>
    %c6_187 = arith.constant 6 : index
    %c0_188 = arith.constant 0 : index
    %c0_189 = arith.constant 0 : index
    %228 = vector.load %arg15[%c6_187, %c0_188, %c0_189] : memref<9x1x32xf32, #tpu.memory_space<vmem>>, vector<1x1x32xf32>
    %229 = vector.shape_cast %228 : vector<1x1x32xf32> to vector<1x32xf32>
    %230 = vector.broadcast %229 : vector<1x32xf32> to vector<16x32xf32>
    %231 = arith.mulf %227, %230 : vector<16x32xf32>
    %232 = arith.addf %224, %231 : vector<16x32xf32>
    %c6_190 = arith.constant 6 : index
    %c0_191 = arith.constant 0 : index
    %c0_192 = arith.constant 0 : index
    %233 = vector.load %arg14[%c6_190, %c0_191, %c0_192] : memref<8x16x16xf32, #tpu.memory_space<vmem>>, vector<1x16x16xf32>
    %234 = vector.shape_cast %233 : vector<1x16x16xf32> to vector<16x16xf32>
    %cst_193 = arith.constant dense<0.000000e+00> : vector<16x32xf32>
    %235 = tpu.matmul %234, %176, %cst_193 {dimension_numbers = #tpu.dot_dimension_numbers<[1], [0], [0], [1], [0, 0, 1, 1], [], []>} : vector<16x16xf32>, vector<16x32xf32>, vector<16x32xf32> -> vector<16x32xf32>
    %c7_194 = arith.constant 7 : index
    %c0_195 = arith.constant 0 : index
    %c0_196 = arith.constant 0 : index
    %236 = vector.load %arg15[%c7_194, %c0_195, %c0_196] : memref<9x1x32xf32, #tpu.memory_space<vmem>>, vector<1x1x32xf32>
    %237 = vector.shape_cast %236 : vector<1x1x32xf32> to vector<1x32xf32>
    %238 = vector.broadcast %237 : vector<1x32xf32> to vector<16x32xf32>
    %239 = arith.mulf %235, %238 : vector<16x32xf32>
    %240 = arith.addf %232, %239 : vector<16x32xf32>
    %c7_197 = arith.constant 7 : index
    %c0_198 = arith.constant 0 : index
    %c0_199 = arith.constant 0 : index
    %241 = vector.load %arg14[%c7_197, %c0_198, %c0_199] : memref<8x16x16xf32, #tpu.memory_space<vmem>>, vector<1x16x16xf32>
    %242 = vector.shape_cast %241 : vector<1x16x16xf32> to vector<16x16xf32>
    %cst_200 = arith.constant dense<0.000000e+00> : vector<16x32xf32>
    %243 = tpu.matmul %242, %176, %cst_200 {dimension_numbers = #tpu.dot_dimension_numbers<[1], [0], [0], [1], [0, 0, 1, 1], [], []>} : vector<16x16xf32>, vector<16x32xf32>, vector<16x32xf32> -> vector<16x32xf32>
    %c8_201 = arith.constant 8 : index
    %c0_202 = arith.constant 0 : index
    %c0_203 = arith.constant 0 : index
    %244 = vector.load %arg15[%c8_201, %c0_202, %c0_203] : memref<9x1x32xf32, #tpu.memory_space<vmem>>, vector<1x1x32xf32>
    %245 = vector.shape_cast %244 : vector<1x1x32xf32> to vector<1x32xf32>
    %246 = vector.broadcast %245 : vector<1x32xf32> to vector<16x32xf32>
    %247 = arith.mulf %243, %246 : vector<16x32xf32>
    %248 = arith.addf %240, %247 : vector<16x32xf32>
    %cst_204 = arith.constant 0.000000e+00 : f32
    %249 = vector.broadcast %cst_204 : f32 to vector<16x32xf32>
    %250 = arith.maximumf %248, %249 : vector<16x32xf32>
    %c0_205 = arith.constant 0 : index
    %c0_206 = arith.constant 0 : index
    %251 = vector.load %arg17[%c0_205, %c0_206] : memref<32x32xf32, #tpu.memory_space<vmem>>, vector<32x32xf32>
    %cst_207 = arith.constant dense<0.000000e+00> : vector<16x32xf32>
    %252 = tpu.matmul %250, %251, %cst_207 {dimension_numbers = #tpu.dot_dimension_numbers<[1], [0], [0], [1], [0, 0, 1, 1], [], []>} : vector<16x32xf32>, vector<32x32xf32>, vector<16x32xf32> -> vector<16x32xf32>
    %c0_208 = arith.constant 0 : index
    %c0_209 = arith.constant 0 : index
    %253 = vector.load %arg18[%c0_208, %c0_209] : memref<1x32xf32, #tpu.memory_space<vmem>>, vector<1x32xf32>
    %254 = vector.broadcast %253 : vector<1x32xf32> to vector<16x32xf32>
    %255 = arith.addf %252, %254 : vector<16x32xf32>
    %cst_210 = arith.constant 0.000000e+00 : f32
    %256 = vector.broadcast %cst_210 : f32 to vector<16x32xf32>
    %257 = arith.maximumf %255, %256 : vector<16x32xf32>
    %c0_211 = arith.constant 0 : index
    %c0_212 = arith.constant 0 : index
    %c0_213 = arith.constant 0 : index
    %258 = vector.load %arg53[%c0_211, %c0_212, %c0_213] : memref<1x16x32xf32, #tpu.memory_space<vmem>>, vector<1x16x32xf32>
    %259 = vector.shape_cast %258 : vector<1x16x32xf32> to vector<16x32xf32>
    %260 = vector.shape_cast %257 : vector<16x32xf32> to vector<1x16x32xf32>
    tpu.vector_store %arg53[%c0_211, %c0_212, %c0_213], %260 {strides = array<i32>} : memref<1x16x32xf32, #tpu.memory_space<vmem>>, vector<1x16x32xf32>,
    %c0_214 = arith.constant 0 : index
    %c0_215 = arith.constant 0 : index
    %261 = vector.load %arg21[%c0_214, %c0_215] : memref<1x32xf32, #tpu.memory_space<vmem>>, vector<1x32xf32>
    %262 = vector.shape_cast %261 : vector<1x32xf32> to vector<1x32xf32>
    %263 = vector.broadcast %262 : vector<1x32xf32> to vector<4x32xf32>
    %c0_216 = arith.constant 0 : index
    %c0_217 = arith.constant 0 : index
    %c0_218 = arith.constant 0 : index
    %264 = vector.load %arg19[%c0_216, %c0_217, %c0_218] : memref<9x4x16xf32, #tpu.memory_space<vmem>>, vector<1x4x16xf32>
    %265 = vector.shape_cast %264 : vector<1x4x16xf32> to vector<4x16xf32>
    %cst_219 = arith.constant dense<0.000000e+00> : vector<4x32xf32>
    %266 = tpu.matmul %265, %257, %cst_219 {dimension_numbers = #tpu.dot_dimension_numbers<[1], [0], [0], [1], [0, 0, 1, 1], [], []>} : vector<4x16xf32>, vector<16x32xf32>, vector<4x32xf32> -> vector<4x32xf32>
    %c0_220 = arith.constant 0 : index
    %c0_221 = arith.constant 0 : index
    %c0_222 = arith.constant 0 : index
    %267 = vector.load %arg20[%c0_220, %c0_221, %c0_222] : memref<9x1x32xf32, #tpu.memory_space<vmem>>, vector<1x1x32xf32>
    %268 = vector.shape_cast %267 : vector<1x1x32xf32> to vector<1x32xf32>
    %269 = vector.broadcast %268 : vector<1x32xf32> to vector<4x32xf32>
    %270 = arith.mulf %266, %269 : vector<4x32xf32>
    %271 = arith.addf %263, %270 : vector<4x32xf32>
    %c1_223 = arith.constant 1 : index
    %c0_224 = arith.constant 0 : index
    %c0_225 = arith.constant 0 : index
    %272 = vector.load %arg19[%c1_223, %c0_224, %c0_225] : memref<9x4x16xf32, #tpu.memory_space<vmem>>, vector<1x4x16xf32>
    %273 = vector.shape_cast %272 : vector<1x4x16xf32> to vector<4x16xf32>
    %cst_226 = arith.constant dense<0.000000e+00> : vector<4x32xf32>
    %274 = tpu.matmul %273, %257, %cst_226 {dimension_numbers = #tpu.dot_dimension_numbers<[1], [0], [0], [1], [0, 0, 1, 1], [], []>} : vector<4x16xf32>, vector<16x32xf32>, vector<4x32xf32> -> vector<4x32xf32>
    %c1_227 = arith.constant 1 : index
    %c0_228 = arith.constant 0 : index
    %c0_229 = arith.constant 0 : index
    %275 = vector.load %arg20[%c1_227, %c0_228, %c0_229] : memref<9x1x32xf32, #tpu.memory_space<vmem>>, vector<1x1x32xf32>
    %276 = vector.shape_cast %275 : vector<1x1x32xf32> to vector<1x32xf32>
    %277 = vector.broadcast %276 : vector<1x32xf32> to vector<4x32xf32>
    %278 = arith.mulf %274, %277 : vector<4x32xf32>
    %279 = arith.addf %271, %278 : vector<4x32xf32>
    %c2_230 = arith.constant 2 : index
    %c0_231 = arith.constant 0 : index
    %c0_232 = arith.constant 0 : index
    %280 = vector.load %arg19[%c2_230, %c0_231, %c0_232] : memref<9x4x16xf32, #tpu.memory_space<vmem>>, vector<1x4x16xf32>
    %281 = vector.shape_cast %280 : vector<1x4x16xf32> to vector<4x16xf32>
    %cst_233 = arith.constant dense<0.000000e+00> : vector<4x32xf32>
    %282 = tpu.matmul %281, %257, %cst_233 {dimension_numbers = #tpu.dot_dimension_numbers<[1], [0], [0], [1], [0, 0, 1, 1], [], []>} : vector<4x16xf32>, vector<16x32xf32>, vector<4x32xf32> -> vector<4x32xf32>
    %c2_234 = arith.constant 2 : index
    %c0_235 = arith.constant 0 : index
    %c0_236 = arith.constant 0 : index
    %283 = vector.load %arg20[%c2_234, %c0_235, %c0_236] : memref<9x1x32xf32, #tpu.memory_space<vmem>>, vector<1x1x32xf32>
    %284 = vector.shape_cast %283 : vector<1x1x32xf32> to vector<1x32xf32>
    %285 = vector.broadcast %284 : vector<1x32xf32> to vector<4x32xf32>
    %286 = arith.mulf %282, %285 : vector<4x32xf32>
    %287 = arith.addf %279, %286 : vector<4x32xf32>
    %c3_237 = arith.constant 3 : index
    %c0_238 = arith.constant 0 : index
    %c0_239 = arith.constant 0 : index
    %288 = vector.load %arg19[%c3_237, %c0_238, %c0_239] : memref<9x4x16xf32, #tpu.memory_space<vmem>>, vector<1x4x16xf32>
    %289 = vector.shape_cast %288 : vector<1x4x16xf32> to vector<4x16xf32>
    %cst_240 = arith.constant dense<0.000000e+00> : vector<4x32xf32>
    %290 = tpu.matmul %289, %257, %cst_240 {dimension_numbers = #tpu.dot_dimension_numbers<[1], [0], [0], [1], [0, 0, 1, 1], [], []>} : vector<4x16xf32>, vector<16x32xf32>, vector<4x32xf32> -> vector<4x32xf32>
    %c3_241 = arith.constant 3 : index
    %c0_242 = arith.constant 0 : index
    %c0_243 = arith.constant 0 : index
    %291 = vector.load %arg20[%c3_241, %c0_242, %c0_243] : memref<9x1x32xf32, #tpu.memory_space<vmem>>, vector<1x1x32xf32>
    %292 = vector.shape_cast %291 : vector<1x1x32xf32> to vector<1x32xf32>
    %293 = vector.broadcast %292 : vector<1x32xf32> to vector<4x32xf32>
    %294 = arith.mulf %290, %293 : vector<4x32xf32>
    %295 = arith.addf %287, %294 : vector<4x32xf32>
    %c4_244 = arith.constant 4 : index
    %c0_245 = arith.constant 0 : index
    %c0_246 = arith.constant 0 : index
    %296 = vector.load %arg19[%c4_244, %c0_245, %c0_246] : memref<9x4x16xf32, #tpu.memory_space<vmem>>, vector<1x4x16xf32>
    %297 = vector.shape_cast %296 : vector<1x4x16xf32> to vector<4x16xf32>
    %cst_247 = arith.constant dense<0.000000e+00> : vector<4x32xf32>
    %298 = tpu.matmul %297, %257, %cst_247 {dimension_numbers = #tpu.dot_dimension_numbers<[1], [0], [0], [1], [0, 0, 1, 1], [], []>} : vector<4x16xf32>, vector<16x32xf32>, vector<4x32xf32> -> vector<4x32xf32>
    %c4_248 = arith.constant 4 : index
    %c0_249 = arith.constant 0 : index
    %c0_250 = arith.constant 0 : index
    %299 = vector.load %arg20[%c4_248, %c0_249, %c0_250] : memref<9x1x32xf32, #tpu.memory_space<vmem>>, vector<1x1x32xf32>
    %300 = vector.shape_cast %299 : vector<1x1x32xf32> to vector<1x32xf32>
    %301 = vector.broadcast %300 : vector<1x32xf32> to vector<4x32xf32>
    %302 = arith.mulf %298, %301 : vector<4x32xf32>
    %303 = arith.addf %295, %302 : vector<4x32xf32>
    %c5_251 = arith.constant 5 : index
    %c0_252 = arith.constant 0 : index
    %c0_253 = arith.constant 0 : index
    %304 = vector.load %arg19[%c5_251, %c0_252, %c0_253] : memref<9x4x16xf32, #tpu.memory_space<vmem>>, vector<1x4x16xf32>
    %305 = vector.shape_cast %304 : vector<1x4x16xf32> to vector<4x16xf32>
    %cst_254 = arith.constant dense<0.000000e+00> : vector<4x32xf32>
    %306 = tpu.matmul %305, %257, %cst_254 {dimension_numbers = #tpu.dot_dimension_numbers<[1], [0], [0], [1], [0, 0, 1, 1], [], []>} : vector<4x16xf32>, vector<16x32xf32>, vector<4x32xf32> -> vector<4x32xf32>
    %c5_255 = arith.constant 5 : index
    %c0_256 = arith.constant 0 : index
    %c0_257 = arith.constant 0 : index
    %307 = vector.load %arg20[%c5_255, %c0_256, %c0_257] : memref<9x1x32xf32, #tpu.memory_space<vmem>>, vector<1x1x32xf32>
    %308 = vector.shape_cast %307 : vector<1x1x32xf32> to vector<1x32xf32>
    %309 = vector.broadcast %308 : vector<1x32xf32> to vector<4x32xf32>
    %310 = arith.mulf %306, %309 : vector<4x32xf32>
    %311 = arith.addf %303, %310 : vector<4x32xf32>
    %c6_258 = arith.constant 6 : index
    %c0_259 = arith.constant 0 : index
    %c0_260 = arith.constant 0 : index
    %312 = vector.load %arg19[%c6_258, %c0_259, %c0_260] : memref<9x4x16xf32, #tpu.memory_space<vmem>>, vector<1x4x16xf32>
    %313 = vector.shape_cast %312 : vector<1x4x16xf32> to vector<4x16xf32>
    %cst_261 = arith.constant dense<0.000000e+00> : vector<4x32xf32>
    %314 = tpu.matmul %313, %257, %cst_261 {dimension_numbers = #tpu.dot_dimension_numbers<[1], [0], [0], [1], [0, 0, 1, 1], [], []>} : vector<4x16xf32>, vector<16x32xf32>, vector<4x32xf32> -> vector<4x32xf32>
    %c6_262 = arith.constant 6 : index
    %c0_263 = arith.constant 0 : index
    %c0_264 = arith.constant 0 : index
    %315 = vector.load %arg20[%c6_262, %c0_263, %c0_264] : memref<9x1x32xf32, #tpu.memory_space<vmem>>, vector<1x1x32xf32>
    %316 = vector.shape_cast %315 : vector<1x1x32xf32> to vector<1x32xf32>
    %317 = vector.broadcast %316 : vector<1x32xf32> to vector<4x32xf32>
    %318 = arith.mulf %314, %317 : vector<4x32xf32>
    %319 = arith.addf %311, %318 : vector<4x32xf32>
    %c7_265 = arith.constant 7 : index
    %c0_266 = arith.constant 0 : index
    %c0_267 = arith.constant 0 : index
    %320 = vector.load %arg19[%c7_265, %c0_266, %c0_267] : memref<9x4x16xf32, #tpu.memory_space<vmem>>, vector<1x4x16xf32>
    %321 = vector.shape_cast %320 : vector<1x4x16xf32> to vector<4x16xf32>
    %cst_268 = arith.constant dense<0.000000e+00> : vector<4x32xf32>
    %322 = tpu.matmul %321, %257, %cst_268 {dimension_numbers = #tpu.dot_dimension_numbers<[1], [0], [0], [1], [0, 0, 1, 1], [], []>} : vector<4x16xf32>, vector<16x32xf32>, vector<4x32xf32> -> vector<4x32xf32>
    %c7_269 = arith.constant 7 : index
    %c0_270 = arith.constant 0 : index
    %c0_271 = arith.constant 0 : index
    %323 = vector.load %arg20[%c7_269, %c0_270, %c0_271] : memref<9x1x32xf32, #tpu.memory_space<vmem>>, vector<1x1x32xf32>
    %324 = vector.shape_cast %323 : vector<1x1x32xf32> to vector<1x32xf32>
    %325 = vector.broadcast %324 : vector<1x32xf32> to vector<4x32xf32>
    %326 = arith.mulf %322, %325 : vector<4x32xf32>
    %327 = arith.addf %319, %326 : vector<4x32xf32>
    %c8_272 = arith.constant 8 : index
    %c0_273 = arith.constant 0 : index
    %c0_274 = arith.constant 0 : index
    %328 = vector.load %arg19[%c8_272, %c0_273, %c0_274] : memref<9x4x16xf32, #tpu.memory_space<vmem>>, vector<1x4x16xf32>
    %329 = vector.shape_cast %328 : vector<1x4x16xf32> to vector<4x16xf32>
    %cst_275 = arith.constant dense<0.000000e+00> : vector<4x32xf32>
    %330 = tpu.matmul %329, %257, %cst_275 {dimension_numbers = #tpu.dot_dimension_numbers<[1], [0], [0], [1], [0, 0, 1, 1], [], []>} : vector<4x16xf32>, vector<16x32xf32>, vector<4x32xf32> -> vector<4x32xf32>
    %c8_276 = arith.constant 8 : index
    %c0_277 = arith.constant 0 : index
    %c0_278 = arith.constant 0 : index
    %331 = vector.load %arg20[%c8_276, %c0_277, %c0_278] : memref<9x1x32xf32, #tpu.memory_space<vmem>>, vector<1x1x32xf32>
    %332 = vector.shape_cast %331 : vector<1x1x32xf32> to vector<1x32xf32>
    %333 = vector.broadcast %332 : vector<1x32xf32> to vector<4x32xf32>
    %334 = arith.mulf %330, %333 : vector<4x32xf32>
    %335 = arith.addf %327, %334 : vector<4x32xf32>
    %cst_279 = arith.constant 0.000000e+00 : f32
    %336 = vector.broadcast %cst_279 : f32 to vector<4x32xf32>
    %337 = arith.maximumf %335, %336 : vector<4x32xf32>
    %c0_280 = arith.constant 0 : index
    %c0_281 = arith.constant 0 : index
    %338 = vector.load %arg22[%c0_280, %c0_281] : memref<32x64xf32, #tpu.memory_space<vmem>>, vector<32x64xf32>
    %cst_282 = arith.constant dense<0.000000e+00> : vector<4x64xf32>
    %339 = tpu.matmul %337, %338, %cst_282 {dimension_numbers = #tpu.dot_dimension_numbers<[1], [0], [0], [1], [0, 0, 1, 1], [], []>} : vector<4x32xf32>, vector<32x64xf32>, vector<4x64xf32> -> vector<4x64xf32>
    %c0_283 = arith.constant 0 : index
    %c0_284 = arith.constant 0 : index
    %340 = vector.load %arg23[%c0_283, %c0_284] : memref<1x64xf32, #tpu.memory_space<vmem>>, vector<1x64xf32>
    %341 = vector.broadcast %340 : vector<1x64xf32> to vector<4x64xf32>
    %342 = arith.addf %339, %341 : vector<4x64xf32>
    %cst_285 = arith.constant 0.000000e+00 : f32
    %343 = vector.broadcast %cst_285 : f32 to vector<4x64xf32>
    %344 = arith.maximumf %342, %343 : vector<4x64xf32>
    %c0_286 = arith.constant 0 : index
    %c0_287 = arith.constant 0 : index
    %345 = vector.load %arg26[%c0_286, %c0_287] : memref<1x64xf32, #tpu.memory_space<vmem>>, vector<1x64xf32>
    %346 = vector.shape_cast %345 : vector<1x64xf32> to vector<1x64xf32>
    %347 = vector.broadcast %346 : vector<1x64xf32> to vector<4x64xf32>
    %c0_288 = arith.constant 0 : index
    %c0_289 = arith.constant 0 : index
    %c0_290 = arith.constant 0 : index
    %348 = vector.load %arg24[%c0_288, %c0_289, %c0_290] : memref<8x4x4xf32, #tpu.memory_space<vmem>>, vector<1x4x4xf32>
    %349 = vector.shape_cast %348 : vector<1x4x4xf32> to vector<4x4xf32>
    %cst_291 = arith.constant dense<0.000000e+00> : vector<4x64xf32>
    %350 = tpu.matmul %349, %344, %cst_291 {dimension_numbers = #tpu.dot_dimension_numbers<[1], [0], [0], [1], [0, 0, 1, 1], [], []>} : vector<4x4xf32>, vector<4x64xf32>, vector<4x64xf32> -> vector<4x64xf32>
    %c0_292 = arith.constant 0 : index
    %c0_293 = arith.constant 0 : index
    %c0_294 = arith.constant 0 : index
    %351 = vector.load %arg25[%c0_292, %c0_293, %c0_294] : memref<9x1x64xf32, #tpu.memory_space<vmem>>, vector<1x1x64xf32>
    %352 = vector.shape_cast %351 : vector<1x1x64xf32> to vector<1x64xf32>
    %353 = vector.broadcast %352 : vector<1x64xf32> to vector<4x64xf32>
    %354 = arith.mulf %350, %353 : vector<4x64xf32>
    %355 = arith.addf %347, %354 : vector<4x64xf32>
    %c1_295 = arith.constant 1 : index
    %c0_296 = arith.constant 0 : index
    %c0_297 = arith.constant 0 : index
    %356 = vector.load %arg24[%c1_295, %c0_296, %c0_297] : memref<8x4x4xf32, #tpu.memory_space<vmem>>, vector<1x4x4xf32>
    %357 = vector.shape_cast %356 : vector<1x4x4xf32> to vector<4x4xf32>
    %cst_298 = arith.constant dense<0.000000e+00> : vector<4x64xf32>
    %358 = tpu.matmul %357, %344, %cst_298 {dimension_numbers = #tpu.dot_dimension_numbers<[1], [0], [0], [1], [0, 0, 1, 1], [], []>} : vector<4x4xf32>, vector<4x64xf32>, vector<4x64xf32> -> vector<4x64xf32>
    %c1_299 = arith.constant 1 : index
    %c0_300 = arith.constant 0 : index
    %c0_301 = arith.constant 0 : index
    %359 = vector.load %arg25[%c1_299, %c0_300, %c0_301] : memref<9x1x64xf32, #tpu.memory_space<vmem>>, vector<1x1x64xf32>
    %360 = vector.shape_cast %359 : vector<1x1x64xf32> to vector<1x64xf32>
    %361 = vector.broadcast %360 : vector<1x64xf32> to vector<4x64xf32>
    %362 = arith.mulf %358, %361 : vector<4x64xf32>
    %363 = arith.addf %355, %362 : vector<4x64xf32>
    %c2_302 = arith.constant 2 : index
    %c0_303 = arith.constant 0 : index
    %c0_304 = arith.constant 0 : index
    %364 = vector.load %arg24[%c2_302, %c0_303, %c0_304] : memref<8x4x4xf32, #tpu.memory_space<vmem>>, vector<1x4x4xf32>
    %365 = vector.shape_cast %364 : vector<1x4x4xf32> to vector<4x4xf32>
    %cst_305 = arith.constant dense<0.000000e+00> : vector<4x64xf32>
    %366 = tpu.matmul %365, %344, %cst_305 {dimension_numbers = #tpu.dot_dimension_numbers<[1], [0], [0], [1], [0, 0, 1, 1], [], []>} : vector<4x4xf32>, vector<4x64xf32>, vector<4x64xf32> -> vector<4x64xf32>
    %c2_306 = arith.constant 2 : index
    %c0_307 = arith.constant 0 : index
    %c0_308 = arith.constant 0 : index
    %367 = vector.load %arg25[%c2_306, %c0_307, %c0_308] : memref<9x1x64xf32, #tpu.memory_space<vmem>>, vector<1x1x64xf32>
    %368 = vector.shape_cast %367 : vector<1x1x64xf32> to vector<1x64xf32>
    %369 = vector.broadcast %368 : vector<1x64xf32> to vector<4x64xf32>
    %370 = arith.mulf %366, %369 : vector<4x64xf32>
    %371 = arith.addf %363, %370 : vector<4x64xf32>
    %c3_309 = arith.constant 3 : index
    %c0_310 = arith.constant 0 : index
    %c0_311 = arith.constant 0 : index
    %372 = vector.load %arg24[%c3_309, %c0_310, %c0_311] : memref<8x4x4xf32, #tpu.memory_space<vmem>>, vector<1x4x4xf32>
    %373 = vector.shape_cast %372 : vector<1x4x4xf32> to vector<4x4xf32>
    %cst_312 = arith.constant dense<0.000000e+00> : vector<4x64xf32>
    %374 = tpu.matmul %373, %344, %cst_312 {dimension_numbers = #tpu.dot_dimension_numbers<[1], [0], [0], [1], [0, 0, 1, 1], [], []>} : vector<4x4xf32>, vector<4x64xf32>, vector<4x64xf32> -> vector<4x64xf32>
    %c3_313 = arith.constant 3 : index
    %c0_314 = arith.constant 0 : index
    %c0_315 = arith.constant 0 : index
    %375 = vector.load %arg25[%c3_313, %c0_314, %c0_315] : memref<9x1x64xf32, #tpu.memory_space<vmem>>, vector<1x1x64xf32>
    %376 = vector.shape_cast %375 : vector<1x1x64xf32> to vector<1x64xf32>
    %377 = vector.broadcast %376 : vector<1x64xf32> to vector<4x64xf32>
    %378 = arith.mulf %374, %377 : vector<4x64xf32>
    %379 = arith.addf %371, %378 : vector<4x64xf32>
    %c4_316 = arith.constant 4 : index
    %c0_317 = arith.constant 0 : index
    %c0_318 = arith.constant 0 : index
    %380 = vector.load %arg25[%c4_316, %c0_317, %c0_318] : memref<9x1x64xf32, #tpu.memory_space<vmem>>, vector<1x1x64xf32>
    %381 = vector.shape_cast %380 : vector<1x1x64xf32> to vector<1x64xf32>
    %382 = vector.broadcast %381 : vector<1x64xf32> to vector<4x64xf32>
    %383 = arith.mulf %344, %382 : vector<4x64xf32>
    %384 = arith.addf %379, %383 : vector<4x64xf32>
    %c4_319 = arith.constant 4 : index
    %c0_320 = arith.constant 0 : index
    %c0_321 = arith.constant 0 : index
    %385 = vector.load %arg24[%c4_319, %c0_320, %c0_321] : memref<8x4x4xf32, #tpu.memory_space<vmem>>, vector<1x4x4xf32>
    %386 = vector.shape_cast %385 : vector<1x4x4xf32> to vector<4x4xf32>
    %cst_322 = arith.constant dense<0.000000e+00> : vector<4x64xf32>
    %387 = tpu.matmul %386, %344, %cst_322 {dimension_numbers = #tpu.dot_dimension_numbers<[1], [0], [0], [1], [0, 0, 1, 1], [], []>} : vector<4x4xf32>, vector<4x64xf32>, vector<4x64xf32> -> vector<4x64xf32>
    %c5_323 = arith.constant 5 : index
    %c0_324 = arith.constant 0 : index
    %c0_325 = arith.constant 0 : index
    %388 = vector.load %arg25[%c5_323, %c0_324, %c0_325] : memref<9x1x64xf32, #tpu.memory_space<vmem>>, vector<1x1x64xf32>
    %389 = vector.shape_cast %388 : vector<1x1x64xf32> to vector<1x64xf32>
    %390 = vector.broadcast %389 : vector<1x64xf32> to vector<4x64xf32>
    %391 = arith.mulf %387, %390 : vector<4x64xf32>
    %392 = arith.addf %384, %391 : vector<4x64xf32>
    %c5_326 = arith.constant 5 : index
    %c0_327 = arith.constant 0 : index
    %c0_328 = arith.constant 0 : index
    %393 = vector.load %arg24[%c5_326, %c0_327, %c0_328] : memref<8x4x4xf32, #tpu.memory_space<vmem>>, vector<1x4x4xf32>
    %394 = vector.shape_cast %393 : vector<1x4x4xf32> to vector<4x4xf32>
    %cst_329 = arith.constant dense<0.000000e+00> : vector<4x64xf32>
    %395 = tpu.matmul %394, %344, %cst_329 {dimension_numbers = #tpu.dot_dimension_numbers<[1], [0], [0], [1], [0, 0, 1, 1], [], []>} : vector<4x4xf32>, vector<4x64xf32>, vector<4x64xf32> -> vector<4x64xf32>
    %c6_330 = arith.constant 6 : index
    %c0_331 = arith.constant 0 : index
    %c0_332 = arith.constant 0 : index
    %396 = vector.load %arg25[%c6_330, %c0_331, %c0_332] : memref<9x1x64xf32, #tpu.memory_space<vmem>>, vector<1x1x64xf32>
    %397 = vector.shape_cast %396 : vector<1x1x64xf32> to vector<1x64xf32>
    %398 = vector.broadcast %397 : vector<1x64xf32> to vector<4x64xf32>
    %399 = arith.mulf %395, %398 : vector<4x64xf32>
    %400 = arith.addf %392, %399 : vector<4x64xf32>
    %c6_333 = arith.constant 6 : index
    %c0_334 = arith.constant 0 : index
    %c0_335 = arith.constant 0 : index
    %401 = vector.load %arg24[%c6_333, %c0_334, %c0_335] : memref<8x4x4xf32, #tpu.memory_space<vmem>>, vector<1x4x4xf32>
    %402 = vector.shape_cast %401 : vector<1x4x4xf32> to vector<4x4xf32>
    %cst_336 = arith.constant dense<0.000000e+00> : vector<4x64xf32>
    %403 = tpu.matmul %402, %344, %cst_336 {dimension_numbers = #tpu.dot_dimension_numbers<[1], [0], [0], [1], [0, 0, 1, 1], [], []>} : vector<4x4xf32>, vector<4x64xf32>, vector<4x64xf32> -> vector<4x64xf32>
    %c7_337 = arith.constant 7 : index
    %c0_338 = arith.constant 0 : index
    %c0_339 = arith.constant 0 : index
    %404 = vector.load %arg25[%c7_337, %c0_338, %c0_339] : memref<9x1x64xf32, #tpu.memory_space<vmem>>, vector<1x1x64xf32>
    %405 = vector.shape_cast %404 : vector<1x1x64xf32> to vector<1x64xf32>
    %406 = vector.broadcast %405 : vector<1x64xf32> to vector<4x64xf32>
    %407 = arith.mulf %403, %406 : vector<4x64xf32>
    %408 = arith.addf %400, %407 : vector<4x64xf32>
    %c7_340 = arith.constant 7 : index
    %c0_341 = arith.constant 0 : index
    %c0_342 = arith.constant 0 : index
    %409 = vector.load %arg24[%c7_340, %c0_341, %c0_342] : memref<8x4x4xf32, #tpu.memory_space<vmem>>, vector<1x4x4xf32>
    %410 = vector.shape_cast %409 : vector<1x4x4xf32> to vector<4x4xf32>
    %cst_343 = arith.constant dense<0.000000e+00> : vector<4x64xf32>
    %411 = tpu.matmul %410, %344, %cst_343 {dimension_numbers = #tpu.dot_dimension_numbers<[1], [0], [0], [1], [0, 0, 1, 1], [], []>} : vector<4x4xf32>, vector<4x64xf32>, vector<4x64xf32> -> vector<4x64xf32>
    %c8_344 = arith.constant 8 : index
    %c0_345 = arith.constant 0 : index
    %c0_346 = arith.constant 0 : index
    %412 = vector.load %arg25[%c8_344, %c0_345, %c0_346] : memref<9x1x64xf32, #tpu.memory_space<vmem>>, vector<1x1x64xf32>
    %413 = vector.shape_cast %412 : vector<1x1x64xf32> to vector<1x64xf32>
    %414 = vector.broadcast %413 : vector<1x64xf32> to vector<4x64xf32>
    %415 = arith.mulf %411, %414 : vector<4x64xf32>
    %416 = arith.addf %408, %415 : vector<4x64xf32>
    %cst_347 = arith.constant 0.000000e+00 : f32
    %417 = vector.broadcast %cst_347 : f32 to vector<4x64xf32>
    %418 = arith.maximumf %416, %417 : vector<4x64xf32>
    %c0_348 = arith.constant 0 : index
    %c0_349 = arith.constant 0 : index
    %419 = vector.load %arg27[%c0_348, %c0_349] : memref<64x64xf32, #tpu.memory_space<vmem>>, vector<64x64xf32>
    %cst_350 = arith.constant dense<0.000000e+00> : vector<4x64xf32>
    %420 = tpu.matmul %418, %419, %cst_350 {dimension_numbers = #tpu.dot_dimension_numbers<[1], [0], [0], [1], [0, 0, 1, 1], [], []>} : vector<4x64xf32>, vector<64x64xf32>, vector<4x64xf32> -> vector<4x64xf32>
    %c0_351 = arith.constant 0 : index
    %c0_352 = arith.constant 0 : index
    %421 = vector.load %arg28[%c0_351, %c0_352] : memref<1x64xf32, #tpu.memory_space<vmem>>, vector<1x64xf32>
    %422 = vector.broadcast %421 : vector<1x64xf32> to vector<4x64xf32>
    %423 = arith.addf %420, %422 : vector<4x64xf32>
    %cst_353 = arith.constant 0.000000e+00 : f32
    %424 = vector.broadcast %cst_353 : f32 to vector<4x64xf32>
    %425 = arith.maximumf %423, %424 : vector<4x64xf32>
    %c0_354 = arith.constant 0 : index
    %c0_355 = arith.constant 0 : index
    %c0_356 = arith.constant 0 : index
    %426 = vector.load %arg54[%c0_354, %c0_355, %c0_356] : memref<1x4x64xf32, #tpu.memory_space<vmem>>, vector<1x4x64xf32>
    %427 = vector.shape_cast %426 : vector<1x4x64xf32> to vector<4x64xf32>
    %428 = vector.shape_cast %425 : vector<4x64xf32> to vector<1x4x64xf32>
    tpu.vector_store %arg54[%c0_354, %c0_355, %c0_356], %428 {strides = array<i32>} : memref<1x4x64xf32, #tpu.memory_space<vmem>>, vector<1x4x64xf32>,
    %c0_357 = arith.constant 0 : index
    %c0_358 = arith.constant 0 : index
    %429 = vector.load %arg30[%c0_357, %c0_358] : memref<1x64xf32, #tpu.memory_space<vmem>>, vector<1x64xf32>
    %430 = vector.extract_strided_slice %425 {offsets = [0, 0], sizes = [1, 64], strides = [1, 1]} : vector<4x64xf32> to vector<1x64xf32>
    %c4_359 = arith.constant 4 : index
    %c0_360 = arith.constant 0 : index
    %c0_361 = arith.constant 0 : index
    %431 = vector.load %arg29[%c4_359, %c0_360, %c0_361] : memref<9x1x64xf32, #tpu.memory_space<vmem>>, vector<1x1x64xf32>
    %432 = vector.shape_cast %431 : vector<1x1x64xf32> to vector<1x64xf32>
    %433 = arith.mulf %430, %432 : vector<1x64xf32>
    %434 = arith.addf %429, %433 : vector<1x64xf32>
    %435 = vector.extract_strided_slice %425 {offsets = [1, 0], sizes = [1, 64], strides = [1, 1]} : vector<4x64xf32> to vector<1x64xf32>
    %c5_362 = arith.constant 5 : index
    %c0_363 = arith.constant 0 : index
    %c0_364 = arith.constant 0 : index
    %436 = vector.load %arg29[%c5_362, %c0_363, %c0_364] : memref<9x1x64xf32, #tpu.memory_space<vmem>>, vector<1x1x64xf32>
    %437 = vector.shape_cast %436 : vector<1x1x64xf32> to vector<1x64xf32>
    %438 = arith.mulf %435, %437 : vector<1x64xf32>
    %439 = arith.addf %434, %438 : vector<1x64xf32>
    %440 = vector.extract_strided_slice %425 {offsets = [2, 0], sizes = [1, 64], strides = [1, 1]} : vector<4x64xf32> to vector<1x64xf32>
    %c7_365 = arith.constant 7 : index
    %c0_366 = arith.constant 0 : index
    %c0_367 = arith.constant 0 : index
    %441 = vector.load %arg29[%c7_365, %c0_366, %c0_367] : memref<9x1x64xf32, #tpu.memory_space<vmem>>, vector<1x1x64xf32>
    %442 = vector.shape_cast %441 : vector<1x1x64xf32> to vector<1x64xf32>
    %443 = arith.mulf %440, %442 : vector<1x64xf32>
    %444 = arith.addf %439, %443 : vector<1x64xf32>
    %445 = vector.extract_strided_slice %425 {offsets = [3, 0], sizes = [1, 64], strides = [1, 1]} : vector<4x64xf32> to vector<1x64xf32>
    %c8_368 = arith.constant 8 : index
    %c0_369 = arith.constant 0 : index
    %c0_370 = arith.constant 0 : index
    %446 = vector.load %arg29[%c8_368, %c0_369, %c0_370] : memref<9x1x64xf32, #tpu.memory_space<vmem>>, vector<1x1x64xf32>
    %447 = vector.shape_cast %446 : vector<1x1x64xf32> to vector<1x64xf32>
    %448 = arith.mulf %445, %447 : vector<1x64xf32>
    %449 = arith.addf %444, %448 : vector<1x64xf32>
    %cst_371 = arith.constant 0.000000e+00 : f32
    %450 = vector.broadcast %cst_371 : f32 to vector<1x64xf32>
    %451 = arith.maximumf %449, %450 : vector<1x64xf32>
    %c0_372 = arith.constant 0 : index
    %c0_373 = arith.constant 0 : index
    %452 = vector.load %arg31[%c0_372, %c0_373] : memref<64x128xf32, #tpu.memory_space<vmem>>, vector<64x128xf32>
    %cst_374 = arith.constant dense<0.000000e+00> : vector<1x128xf32>
    %453 = tpu.matmul %451, %452, %cst_374 {dimension_numbers = #tpu.dot_dimension_numbers<[1], [0], [0], [1], [0, 0, 1, 1], [], []>} : vector<1x64xf32>, vector<64x128xf32>, vector<1x128xf32> -> vector<1x128xf32>
    %c0_375 = arith.constant 0 : index
    %c0_376 = arith.constant 0 : index
    %454 = vector.load %arg32[%c0_375, %c0_376] : memref<1x128xf32, #tpu.memory_space<vmem>>, vector<1x128xf32>
    %455 = arith.addf %453, %454 : vector<1x128xf32>
    %cst_377 = arith.constant 0.000000e+00 : f32
    %456 = vector.broadcast %cst_377 : f32 to vector<1x128xf32>
    %457 = arith.maximumf %455, %456 : vector<1x128xf32>
    %c0_378 = arith.constant 0 : index
    %c0_379 = arith.constant 0 : index
    %458 = vector.load %arg34[%c0_378, %c0_379] : memref<1x128xf32, #tpu.memory_space<vmem>>, vector<1x128xf32>
    %c4_380 = arith.constant 4 : index
    %c0_381 = arith.constant 0 : index
    %c0_382 = arith.constant 0 : index
    %459 = vector.load %arg33[%c4_380, %c0_381, %c0_382] : memref<9x1x128xf32, #tpu.memory_space<vmem>>, vector<1x1x128xf32>
    %460 = vector.shape_cast %459 : vector<1x1x128xf32> to vector<1x128xf32>
    %461 = arith.mulf %457, %460 : vector<1x128xf32>
    %462 = arith.addf %458, %461 : vector<1x128xf32>
    %cst_383 = arith.constant 0.000000e+00 : f32
    %463 = vector.broadcast %cst_383 : f32 to vector<1x128xf32>
    %464 = arith.maximumf %462, %463 : vector<1x128xf32>
    %c0_384 = arith.constant 0 : index
    %c0_385 = arith.constant 0 : index
    %465 = vector.load %arg35[%c0_384, %c0_385] : memref<128x128xf32, #tpu.memory_space<vmem>>, vector<128x128xf32>
    %cst_386 = arith.constant dense<0.000000e+00> : vector<1x128xf32>
    %466 = tpu.matmul %464, %465, %cst_386 {dimension_numbers = #tpu.dot_dimension_numbers<[1], [0], [0], [1], [0, 0, 1, 1], [], []>} : vector<1x128xf32>, vector<128x128xf32>, vector<1x128xf32> -> vector<1x128xf32>
    %c0_387 = arith.constant 0 : index
    %c0_388 = arith.constant 0 : index
    %467 = vector.load %arg36[%c0_387, %c0_388] : memref<1x128xf32, #tpu.memory_space<vmem>>, vector<1x128xf32>
    %468 = arith.addf %466, %467 : vector<1x128xf32>
    %cst_389 = arith.constant 0.000000e+00 : f32
    %469 = vector.broadcast %cst_389 : f32 to vector<1x128xf32>
    %470 = arith.maximumf %468, %469 : vector<1x128xf32>
    %c0_390 = arith.constant 0 : index
    %c0_391 = arith.constant 0 : index
    %471 = vector.load %arg38[%c0_390, %c0_391] : memref<1x128xf32, #tpu.memory_space<vmem>>, vector<1x128xf32>
    %c4_392 = arith.constant 4 : index
    %c0_393 = arith.constant 0 : index
    %c0_394 = arith.constant 0 : index
    %472 = vector.load %arg37[%c4_392, %c0_393, %c0_394] : memref<9x1x128xf32, #tpu.memory_space<vmem>>, vector<1x1x128xf32>
    %473 = vector.shape_cast %472 : vector<1x1x128xf32> to vector<1x128xf32>
    %474 = arith.mulf %470, %473 : vector<1x128xf32>
    %475 = arith.addf %471, %474 : vector<1x128xf32>
    %cst_395 = arith.constant 0.000000e+00 : f32
    %476 = vector.broadcast %cst_395 : f32 to vector<1x128xf32>
    %477 = arith.maximumf %475, %476 : vector<1x128xf32>
    %c0_396 = arith.constant 0 : index
    %c0_397 = arith.constant 0 : index
    %478 = vector.load %arg39[%c0_396, %c0_397] : memref<128x128xf32, #tpu.memory_space<vmem>>, vector<128x128xf32>
    %cst_398 = arith.constant dense<0.000000e+00> : vector<1x128xf32>
    %479 = tpu.matmul %477, %478, %cst_398 {dimension_numbers = #tpu.dot_dimension_numbers<[1], [0], [0], [1], [0, 0, 1, 1], [], []>} : vector<1x128xf32>, vector<128x128xf32>, vector<1x128xf32> -> vector<1x128xf32>
    %c0_399 = arith.constant 0 : index
    %c0_400 = arith.constant 0 : index
    %480 = vector.load %arg40[%c0_399, %c0_400] : memref<1x128xf32, #tpu.memory_space<vmem>>, vector<1x128xf32>
    %481 = arith.addf %479, %480 : vector<1x128xf32>
    %cst_401 = arith.constant 0.000000e+00 : f32
    %482 = vector.broadcast %cst_401 : f32 to vector<1x128xf32>
    %483 = arith.maximumf %481, %482 : vector<1x128xf32>
    %c0_402 = arith.constant 0 : index
    %c0_403 = arith.constant 0 : index
    %484 = vector.load %arg42[%c0_402, %c0_403] : memref<1x128xf32, #tpu.memory_space<vmem>>, vector<1x128xf32>
    %c4_404 = arith.constant 4 : index
    %c0_405 = arith.constant 0 : index
    %c0_406 = arith.constant 0 : index
    %485 = vector.load %arg41[%c4_404, %c0_405, %c0_406] : memref<9x1x128xf32, #tpu.memory_space<vmem>>, vector<1x1x128xf32>
    %486 = vector.shape_cast %485 : vector<1x1x128xf32> to vector<1x128xf32>
    %487 = arith.mulf %483, %486 : vector<1x128xf32>
    %488 = arith.addf %484, %487 : vector<1x128xf32>
    %cst_407 = arith.constant 0.000000e+00 : f32
    %489 = vector.broadcast %cst_407 : f32 to vector<1x128xf32>
    %490 = arith.maximumf %488, %489 : vector<1x128xf32>
    %c0_408 = arith.constant 0 : index
    %c0_409 = arith.constant 0 : index
    %491 = vector.load %arg43[%c0_408, %c0_409] : memref<128x128xf32, #tpu.memory_space<vmem>>, vector<128x128xf32>
    %cst_410 = arith.constant dense<0.000000e+00> : vector<1x128xf32>
    %492 = tpu.matmul %490, %491, %cst_410 {dimension_numbers = #tpu.dot_dimension_numbers<[1], [0], [0], [1], [0, 0, 1, 1], [], []>} : vector<1x128xf32>, vector<128x128xf32>, vector<1x128xf32> -> vector<1x128xf32>
    %c0_411 = arith.constant 0 : index
    %c0_412 = arith.constant 0 : index
    %493 = vector.load %arg44[%c0_411, %c0_412] : memref<1x128xf32, #tpu.memory_space<vmem>>, vector<1x128xf32>
    %494 = arith.addf %492, %493 : vector<1x128xf32>
    %cst_413 = arith.constant 0.000000e+00 : f32
    %495 = vector.broadcast %cst_413 : f32 to vector<1x128xf32>
    %496 = arith.maximumf %494, %495 : vector<1x128xf32>
    %c0_414 = arith.constant 0 : index
    %c0_415 = arith.constant 0 : index
    %497 = vector.load %arg46[%c0_414, %c0_415] : memref<1x128xf32, #tpu.memory_space<vmem>>, vector<1x128xf32>
    %c4_416 = arith.constant 4 : index
    %c0_417 = arith.constant 0 : index
    %c0_418 = arith.constant 0 : index
    %498 = vector.load %arg45[%c4_416, %c0_417, %c0_418] : memref<9x1x128xf32, #tpu.memory_space<vmem>>, vector<1x1x128xf32>
    %499 = vector.shape_cast %498 : vector<1x1x128xf32> to vector<1x128xf32>
    %500 = arith.mulf %496, %499 : vector<1x128xf32>
    %501 = arith.addf %497, %500 : vector<1x128xf32>
    %cst_419 = arith.constant 0.000000e+00 : f32
    %502 = vector.broadcast %cst_419 : f32 to vector<1x128xf32>
    %503 = arith.maximumf %501, %502 : vector<1x128xf32>
    %c0_420 = arith.constant 0 : index
    %c0_421 = arith.constant 0 : index
    %504 = vector.load %arg47[%c0_420, %c0_421] : memref<128x128xf32, #tpu.memory_space<vmem>>, vector<128x128xf32>
    %cst_422 = arith.constant dense<0.000000e+00> : vector<1x128xf32>
    %505 = tpu.matmul %503, %504, %cst_422 {dimension_numbers = #tpu.dot_dimension_numbers<[1], [0], [0], [1], [0, 0, 1, 1], [], []>} : vector<1x128xf32>, vector<128x128xf32>, vector<1x128xf32> -> vector<1x128xf32>
    %c0_423 = arith.constant 0 : index
    %c0_424 = arith.constant 0 : index
    %506 = vector.load %arg48[%c0_423, %c0_424] : memref<1x128xf32, #tpu.memory_space<vmem>>, vector<1x128xf32>
    %507 = arith.addf %505, %506 : vector<1x128xf32>
    %cst_425 = arith.constant 0.000000e+00 : f32
    %508 = vector.broadcast %cst_425 : f32 to vector<1x128xf32>
    %509 = arith.maximumf %507, %508 : vector<1x128xf32>
    %c0_426 = arith.constant 0 : index
    %c0_427 = arith.constant 0 : index
    %510 = vector.load %arg50[%c0_426, %c0_427] : memref<1x128xf32, #tpu.memory_space<vmem>>, vector<1x128xf32>
    %c4_428 = arith.constant 4 : index
    %c0_429 = arith.constant 0 : index
    %c0_430 = arith.constant 0 : index
    %511 = vector.load %arg49[%c4_428, %c0_429, %c0_430] : memref<9x1x128xf32, #tpu.memory_space<vmem>>, vector<1x1x128xf32>
    %512 = vector.shape_cast %511 : vector<1x1x128xf32> to vector<1x128xf32>
    %513 = arith.mulf %509, %512 : vector<1x128xf32>
    %514 = arith.addf %510, %513 : vector<1x128xf32>
    %cst_431 = arith.constant 0.000000e+00 : f32
    %515 = vector.broadcast %cst_431 : f32 to vector<1x128xf32>
    %516 = arith.maximumf %514, %515 : vector<1x128xf32>
    %c0_432 = arith.constant 0 : index
    %c0_433 = arith.constant 0 : index
    %517 = vector.load %arg51[%c0_432, %c0_433] : memref<128x256xf32, #tpu.memory_space<vmem>>, vector<128x256xf32>
    %cst_434 = arith.constant dense<0.000000e+00> : vector<1x256xf32>
    %518 = tpu.matmul %516, %517, %cst_434 {dimension_numbers = #tpu.dot_dimension_numbers<[1], [0], [0], [1], [0, 0, 1, 1], [], []>} : vector<1x128xf32>, vector<128x256xf32>, vector<1x256xf32> -> vector<1x256xf32>
    %c0_435 = arith.constant 0 : index
    %c0_436 = arith.constant 0 : index
    %519 = vector.load %arg52[%c0_435, %c0_436] : memref<1x256xf32, #tpu.memory_space<vmem>>, vector<1x256xf32>
    %520 = arith.addf %518, %519 : vector<1x256xf32>
    %cst_437 = arith.constant 0.000000e+00 : f32
    %521 = vector.broadcast %cst_437 : f32 to vector<1x256xf32>
    %522 = arith.maximumf %520, %521 : vector<1x256xf32>
    %c0_438 = arith.constant 0 : index
    %c0_439 = arith.constant 0 : index
    %c0_440 = arith.constant 0 : index
    %523 = vector.load %arg55[%c0_438, %c0_439, %c0_440] : memref<1x1x256xf32, #tpu.memory_space<vmem>>, vector<1x1x256xf32>
    %524 = vector.shape_cast %523 : vector<1x1x256xf32> to vector<1x256xf32>
    %525 = vector.shape_cast %522 : vector<1x256xf32> to vector<1x1x256xf32>
    tpu.vector_store %arg55[%c0_438, %c0_439, %c0_440], %525 {strides = array<i32>} : memref<1x1x256xf32, #tpu.memory_space<vmem>>, vector<1x1x256xf32>,
    return
  }
  func.func @transform_0(%arg0: i32) -> (i32, i32, i32) {
    %c0_i32 = arith.constant 0 : i32
    %c0_i32_0 = arith.constant 0 : i32
    %c0_i32_1 = arith.constant 0 : i32
    return %arg0, %c0_i32, %c0_i32_0 : i32, i32, i32
  }
  func.func @transform_1(%arg0: i32) -> (i32, i32) {
    %c0_i32 = arith.constant 0 : i32
    %c0_i32_0 = arith.constant 0 : i32
    %c0_i32_1 = arith.constant 0 : i32
    return %c0_i32, %c0_i32_0 : i32, i32
  }
  func.func @transform_2(%arg0: i32) -> (i32, i32) {
    %c0_i32 = arith.constant 0 : i32
    %c0_i32_0 = arith.constant 0 : i32
    %c0_i32_1 = arith.constant 0 : i32
    return %c0_i32, %c0_i32_0 : i32, i32
  }
  func.func @transform_3(%arg0: i32) -> (i32, i32, i32) {
    %c0_i32 = arith.constant 0 : i32
    %c0_i32_0 = arith.constant 0 : i32
    %c0_i32_1 = arith.constant 0 : i32
    %c0_i32_2 = arith.constant 0 : i32
    return %c0_i32, %c0_i32_0, %c0_i32_1 : i32, i32, i32
  }
  func.func @transform_4(%arg0: i32) -> (i32, i32, i32) {
    %c0_i32 = arith.constant 0 : i32
    %c0_i32_0 = arith.constant 0 : i32
    %c0_i32_1 = arith.constant 0 : i32
    %c0_i32_2 = arith.constant 0 : i32
    return %c0_i32, %c0_i32_0, %c0_i32_1 : i32, i32, i32
  }
  func.func @transform_5(%arg0: i32) -> (i32, i32) {
    %c0_i32 = arith.constant 0 : i32
    %c0_i32_0 = arith.constant 0 : i32
    %c0_i32_1 = arith.constant 0 : i32
    return %c0_i32, %c0_i32_0 : i32, i32
  }
  func.func @transform_6(%arg0: i32) -> (i32, i32) {
    %c0_i32 = arith.constant 0 : i32
    %c0_i32_0 = arith.constant 0 : i32
    %c0_i32_1 = arith.constant 0 : i32
    return %c0_i32, %c0_i32_0 : i32, i32
  }
  func.func @transform_7(%arg0: i32) -> (i32, i32) {
    %c0_i32 = arith.constant 0 : i32
    %c0_i32_0 = arith.constant 0 : i32
    %c0_i32_1 = arith.constant 0 : i32
    return %c0_i32, %c0_i32_0 : i32, i32
  }
  func.func @transform_8(%arg0: i32) -> (i32, i32, i32) {
    %c0_i32 = arith.constant 0 : i32
    %c0_i32_0 = arith.constant 0 : i32
    %c0_i32_1 = arith.constant 0 : i32
    %c0_i32_2 = arith.constant 0 : i32
    return %c0_i32, %c0_i32_0, %c0_i32_1 : i32, i32, i32
  }
  func.func @transform_9(%arg0: i32) -> (i32, i32, i32) {
    %c0_i32 = arith.constant 0 : i32
    %c0_i32_0 = arith.constant 0 : i32
    %c0_i32_1 = arith.constant 0 : i32
    %c0_i32_2 = arith.constant 0 : i32
    return %c0_i32, %c0_i32_0, %c0_i32_1 : i32, i32, i32
  }
  func.func @transform_10(%arg0: i32) -> (i32, i32) {
    %c0_i32 = arith.constant 0 : i32
    %c0_i32_0 = arith.constant 0 : i32
    %c0_i32_1 = arith.constant 0 : i32
    return %c0_i32, %c0_i32_0 : i32, i32
  }
  func.func @transform_11(%arg0: i32) -> (i32, i32) {
    %c0_i32 = arith.constant 0 : i32
    %c0_i32_0 = arith.constant 0 : i32
    %c0_i32_1 = arith.constant 0 : i32
    return %c0_i32, %c0_i32_0 : i32, i32
  }
  func.func @transform_12(%arg0: i32) -> (i32, i32) {
    %c0_i32 = arith.constant 0 : i32
    %c0_i32_0 = arith.constant 0 : i32
    %c0_i32_1 = arith.constant 0 : i32
    return %c0_i32, %c0_i32_0 : i32, i32
  }
  func.func @transform_13(%arg0: i32) -> (i32, i32, i32) {
    %c0_i32 = arith.constant 0 : i32
    %c0_i32_0 = arith.constant 0 : i32
    %c0_i32_1 = arith.constant 0 : i32
    %c0_i32_2 = arith.constant 0 : i32
    return %c0_i32, %c0_i32_0, %c0_i32_1 : i32, i32, i32
  }
  func.func @transform_14(%arg0: i32) -> (i32, i32, i32) {
    %c0_i32 = arith.constant 0 : i32
    %c0_i32_0 = arith.constant 0 : i32
    %c0_i32_1 = arith.constant 0 : i32
    %c0_i32_2 = arith.constant 0 : i32
    return %c0_i32, %c0_i32_0, %c0_i32_1 : i32, i32, i32
  }
  func.func @transform_15(%arg0: i32) -> (i32, i32) {
    %c0_i32 = arith.constant 0 : i32
    %c0_i32_0 = arith.constant 0 : i32
    %c0_i32_1 = arith.constant 0 : i32
    return %c0_i32, %c0_i32_0 : i32, i32
  }
  func.func @transform_16(%arg0: i32) -> (i32, i32) {
    %c0_i32 = arith.constant 0 : i32
    %c0_i32_0 = arith.constant 0 : i32
    %c0_i32_1 = arith.constant 0 : i32
    return %c0_i32, %c0_i32_0 : i32, i32
  }
  func.func @transform_17(%arg0: i32) -> (i32, i32) {
    %c0_i32 = arith.constant 0 : i32
    %c0_i32_0 = arith.constant 0 : i32
    %c0_i32_1 = arith.constant 0 : i32
    return %c0_i32, %c0_i32_0 : i32, i32
  }
  func.func @transform_18(%arg0: i32) -> (i32, i32, i32) {
    %c0_i32 = arith.constant 0 : i32
    %c0_i32_0 = arith.constant 0 : i32
    %c0_i32_1 = arith.constant 0 : i32
    %c0_i32_2 = arith.constant 0 : i32
    return %c0_i32, %c0_i32_0, %c0_i32_1 : i32, i32, i32
  }
  func.func @transform_19(%arg0: i32) -> (i32, i32, i32) {
    %c0_i32 = arith.constant 0 : i32
    %c0_i32_0 = arith.constant 0 : i32
    %c0_i32_1 = arith.constant 0 : i32
    %c0_i32_2 = arith.constant 0 : i32
    return %c0_i32, %c0_i32_0, %c0_i32_1 : i32, i32, i32
  }
  func.func @transform_20(%arg0: i32) -> (i32, i32) {
    %c0_i32 = arith.constant 0 : i32
    %c0_i32_0 = arith.constant 0 : i32
    %c0_i32_1 = arith.constant 0 : i32
    return %c0_i32, %c0_i32_0 : i32, i32
  }
  func.func @transform_21(%arg0: i32) -> (i32, i32) {
    %c0_i32 = arith.constant 0 : i32
    %c0_i32_0 = arith.constant 0 : i32
    %c0_i32_1 = arith.constant 0 : i32
    return %c0_i32, %c0_i32_0 : i32, i32
  }
  func.func @transform_22(%arg0: i32) -> (i32, i32) {
    %c0_i32 = arith.constant 0 : i32
    %c0_i32_0 = arith.constant 0 : i32
    %c0_i32_1 = arith.constant 0 : i32
    return %c0_i32, %c0_i32_0 : i32, i32
  }
  func.func @transform_23(%arg0: i32) -> (i32, i32, i32) {
    %c0_i32 = arith.constant 0 : i32
    %c0_i32_0 = arith.constant 0 : i32
    %c0_i32_1 = arith.constant 0 : i32
    %c0_i32_2 = arith.constant 0 : i32
    return %c0_i32, %c0_i32_0, %c0_i32_1 : i32, i32, i32
  }
  func.func @transform_24(%arg0: i32) -> (i32, i32, i32) {
    %c0_i32 = arith.constant 0 : i32
    %c0_i32_0 = arith.constant 0 : i32
    %c0_i32_1 = arith.constant 0 : i32
    %c0_i32_2 = arith.constant 0 : i32
    return %c0_i32, %c0_i32_0, %c0_i32_1 : i32, i32, i32
  }
  func.func @transform_25(%arg0: i32) -> (i32, i32) {
    %c0_i32 = arith.constant 0 : i32
    %c0_i32_0 = arith.constant 0 : i32
    %c0_i32_1 = arith.constant 0 : i32
    return %c0_i32, %c0_i32_0 : i32, i32
  }
  func.func @transform_26(%arg0: i32) -> (i32, i32) {
    %c0_i32 = arith.constant 0 : i32
    %c0_i32_0 = arith.constant 0 : i32
    %c0_i32_1 = arith.constant 0 : i32
    return %c0_i32, %c0_i32_0 : i32, i32
  }
  func.func @transform_27(%arg0: i32) -> (i32, i32) {
    %c0_i32 = arith.constant 0 : i32
    %c0_i32_0 = arith.constant 0 : i32
    %c0_i32_1 = arith.constant 0 : i32
    return %c0_i32, %c0_i32_0 : i32, i32
  }
  func.func @transform_28(%arg0: i32) -> (i32, i32, i32) {
    %c0_i32 = arith.constant 0 : i32
    %c0_i32_0 = arith.constant 0 : i32
    %c0_i32_1 = arith.constant 0 : i32
    %c0_i32_2 = arith.constant 0 : i32
    return %c0_i32, %c0_i32_0, %c0_i32_1 : i32, i32, i32
  }
  func.func @transform_29(%arg0: i32) -> (i32, i32) {
    %c0_i32 = arith.constant 0 : i32
    %c0_i32_0 = arith.constant 0 : i32
    %c0_i32_1 = arith.constant 0 : i32
    return %c0_i32, %c0_i32_0 : i32, i32
  }
  func.func @transform_30(%arg0: i32) -> (i32, i32) {
    %c0_i32 = arith.constant 0 : i32
    %c0_i32_0 = arith.constant 0 : i32
    %c0_i32_1 = arith.constant 0 : i32
    return %c0_i32, %c0_i32_0 : i32, i32
  }
  func.func @transform_31(%arg0: i32) -> (i32, i32) {
    %c0_i32 = arith.constant 0 : i32
    %c0_i32_0 = arith.constant 0 : i32
    %c0_i32_1 = arith.constant 0 : i32
    return %c0_i32, %c0_i32_0 : i32, i32
  }
  func.func @transform_32(%arg0: i32) -> (i32, i32, i32) {
    %c0_i32 = arith.constant 0 : i32
    %c0_i32_0 = arith.constant 0 : i32
    %c0_i32_1 = arith.constant 0 : i32
    %c0_i32_2 = arith.constant 0 : i32
    return %c0_i32, %c0_i32_0, %c0_i32_1 : i32, i32, i32
  }
  func.func @transform_33(%arg0: i32) -> (i32, i32) {
    %c0_i32 = arith.constant 0 : i32
    %c0_i32_0 = arith.constant 0 : i32
    %c0_i32_1 = arith.constant 0 : i32
    return %c0_i32, %c0_i32_0 : i32, i32
  }
  func.func @transform_34(%arg0: i32) -> (i32, i32) {
    %c0_i32 = arith.constant 0 : i32
    %c0_i32_0 = arith.constant 0 : i32
    %c0_i32_1 = arith.constant 0 : i32
    return %c0_i32, %c0_i32_0 : i32, i32
  }
  func.func @transform_35(%arg0: i32) -> (i32, i32) {
    %c0_i32 = arith.constant 0 : i32
    %c0_i32_0 = arith.constant 0 : i32
    %c0_i32_1 = arith.constant 0 : i32
    return %c0_i32, %c0_i32_0 : i32, i32
  }
  func.func @transform_36(%arg0: i32) -> (i32, i32, i32) {
    %c0_i32 = arith.constant 0 : i32
    %c0_i32_0 = arith.constant 0 : i32
    %c0_i32_1 = arith.constant 0 : i32
    %c0_i32_2 = arith.constant 0 : i32
    return %c0_i32, %c0_i32_0, %c0_i32_1 : i32, i32, i32
  }
  func.func @transform_37(%arg0: i32) -> (i32, i32) {
    %c0_i32 = arith.constant 0 : i32
    %c0_i32_0 = arith.constant 0 : i32
    %c0_i32_1 = arith.constant 0 : i32
    return %c0_i32, %c0_i32_0 : i32, i32
  }
  func.func @transform_38(%arg0: i32) -> (i32, i32) {
    %c0_i32 = arith.constant 0 : i32
    %c0_i32_0 = arith.constant 0 : i32
    %c0_i32_1 = arith.constant 0 : i32
    return %c0_i32, %c0_i32_0 : i32, i32
  }
  func.func @transform_39(%arg0: i32) -> (i32, i32) {
    %c0_i32 = arith.constant 0 : i32
    %c0_i32_0 = arith.constant 0 : i32
    %c0_i32_1 = arith.constant 0 : i32
    return %c0_i32, %c0_i32_0 : i32, i32
  }
  func.func @transform_40(%arg0: i32) -> (i32, i32, i32) {
    %c0_i32 = arith.constant 0 : i32
    %c0_i32_0 = arith.constant 0 : i32
    %c0_i32_1 = arith.constant 0 : i32
    %c0_i32_2 = arith.constant 0 : i32
    return %c0_i32, %c0_i32_0, %c0_i32_1 : i32, i32, i32
  }
  func.func @transform_41(%arg0: i32) -> (i32, i32) {
    %c0_i32 = arith.constant 0 : i32
    %c0_i32_0 = arith.constant 0 : i32
    %c0_i32_1 = arith.constant 0 : i32
    return %c0_i32, %c0_i32_0 : i32, i32
  }
  func.func @transform_42(%arg0: i32) -> (i32, i32) {
    %c0_i32 = arith.constant 0 : i32
    %c0_i32_0 = arith.constant 0 : i32
    %c0_i32_1 = arith.constant 0 : i32
    return %c0_i32, %c0_i32_0 : i32, i32
  }
  func.func @transform_43(%arg0: i32) -> (i32, i32) {
    %c0_i32 = arith.constant 0 : i32
    %c0_i32_0 = arith.constant 0 : i32
    %c0_i32_1 = arith.constant 0 : i32
    return %c0_i32, %c0_i32_0 : i32, i32
  }
  func.func @transform_44(%arg0: i32) -> (i32, i32, i32) {
    %c0_i32 = arith.constant 0 : i32
    %c0_i32_0 = arith.constant 0 : i32
    %c0_i32_1 = arith.constant 0 : i32
    %c0_i32_2 = arith.constant 0 : i32
    return %c0_i32, %c0_i32_0, %c0_i32_1 : i32, i32, i32
  }
  func.func @transform_45(%arg0: i32) -> (i32, i32) {
    %c0_i32 = arith.constant 0 : i32
    %c0_i32_0 = arith.constant 0 : i32
    %c0_i32_1 = arith.constant 0 : i32
    return %c0_i32, %c0_i32_0 : i32, i32
  }
  func.func @transform_46(%arg0: i32) -> (i32, i32) {
    %c0_i32 = arith.constant 0 : i32
    %c0_i32_0 = arith.constant 0 : i32
    %c0_i32_1 = arith.constant 0 : i32
    return %c0_i32, %c0_i32_0 : i32, i32
  }
  func.func @transform_47(%arg0: i32) -> (i32, i32) {
    %c0_i32 = arith.constant 0 : i32
    %c0_i32_0 = arith.constant 0 : i32
    %c0_i32_1 = arith.constant 0 : i32
    return %c0_i32, %c0_i32_0 : i32, i32
  }
  func.func @transform_48(%arg0: i32) -> (i32, i32, i32) {
    %c0_i32 = arith.constant 0 : i32
    %c0_i32_0 = arith.constant 0 : i32
    %c0_i32_1 = arith.constant 0 : i32
    %c0_i32_2 = arith.constant 0 : i32
    return %c0_i32, %c0_i32_0, %c0_i32_1 : i32, i32, i32
  }
  func.func @transform_49(%arg0: i32) -> (i32, i32) {
    %c0_i32 = arith.constant 0 : i32
    %c0_i32_0 = arith.constant 0 : i32
    %c0_i32_1 = arith.constant 0 : i32
    return %c0_i32, %c0_i32_0 : i32, i32
  }
  func.func @transform_50(%arg0: i32) -> (i32, i32) {
    %c0_i32 = arith.constant 0 : i32
    %c0_i32_0 = arith.constant 0 : i32
    %c0_i32_1 = arith.constant 0 : i32
    return %c0_i32, %c0_i32_0 : i32, i32
  }
  func.func @transform_51(%arg0: i32) -> (i32, i32) {
    %c0_i32 = arith.constant 0 : i32
    %c0_i32_0 = arith.constant 0 : i32
    %c0_i32_1 = arith.constant 0 : i32
    return %c0_i32, %c0_i32_0 : i32, i32
  }
  func.func @transform_52(%arg0: i32) -> (i32, i32, i32) {
    %c0_i32 = arith.constant 0 : i32
    %c0_i32_0 = arith.constant 0 : i32
    %c0_i32_1 = arith.constant 0 : i32
    return %arg0, %c0_i32, %c0_i32_0 : i32, i32, i32
  }
  func.func @transform_53(%arg0: i32) -> (i32, i32, i32) {
    %c0_i32 = arith.constant 0 : i32
    %c0_i32_0 = arith.constant 0 : i32
    %c0_i32_1 = arith.constant 0 : i32
    return %arg0, %c0_i32, %c0_i32_0 : i32, i32, i32
  }
  func.func @transform_54(%arg0: i32) -> (i32, i32, i32) {
    %c0_i32 = arith.constant 0 : i32
    %c0_i32_0 = arith.constant 0 : i32
    %c0_i32_1 = arith.constant 0 : i32
    return %arg0, %c0_i32, %c0_i32_0 : i32, i32, i32
  }
}

</mosaic_0001>

<bundles_post_ra>
// kernel: fdmobilenet_forward.1
= control target key start
LH: loop header
LB: loop body
LE: loop exit
PB: predicated region body
PF: predicated region fallthrough
CT: control target
= control target key end

     0   :  { %s10665_s6 = smov 1   ;;  %s10666_s10 = smov 2   ;;  %s12928_s0 = inlined_call_operand.smem [shape: u32[55], index: -1, kind: input, shape index: {}] }
   0x1   :  { %s10746_s5 = sld [smem:[%s12928_s0]]   ;;  %s10667_s14 = smov 3  }
   0x2   :  { %s10751_s9 = sld [smem:[%s12928_s0 + %s10665_s6]]   ;;  %s10668_s18 = smov 4  }
   0x3   :  { %s10756_s13 = sld [smem:[%s12928_s0 + %s10666_s10]]   ;;  %s10669_s22 = smov 5  }
   0x4   :  { %s10761_s17 = sld [smem:[%s12928_s0 + %s10667_s14]]   ;;  %s10670_s26 = smov 6  }
   0x5   :  { %s10766_s21 = sld [smem:[%s12928_s0 + %s10668_s18]]   ;;  %s10671_s30 = smov 7  }
   0x6   :  { %s10771_s25 = sld [smem:[%s12928_s0 + %s10669_s22]]   ;;  %s10672_s4 = smov 8  }
   0x7   :  { %12978 = sst [smem:[#allocation32_spill]] %s10746_s5  ;;  %s10673_s10 = smov 9  }
   0x8   :  { %12979 = sst [smem:[#allocation33_spill]] %s10751_s9  ;;  %s10674_s15 = smov 10  }
   0x9   :  { %12980 = sst [smem:[#allocation34_spill]] %s10756_s13  ;;  %s10675_s20 = smov 11  }
   0xa   :  { %s10776_s29 = sld [smem:[%s12928_s0 + %s10670_s26]]   ;;  %s10676_s26 = smov 12  }
   0xb   :  { %12981 = sst [smem:[#allocation35_spill]] %s10766_s21  ;;  %s10677_s1 = smov 13  }
   0xc   :  { %12982 = sst [smem:[#allocation36_spill]] %s10771_s25  ;;  %s10678_s7 = smov 14  }
   0xd   :  { %s10781_s3 = sld [smem:[%s12928_s0 + %s10671_s30]]   ;;  %s10680_s22 = smov 16  }
   0xe   :  { %s10786_s8 = sld [smem:[%s12928_s0 + %s10672_s4]]   ;;  %s10681_s28 = smov 17  }
   0xf   :  { %s10791_s14 = sld [smem:[%s12928_s0 + %s10673_s10]]  }
  0x10   :  { %12983 = sst [smem:[#allocation37_spill]] %s10776_s29 }
  0x11   :  { %s10796_s19 = sld [smem:[%s12928_s0 + %s10674_s15]]   ;;  %s10679_s15 = smov 15  }
  0x12   :  { %s10801_s24 = sld [smem:[%s12928_s0 + %s10675_s20]]  }
  0x13   :  { %12984 = sst [smem:[#allocation38_spill]] %s10781_s3 }
  0x14   :  { %12985 = sst [smem:[#allocation39_spill]] %s10786_s8 }
  0x15   :  { %12986 = sst [smem:[#allocation40_spill]] %s10791_s14 }
  0x16   :  { %s10806_s30 = sld [smem:[%s12928_s0 + %s10676_s26]]  }
  0x17   :  { %12987 = sst [smem:[#allocation41_spill]] %s10796_s19 }
  0x18   :  { %12988 = sst [smem:[#allocation42_spill]] %s10801_s24 }
  0x19   :  { %s10811_s6 = sld [smem:[%s12928_s0 + %s10677_s1]]  }
  0x1a   :  { %s10816_s12 = sld [smem:[%s12928_s0 + %s10678_s7]]   ;;  %s10682_s7 = smov 18  }
  0x1b   :  { %s10821_s20 = sld [smem:[%s12928_s0 + %s10679_s15]]   ;;  %s10683_s15 = smov 19  }
  0x1c   :  { %12989 = sst [smem:[#allocation43_spill]] %s10806_s30 }
  0x1d   :  { %s10826_s27 = sld [smem:[%s12928_s0 + %s10680_s22]]   ;;  %s10684_s22 = smov 20  }
  0x1e   :  { %s10831_s4 = sld [smem:[%s12928_s0 + %s10681_s28]]   ;;  %s10685_s28 = smov 21  }
  0x1f   :  { %12990 = sst [smem:[#allocation44_spill]] %s10811_s6 }
  0x20   :  { %12991 = sst [smem:[#allocation45_spill]] %s10816_s12 }
  0x21   :  { %12992 = sst [smem:[#allocation46_spill]] %s10821_s20 }
  0x22   :  { %s10836_s12 = sld [smem:[%s12928_s0 + %s10682_s7]]   ;;  %s10686_s7 = smov 22  }
  0x23   :  { %12993 = sst [smem:[#allocation47_spill]] %s10826_s27 }
  0x24   :  { %12994 = sst [smem:[#allocation48_spill]] %s10831_s4 }
  0x25   :  { %s10841_s20 = sld [smem:[%s12928_s0 + %s10683_s15]]   ;;  %s10687_s15 = smov 23  }
  0x26   :  { %s10846_s27 = sld [smem:[%s12928_s0 + %s10684_s22]]   ;;  %s10688_s22 = smov 24  }
  0x27   :  { %s10851_s4 = sld [smem:[%s12928_s0 + %s10685_s28]]   ;;  %s10689_s28 = smov 25  }
  0x28   :  { %12995 = sst [smem:[#allocation49_spill]] %s10836_s12 }
  0x29   :  { %s10856_s12 = sld [smem:[%s12928_s0 + %s10686_s7]]   ;;  %s10690_s7 = smov 26  }
  0x2b   :  { %12996 = sst [smem:[#allocation50_spill]] %s10841_s20 }
  0x2c   :  { %12997 = sst [smem:[#allocation51_spill]] %s10846_s27 }
  0x2d   :  { %12998 = sst [smem:[#allocation52_spill]] %s10851_s4 }
  0x2e   :  { %s10861_s20 = sld [smem:[%s12928_s0 + %s10687_s15]]   ;;  %s10691_s15 = smov 27  }
  0x2f   :  { %12999 = sst [smem:[#allocation53_spill]] %s10856_s12 }
  0x30   :  { %s10866_s27 = sld [smem:[%s12928_s0 + %s10688_s22]]   ;;  %s10692_s22 = smov 28  }
  0x31   :  { %s10871_s4 = sld [smem:[%s12928_s0 + %s10689_s28]]   ;;  %s10693_s28 = smov 29  }
  0x32   :  { %s10876_s12 = sld [smem:[%s12928_s0 + %s10690_s7]]   ;;  %s10694_s7 = smov 30  }
  0x34   :  { %13000 = sst [smem:[#allocation54_spill]] %s10861_s20 }
  0x35   :  { %s10881_s20 = sld [smem:[%s12928_s0 + %s10691_s15]]   ;;  %s10695_s15 = smov 31  }
  0x36   :  { %13001 = sst [smem:[#allocation55_spill]] %s10866_s27 }
  0x37   :  { %13002 = sst [smem:[#allocation56_spill]] %s10871_s4 }
  0x38   :  { %13003 = sst [smem:[#allocation57_spill]] %s10876_s12 }
  0x39   :  { %s10886_s27 = sld [smem:[%s12928_s0 + %s10692_s22]]   ;;  %s10696_s22 = smov 32  }
  0x3a   :  { %s10891_s4 = sld [smem:[%s12928_s0 + %s10693_s28]]   ;;  %s10697_s28 = smov 33  }
  0x3b   :  { %13004 = sst [smem:[#allocation58_spill]] %s10881_s20 }
  0x3c   :  { %s10896_s12 = sld [smem:[%s12928_s0 + %s10694_s7]]   ;;  %s10698_s7 = smov 34  }
  0x3d   :  { %s10901_s20 = sld [smem:[%s12928_s0 + %s10695_s15]]   ;;  %s10699_s15 = smov 35  }
  0x3e   :  { %s10911_s30 = sld [smem:[%s12928_s0 + %s10697_s28]]   ;;  %s10701_s28 = smov 37  }
  0x3f   :  { %13005 = sst [smem:[#allocation59_spill]] %s10886_s27 }
  0x40   :  { %13006 = sst [smem:[#allocation60_spill]] %s10891_s4 }
  0x41   :  { %s10906_s27 = sld [smem:[%s12928_s0 + %s10696_s22]]   ;;  %s10700_s22 = smov 36  }
  0x42   :  { %13007 = sst [smem:[#allocation61_spill]] %s10896_s12 }
  0x43   :  { %s10916_s12 = sld [smem:[%s12928_s0 + %s10698_s7]]   ;;  %s10702_s7 = smov 38  }
  0x44   :  { %s10921_s6 = sld [smem:[%s12928_s0 + %s10699_s15]]   ;;  %s10703_s15 = smov 39  }
  0x45   :  { %s10931_s19 = sld [smem:[%s12928_s0 + %s10701_s28]]   ;;  %s10705_s28 = smov 41  }
  0x46   :  { %s10941_s14 = sld [smem:[%s12928_s0 + %s10703_s15]]   ;;  %s10707_s15 = smov 43  }
  0x47   :  { %13008 = sst [smem:[#allocation62_spill]] %s10906_s27 }
  0x48   :  { %s10926_s27 = sld [smem:[%s12928_s0 + %s10700_s22]]   ;;  %s10704_s22 = smov 40  }
  0x49   :  { %13009 = sst [smem:[#allocation63_spill]] %s10916_s12 }
  0x4a   :  { %13010 = sst [smem:[#allocation64_spill]] %s10921_s6 }
  0x4b   :  { %s10936_s12 = sld [smem:[%s12928_s0 + %s10702_s7]]   ;;  %s10706_s7 = smov 42  }
  0x4c   :  { %s10951_s24 = sld [smem:[%s12928_s0 + %s10705_s28]]   ;;  %s10709_s28 = smov 45  }
  0x4d   :  { %s10961_s3 = sld [smem:[%s12928_s0 + %s10707_s15]]   ;;  %s10711_s15 = smov 47  }
  0x4e   :  { %13011 = sst [smem:[#allocation65_spill]] %s10926_s27 }
  0x4f   :  { %s10946_s27 = sld [smem:[%s12928_s0 + %s10704_s22]]   ;;  %s10708_s22 = smov 44  }
  0x50   :  { %s10971_s8 = sld [smem:[%s12928_s0 + %s10709_s28]]   ;;  %s10713_s28 = smov 49  }
  0x51   :  { %13012 = sst [smem:[#allocation66_spill]] %s10936_s12 }
  0x52   :  { %s10956_s12 = sld [smem:[%s12928_s0 + %s10706_s7]]   ;;  %s10710_s7 = smov 46  }
  0x53   :  { %13015 = sst [smem:[#allocation69_spill]] %s10961_s3 }
  0x54   :  { %s10981_s29 = sld [smem:[%s12928_s0 + %s10711_s15]]   ;;  %s10715_s15 = smov 51  }
  0x55   :  { %13013 = sst [smem:[#allocation67_spill]] %s10946_s27 }
  0x56   :  { %s10966_s27 = sld [smem:[%s12928_s0 + %s10708_s22]]   ;;  %s10712_s22 = smov 48  }
  0x57   :  { %13017 = sst [smem:[#allocation71_spill]] %s10971_s8 }
  0x58   :  { %13014 = sst [smem:[#allocation68_spill]] %s10956_s12 }
  0x59   :  { %s10976_s12 = sld [smem:[%s12928_s0 + %s10710_s7]]   ;;  %s10714_s7 = smov 50  }
  0x5a   :  { %s10991_s25 = sld [smem:[%s12928_s0 + %s10713_s28]]   ;;  %s10717_s28 = smov 53  }
  0x5b   :  { %s11001_s21 = sld [smem:[%s12928_s0 + %s10715_s15]]  }
  0x5c   :  { %13016 = sst [smem:[#allocation70_spill]] %s10966_s27 }
  0x5d   :  { %s10986_s27 = sld [smem:[%s12928_s0 + %s10712_s22]]   ;;  %s10716_s22 = smov 52  }
  0x5e   :  { %s11011_s13 = sld [smem:[%s12928_s0 + %s10717_s28]]  }
  0x5f   :  { %13018 = sst [smem:[#allocation72_spill]] %s10976_s12 }
  0x60   :  { %s10996_s12 = sld [smem:[%s12928_s0 + %s10714_s7]]   ;;  %s10718_s7 = smov 54  }
  0x63   :  { %13019 = sst [smem:[#allocation73_spill]] %s10986_s27 }
  0x64   :  { %s11006_s27 = sld [smem:[%s12928_s0 + %s10716_s22]]  }
  0x66   :  { %13020 = sst [smem:[#allocation74_spill]] %s10996_s12 }
  0x67   :  { %s11016_s12 = sld [smem:[%s12928_s0 + %s10718_s7]]  }
  0x68   :  { %115 = vsyncpa [#allocation3], 0 }
  0x69   :  { %116 = vsyncpa [#allocation6], 0 }
  0x6a   :  { %117 = vsyncpa [#allocation9], 0 }
  0x6b   :  { %118 = vsyncpa [#allocation12], 0 }
  0x6c   :  { %119 = vsyncpa [#allocation15], 0 }
  0x6d   :  { %120 = vsyncpa [#allocation18], 0 }
  0x6e   :  { %121 = vsyncpa [#allocation4], 0 }
  0x6f   :  { %123 = vsyncpa [#allocation4 + $0x1], 0 }
  0x70   :  { %124 = vsyncpa [#allocation22], 0 }
  0x71   :  { %126 = vsyncpa [#allocation22 + $0x1], 0  ;;  %s11018_s15 = smov 0   ;;  %s11020_s16 = smov 0  }
  0x72   :  { %s11022_s18 = smov 0   ;;  %s11024_s22 = smov 0  }
  0x73 LB: > { %s13021_s9 = sld [smem:[#allocation33_spill]]  ;;  %s11039_s0 = sadd.s32 4294967295, %s10663_s22   ;;  %s10651_s15 = sphi %s11018_s15, %s13131_s15   ;;  %s10663_s22 = sphi %s11024_s22, %s13128_s22   ;;  %s10659_s18 = sphi %s11022_s18, %s13130_s18   ;;  %s10655_s16 = sphi %s11020_s16, %s13132_s16  }
  0x74   : > { %13022 = sst [smem:[#allocation75_spill]] %s10651_s15  ;;  %s12949_s23 = sadd.s32 4294967294, %s10663_s22  }
  0x75   : > { %13023 = sst [smem:[#allocation76_spill]] %s10659_s18  ;;  %s11043_s26 = sadd.s32 1, %s10663_s22  }
  0x76   : > { %13024 = sst [smem:[#allocation77_spill]] %s10663_s22  ;;  %s1236_s28 = sadd.s32 1, %s10659_s18 }
  0x77   : > { %13025 = sst [smem:[#allocation78_spill]] %s11043_s26  ;;  %s1233_s1 = ssub.s32 %s10663_s22, %s11043_s26 }
  0x78   : > { %p1246_p0 = scmp.ne.s32.totalorder %s10659_s18, %s10655_s16  ;;  %p1234_p1 = scmp.eq.s32.totalorder %s1233_s1, 0 }
  0x79   : > { %p1247_p2 = scmp.eq.s32.totalorder %s11039_s0, 1  ;;  %p1252_p3 = scmp.ne.s32.totalorder %s10655_s16, %s10651_s15 }
  0x7a   : > { %p1253_p4 = scmp.eq.s32.totalorder %s12949_s23, 1  ;;  %p8157_p7 = scmp.ge.s32.totalorder %s10663_s22, 1 }
  0x7b   : > { %s11056_s2 = scalar_select %p1234_p1, %s10659_s18, %s1236_s28  }
  0x7c   : > { %p11058_p5 = por %p1247_p2, %p1246_p0  ;;  %p11062_p6 = por %p1253_p4, %p1252_p3 }
  0x7d   : > { %13026 = sst [smem:[#allocation79_spill]] %s11056_s2  ;;  %p1312_p8 = scmp.lt.s32.totalorder %s10663_s22, 3 }
  0x7e   : > { %s13027_s7 = scalar_select %p11058_p5, 1, 0 }
  0x7f   : > { %s13028_s10 = scalar_select %p11062_p6, 1, 0 }
  0x80   : > { %p12955_p9 = scmp.eq.s32.totalorder %s11039_s0, 0  ;;  %p11069_p10 = pnand %p8157_p7, %p1312_p8 }
  0x81   : > { %13029 = sst [smem:[#allocation80_spill]] %s13028_s10  ;;  %s10719_s1 = smov [#allocation5]  }
  0x82   : > { %s13030_s11 = scalar_select %p11069_p10, 1, 0 }
  0x83   : > { %s1423_s23 = sshll.u32 %s10719_s1, 4  ;;  %p10068_p11 = pneg %p11069_p10  ;;  %s1424_s23 = int_to_ptr.vmem [resolvable:$true] %s1423_s23 }
  0x84   : > { %s10720_s28 = smov [#allocation8]   ;;  %s10721_s26 = smov [#allocation11]  }
  0x85   : > { %s1451_s2 = sshll.u32 %s10720_s28, 4  ;;  %p11077_p12 = pnand %p12955_p9, %p10068_p11  ;;  %s1452_s2 = int_to_ptr.vmem [resolvable:$true] %s1451_s2 }
  0x86   : > { %s1479_s10 = sshll.u32 %s10721_s26, 4  ;;  %s10248_s1 = scalar_lea.vmem %s1424_s23, 16  ;;  %s11081_s10 = int_to_ptr.vmem [resolvable:$true] %s1479_s10 }
  0x87   : > { %p11085_p13 = pneg %p11077_p12  ;;  %p10249_p0 = scmp.ne.s32.totalorder %s1424_s23, %s10248_s1 }
  0x88   : > { %s10255_s28 = scalar_lea.vmem %s1424_s23, 32  ;;  %p10256_p3 = scmp.lt.s32.totalorder %s1424_s23, %s1424_s23 }
  0x89   : > { %p10251_p1 = pnand %p10249_p0, %p11085_p13  ;;  %p10257_p4 = scmp.lt.s32.totalorder %s10255_s28, %s10248_s1 }
  0x8b   : > { %p10252_p2 = pneg %p10251_p1  ;;  %p10258_p7 = por %p10257_p4, %p10256_p3 }
  0x8d   : > { %p10259_p8 = pnand %p10258_p7, %p10252_p2 }
  0x8f   : > { %10262 = shalt.err (!%p10259_p8)
}
  0x90   : > { %10074 = dma.hbm_to_vmem [thread:$0]  (!%p11077_p12), %s10901_s20, 16, %s1424_s23, [#allocation6]  }
  0x91   : > { %s10274_s26 = scalar_lea.vmem %s1452_s2, 16  ;;  %s10281_s22 = scalar_lea.vmem %s1452_s2, 32 }
  0x92   : > { %p10275_p11 = scmp.ne.s32.totalorder %s1452_s2, %s10274_s26  ;;  %p10282_p5 = scmp.lt.s32.totalorder %s1452_s2, %s1452_s2 }
  0x93   : > { %p10283_p0 = scmp.lt.s32.totalorder %s10281_s22, %s10274_s26 }
  0x94   : > { %p10277_p9 = pnand %p10275_p11, %p11085_p13 }
  0x95   : > { %p10284_p1 = por %p10283_p0, %p10282_p5 }
  0x96   : > { %p10278_p6 = pneg %p10277_p9 }
  0x98   : > { %p10285_p10 = pnand %p10284_p1, %p10278_p6 }
  0x9a   : > { %10288 = shalt.err (!%p10285_p10)
}
  0x9b   : > { %s13033_s6 = sld [smem:[#allocation64_spill]]  ;;  %s10300_s23 = scalar_lea.vmem %s11081_s10, 16 }
  0x9c   : > { %p10301_p2 = scmp.ne.s32.totalorder %s11081_s10, %s10300_s23  ;;  %s10307_s1 = scalar_lea.vmem %s11081_s10, 32 }
  0x9d   : > { %p10308_p4 = scmp.lt.s32.totalorder %s11081_s10, %s11081_s10  ;;  %p10309_p5 = scmp.lt.s32.totalorder %s10307_s1, %s10300_s23 }
  0x9e   : > { %p10303_p3 = pnand %p10301_p2, %p11085_p13 }
  0x9f   : > { %p10310_p6 = por %p10309_p5, %p10308_p4 }
  0xa0   : > { %p10304_p9 = pneg %p10303_p3 }
  0xa1   : > { %10080 = dma.hbm_to_vmem [thread:$0]  (!%p11077_p12), %s13033_s6, 16, %s1452_s2, [#allocation9]  }
  0xa2   : > { %p10311_p10 = pnand %p10310_p6, %p10304_p9 }
  0xa4   : > { %10314 = shalt.err (!%p10311_p10)
}
  0xa5   : > { %10086 = dma.hbm_to_vmem [thread:$0]  (!%p11077_p12), %s10941_s14, 16, %s11081_s10, [#allocation12]  }
  0xa6   : > { %s10722_s22 = smov [#allocation14]   ;;  %s10723_s28 = smov [#allocation17]  }
  0xa7   : > { %s1507_s2 = sshll.u32 %s10722_s22, 4  ;;  %s1535_s26 = sshll.u32 %s10723_s28, 4  ;;  %s1508_s2 = int_to_ptr.vmem [resolvable:$true] %s1507_s2  ;;  %s1536_s26 = int_to_ptr.vmem [resolvable:$true] %s1535_s26 }
  0xa8   : > { %s10326_s6 = scalar_lea.vmem %s1508_s2, 16  ;;  %s10333_s23 = scalar_lea.vmem %s1508_s2, 32 }
  0xa9   : > { %p10327_p7 = scmp.ne.s32.totalorder %s1508_s2, %s10326_s6  ;;  %p10334_p0 = scmp.lt.s32.totalorder %s1508_s2, %s1508_s2 }
  0xaa   : > { %p10335_p1 = scmp.lt.s32.totalorder %s10333_s23, %s10326_s6 }
  0xab   : > { %p10329_p8 = pnand %p10327_p7, %p11085_p13 }
  0xac   : > { %p10336_p2 = por %p10335_p1, %p10334_p0 }
  0xad   : > { %p10330_p11 = pneg %p10329_p8 }
  0xaf   : > { %p10337_p3 = pnand %p10336_p2, %p10330_p11 }
  0xb1   : > { %10340 = shalt.err (!%p10337_p3)
}
  0xb2   : > { %s13034_s3 = sld [smem:[#allocation69_spill]]  ;;  %s10352_s10 = scalar_lea.vmem %s1536_s26, 16 }
  0xb3   : > { %p10353_p9 = scmp.ne.s32.totalorder %s1536_s26, %s10352_s10  ;;  %s10359_s1 = scalar_lea.vmem %s1536_s26, 32 }
  0xb4   : > { %p10360_p6 = scmp.lt.s32.totalorder %s1536_s26, %s1536_s26  ;;  %p10361_p10 = scmp.lt.s32.totalorder %s10359_s1, %s10352_s10 }
  0xb5   : > { %p10355_p4 = pnand %p10353_p9, %p11085_p13 }
  0xb6   : > { %p10362_p7 = por %p10361_p10, %p10360_p6 }
  0xb7   : > { %p10356_p5 = pneg %p10355_p4 }
  0xb8   : > { %10092 = dma.hbm_to_vmem [thread:$0]  (!%p11077_p12), %s13034_s3, 16, %s1508_s2, [#allocation15]  }
  0xb9   : > { %p10363_p8 = pnand %p10362_p7, %p10356_p5 }
  0xbb   : > { %10366 = shalt.err (!%p10363_p8)
}
  0xbc   : > { %10098 = dma.hbm_to_vmem [thread:$0]  (!%p11077_p12), %s10981_s29, 16, %s1536_s26, [#allocation18]  }
  0xbd   : > { %s10724_s6 = smov [#allocation2]   ;;  %s10725_s2 = smov [#allocation7]  }
  0xbe   : > { %s1409_s22 = sshll.u32 %s10724_s6, 4  ;;  %s1437_s28 = sshll.u32 %s10725_s2, 4  ;;  %s1410_s22 = int_to_ptr.vmem [resolvable:$true] %s1409_s22  ;;  %s1438_s28 = int_to_ptr.vmem [resolvable:$true] %s1437_s28 }
  0xbf   : > { %s10378_s23 = scalar_lea.vmem %s1410_s22, 16  ;;  %s10385_s3 = scalar_lea.vmem %s1410_s22, 32 }
  0xc0   : > { %p10379_p11 = scmp.ne.s32.totalorder %s1410_s22, %s10378_s23  ;;  %p10386_p2 = scmp.lt.s32.totalorder %s1410_s22, %s1410_s22 }
  0xc1   : > { %p10387_p3 = scmp.lt.s32.totalorder %s10385_s3, %s10378_s23 }
  0xc2   : > { %p10381_p0 = pnand %p10379_p11, %p11085_p13 }
  0xc3   : > { %p10388_p9 = por %p10387_p3, %p10386_p2 }
  0xc4   : > { %p10382_p1 = pneg %p10381_p0 }
  0xc6   : > { %p10389_p4 = pnand %p10388_p9, %p10382_p1 }
  0xc8   : > { %10392 = shalt.err (!%p10389_p4)
}
  0xc9   : > { %s13035_s4 = sld [smem:[#allocation60_spill]]  ;;  %s10404_s26 = scalar_lea.vmem %s1438_s28, 16 }
  0xca   : > { %p10405_p5 = scmp.ne.s32.totalorder %s1438_s28, %s10404_s26  ;;  %s10411_s10 = scalar_lea.vmem %s1438_s28, 32 }
  0xcb   : > { %p10412_p7 = scmp.lt.s32.totalorder %s1438_s28, %s1438_s28  ;;  %p10413_p8 = scmp.lt.s32.totalorder %s10411_s10, %s10404_s26 }
  0xcc   : > { %p10407_p6 = pnand %p10405_p5, %p11085_p13 }
  0xcd   : > { %p10414_p11 = por %p10413_p8, %p10412_p7 }
  0xce   : > { %p10408_p10 = pneg %p10407_p6 }
  0xcf   : > { %10071 = dma.hbm_to_vmem [thread:$0]  (!%p11077_p12), %s13035_s4, 16, %s1410_s22, [#allocation3]  }
  0xd0   : > { %p10415_p0 = pnand %p10414_p11, %p10408_p10 }
  0xd2   : > { %10418 = shalt.err (!%p10415_p0)
}
  0xd3   : > { %10077 = dma.hbm_to_vmem [thread:$0]  (!%p11077_p12), %s10911_s30, 16, %s1438_s28, [#allocation6]  }
  0xd4   : > { %s10726_s3 = smov [#allocation10]   ;;  %s10727_s6 = smov [#allocation13]  }
  0xd5   : > { %s1465_s1 = sshll.u32 %s10726_s3, 4  ;;  %s1493_s22 = sshll.u32 %s10727_s6, 4  ;;  %s1466_s1 = int_to_ptr.vmem [resolvable:$true] %s1465_s1  ;;  %s1494_s22 = int_to_ptr.vmem [resolvable:$true] %s1493_s22 }
  0xd6   : > { %s10430_s2 = scalar_lea.vmem %s1466_s1, 16  ;;  %s10437_s23 = scalar_lea.vmem %s1466_s1, 32 }
  0xd7   : > { %p10431_p1 = scmp.ne.s32.totalorder %s1466_s1, %s10430_s2  ;;  %p10438_p9 = scmp.lt.s32.totalorder %s1466_s1, %s1466_s1 }
  0xd8   : > { %p10439_p4 = scmp.lt.s32.totalorder %s10437_s23, %s10430_s2 }
  0xd9   : > { %p10433_p2 = pnand %p10431_p1, %p11085_p13 }
  0xda   : > { %p10440_p5 = por %p10439_p4, %p10438_p9 }
  0xdb   : > { %p10434_p3 = pneg %p10433_p2 }
  0xdd   : > { %p10441_p6 = pnand %p10440_p5, %p10434_p3 }
  0xdf   : > { %10444 = shalt.err (!%p10441_p6)
}
  0xe0   : > { %10083 = dma.hbm_to_vmem [thread:$0]  (!%p11077_p12), %s10931_s19, 16, %s1466_s1, [#allocation9]  }
  0xe1   : > { %s10456_s28 = scalar_lea.vmem %s1494_s22, 16  ;;  %s10463_s26 = scalar_lea.vmem %s1494_s22, 32 }
  0xe2   : > { %p10457_p10 = scmp.ne.s32.totalorder %s1494_s22, %s10456_s28  ;;  %p10464_p11 = scmp.lt.s32.totalorder %s1494_s22, %s1494_s22 }
  0xe3   : > { %p10465_p0 = scmp.lt.s32.totalorder %s10463_s26, %s10456_s28 }
  0xe4   : > { %p10459_p7 = pnand %p10457_p10, %p11085_p13 }
  0xe5   : > { %p10466_p1 = por %p10465_p0, %p10464_p11 }
  0xe6   : > { %p10460_p8 = pneg %p10459_p7 }
  0xe8   : > { %p10467_p2 = pnand %p10466_p1, %p10460_p8 }
  0xea   : > { %10470 = shalt.err (!%p10467_p2)
}
  0xeb   : > { %10089 = dma.hbm_to_vmem [thread:$0]  (!%p11077_p12), %s10951_s24, 16, %s1494_s22, [#allocation12]  }
  0xec   : > { %s10728_s10 = smov [#allocation16]   ;;  %s10729_s1 = smov [#allocation19]  }
  0xed   : > { %s1521_s3 = sshll.u32 %s10728_s10, 4  ;;  %s1549_s6 = sshll.u32 %s10729_s1, 4  ;;  %s1522_s3 = int_to_ptr.vmem [resolvable:$true] %s1521_s3  ;;  %s1550_s6 = int_to_ptr.vmem [resolvable:$true] %s1549_s6 }
  0xee   : > { %s10482_s2 = scalar_lea.vmem %s1522_s3, 16  ;;  %s10489_s23 = scalar_lea.vmem %s1522_s3, 32 }
  0xef   : > { %p10483_p3 = scmp.ne.s32.totalorder %s1522_s3, %s10482_s2  ;;  %p10490_p5 = scmp.lt.s32.totalorder %s1522_s3, %s1522_s3 }
  0xf0   : > { %p10491_p6 = scmp.lt.s32.totalorder %s10489_s23, %s10482_s2 }
  0xf1   : > { %p10485_p9 = pnand %p10483_p3, %p11085_p13 }
  0xf2   : > { %p10492_p10 = por %p10491_p6, %p10490_p5 }
  0xf3   : > { %p10486_p4 = pneg %p10485_p9 }
  0xf5   : > { %p10493_p7 = pnand %p10492_p10, %p10486_p4 }
  0xf7   : > { %10496 = shalt.err (!%p10493_p7)
}
  0xf8   : > { %s13036_s8 = sld [smem:[#allocation71_spill]]  ;;  %s10508_s22 = scalar_lea.vmem %s1550_s6, 16 }
  0xf9   : > { %p10509_p8 = scmp.ne.s32.totalorder %s1550_s6, %s10508_s22  ;;  %s10515_s28 = scalar_lea.vmem %s1550_s6, 32 }
  0xfa   : > { %p10516_p1 = scmp.lt.s32.totalorder %s1550_s6, %s1550_s6  ;;  %p10517_p2 = scmp.lt.s32.totalorder %s10515_s28, %s10508_s22 }
  0xfb   : > { %p10511_p11 = pnand %p10509_p8, %p11085_p13 }
  0xfc   : > { %p10518_p3 = por %p10517_p2, %p10516_p1 }
  0xfd   : > { %p10512_p0 = pneg %p10511_p11 }
  0xfe   : > { %10095 = dma.hbm_to_vmem [thread:$0]  (!%p11077_p12), %s13036_s8, 16, %s1522_s3, [#allocation15]  }
  0xff   : > { %p10519_p9 = pnand %p10518_p3, %p10512_p0 }
 0x101   : > { %10522 = shalt.err (!%p10519_p9)
}
 0x102   : > { %10101 = dma.hbm_to_vmem [thread:$0]  (!%p11077_p12), %s10991_s25, 16, %s1550_s6, [#allocation18]  }
 0x103   : > { %p13037_p4 = scmp.ne.s32.totalorder %s13030_s11, 0 }
 0x105   : > { %1576 = sbr.rel (%p13037_p4) target bundleno = 4145 (0x1031), region = 228 }
 0x10a   : > { %p13038_p5 = scmp.eq.s32.totalorder %s11039_s0, 0 }
 0x10c   : > { %10618 = dma.done.wait (%p13038_p5), [#allocation3], 16   ;;  %p13039_p6 = pmov %p13038_p5 }
 0x10d   : > { %p13040_p13 = pmov %p13038_p5 }
 0x10e   : > { %10620 = vsyncadd (%p13039_p6), [#allocation3], 4294967280 }
 0x10f   : > { %10622 = dma.done.wait (%p13040_p13), [#allocation6], 32   ;;  %p13041_p10 = pmov %p13038_p5 }
 0x110   : > { %p13042_p7 = pmov %p13038_p5 }
 0x111   : > { %10624 = vsyncadd (%p13041_p10), [#allocation6], 4294967264 }
 0x112   : > { %10626 = dma.done.wait (%p13042_p7), [#allocation9], 32   ;;  %p13043_p12 = pmov %p13038_p5 }
 0x113   : > { %p13044_p8 = pmov %p13038_p5 }
 0x114   : > { %10628 = vsyncadd (%p13043_p12), [#allocation9], 4294967264 }
 0x115   : > { %10630 = dma.done.wait (%p13044_p8), [#allocation12], 32   ;;  %p13045_p11 = pmov %p13038_p5 }
 0x116   : > { %p13046_p0 = pmov %p13038_p5 }
 0x117   : > { %10632 = vsyncadd (%p13045_p11), [#allocation12], 4294967264 }
 0x118   : > { %10634 = dma.done.wait (%p13046_p0), [#allocation15], 32   ;;  %p13047_p1 = pmov %p13046_p0 }
 0x119   : > { %p13048_p2 = pmov %p13046_p0 }
 0x11a   : > { %10636 = vsyncadd (%p13047_p1), [#allocation15], 4294967264 }
 0x11b   : > { %10638 = dma.done.wait (%p13048_p2), [#allocation18], 32   ;;  %p13049_p3 = pmov %p13046_p0 }
 0x11c   : > { %s13050_s5 = sld [smem:[#allocation32_spill]]  ;;  %p1752_p9 = scmp.lt.s32.totalorder %s11039_s0, 1  ;;  %vm1897_vm0 = vcmask 1042432   ;;  %v1792_v0 = vld [vmem:[%s13021_s9 + $0x18] sm:$0x7]  ;;  %v1791_v1 = vld [vmem:[%s13021_s9 + $0x10] sm:$0xff] }
 0x11d   : > { %10640 = vsyncadd (%p13049_p3), [#allocation18], 4294967264  ;;  %9403 = vmatprep.subr.msk.mxu0 %vm1897_vm0, %v1792_v0  ;;  %10010 = vmatprep.subr.msk.mxu1 %vm1897_vm0, %v1792_v0  ;;  %v1790_v2 = vld [vmem:[%s13021_s9 + $0x8] sm:$0xff]  ;;  %v1789_v3 = vld [vmem:[%s13021_s9] sm:$0xff]  ;;  %vm1800_vm1 = vcmask 220160   ;;  %s13051_s26 = sld [smem:[#allocation34_spill]] }
 0x11e   : > { %s1753_s15 = scalar_select %p1752_p9, %s11039_s0, 1  ;;  %9404 = vmatpush3.msk.msra.mxu0 %vm1897_vm0, %v1792_v0  ;;  %10014 = vmatpush3.msk.msra.mxu1 %vm1897_vm0, %v1792_v0  ;;  %v2166_v36 = vld [vmem:[%s10761_s17 + $0x8] sm:$0xff]  ;;  %vm3493_vm2 = vcmask 64512   ;;  %vm3640_vm3 = vcmask 523264   ;;  %vm4512_vm4 = vcmask 130048   ;;  %vm5394_vm5 = vcmask 261120  }
 0x11f   : > { %9405 = vmatprep.subr.mxu0 %v1791_v1  ;;  %10011 = vmatprep.subr.mxu1 %v1791_v1  ;;  %v8242_v37 = vld [vmem:[%s10761_s17 + $0x108] sm:$0xff]  ;;  %s13052_s10 = sld [smem:[#allocation35_spill]]  ;;  %vm10731_vm6 = vmmov 0   ;;  %vm6348_vm7 = vcmask 1043456   ;;  %vm6344_vm8 = vcmask 31744   ;;  %vm7126_vm9 = vcmask 519168  }
 0x120   : > { %s8585_s18 = sshll.u32 %s1753_s15, 8  ;;  %9406 = vmatpush3.msra.mxu0 %v1791_v1  ;;  %10015 = vmatpush3.msra.mxu1 %v1791_v1  ;;  %s13053_s3 = sld [smem:[#allocation36_spill]] }
 0x121   : > { %9407 = vmatprep.subr.mxu0 %v1790_v2  ;;  %10012 = vmatprep.subr.mxu1 %v1790_v2  ;;  %s13054_s1 = sld [smem:[#allocation37_spill]]  ;;  %p13122_p5 = scmp.ne.s32.totalorder %s13027_s7, 0 }
 0x122   : > { %s11182_s11 = scalar_lea.vmem %s13050_s5, %s8585_s18  ;;  %9408 = vmatpush3.msra.mxu0 %v1790_v2  ;;  %10016 = vmatpush3.msra.mxu1 %v1790_v2  ;;  %s13079_s6 = sld [smem:[#allocation39_spill]] }
 0x123   : > { %v1757_v4 = vld [vmem:[%s11182_s11] sm:$0xff]  ;;  %9409 = vmatprep.subr.mxu0 %v1789_v3  ;;  %10013 = vmatprep.subr.mxu1 %v1789_v3  ;;  %v1758_v6 = vld [vmem:[%s11182_s11 + $0x8] sm:$0xff]  ;;  %v1759_v8 = vld [vmem:[%s11182_s11 + $0x10] sm:$0xff]  ;;  %s13080_s2 = sld [smem:[#allocation38_spill]] }
 0x124   : > { %v1773_v5 = vld [vmem:[%s11182_s11 + $0x80] sm:$0xff]  ;;  %v1774_v7 = vld [vmem:[%s11182_s11 + $0x88] sm:$0xff]  ;;  %9410 = vmatpush3.msra.mxu0 %v1789_v3  ;;  %10017 = vmatpush3.msra.mxu1 %v1789_v3  ;;  %v1775_v9 = vld [vmem:[%s11182_s11 + $0x90] sm:$0xff]  ;;  %s13081_s23 = sld [smem:[#allocation42_spill]] }
 0x125   : > { %9411 = vmatprep.mubr.msk.f32.mxu0 %vm1800_vm1, %v1757_v4  ;;  %9435 = vmatprep.mubr.msk.f32.mxu1 %vm1800_vm1, %v1773_v5  ;;  %v1760_v10 = vld [vmem:[%s11182_s11 + $0x18] sm:$0xff]  ;;  %v1761_v12 = vld [vmem:[%s11182_s11 + $0x20] sm:$0xff]  ;;  %v1762_v14 = vld [vmem:[%s11182_s11 + $0x28] sm:$0xff]  ;;  %s13082_s22 = sld [smem:[#allocation40_spill]] }
 0x126   : > { %9412 = vmatmul.mubr.msk.f32.vlgmr.msra.gmra.mxu0 %vm1800_vm1, %v1758_v6  ;;  %9436 = vmatmul.mubr.msk.f32.vlgmr.msra.gmra.mxu1 %vm1800_vm1, %v1774_v7  ;;  %v1776_v11 = vld [vmem:[%s11182_s11 + $0x98] sm:$0xff]  ;;  %v1777_v13 = vld [vmem:[%s11182_s11 + $0xa0] sm:$0xff]  ;;  %v1778_v15 = vld [vmem:[%s11182_s11 + $0xa8] sm:$0xff]  ;;  %s13084_s15 = sld [smem:[#allocation41_spill]] }
 0x127   : > { %9414 = vmatprep.mubr.msk.f32.mxu0 %vm1800_vm1, %v1759_v8  ;;  %9438 = vmatprep.mubr.msk.f32.mxu1 %vm1800_vm1, %v1775_v9  ;;  %v1763_v16 = vld [vmem:[%s11182_s11 + $0x30] sm:$0xff]  ;;  %v1764_v18 = vld [vmem:[%s11182_s11 + $0x38] sm:$0xff]  ;;  %v1765_v20 = vld [vmem:[%s11182_s11 + $0x40] sm:$0xff]  ;;  %s13085_s18 = sld [smem:[#allocation44_spill]] }
 0x128   : > { %v1779_v17 = vld [vmem:[%s11182_s11 + $0xb0] sm:$0xff]  ;;  %v1780_v19 = vld [vmem:[%s11182_s11 + $0xb8] sm:$0xff]  ;;  %v1781_v21 = vld [vmem:[%s11182_s11 + $0xc0] sm:$0xff]  ;;  %s13098_s4 = sld [smem:[#allocation51_spill]] }
 0x129   : > { %v1766_v22 = vld [vmem:[%s11182_s11 + $0x48] sm:$0xff]  ;;  %v1767_v24 = vld [vmem:[%s11182_s11 + $0x50] sm:$0xff]  ;;  %v1768_v26 = vld [vmem:[%s11182_s11 + $0x58] sm:$0xff] }
 0x12a   : > { %9415 = vmatmul.mubr.msk.f32.gmra.mxu0 %vm1800_vm1, %v1760_v10  ;;  %9439 = vmatmul.mubr.msk.f32.gmra.mxu1 %vm1800_vm1, %v1776_v11  ;;  %v1782_v23 = vld [vmem:[%s11182_s11 + $0xc8] sm:$0xff]  ;;  %v1783_v25 = vld [vmem:[%s11182_s11 + $0xd0] sm:$0xff]  ;;  %v1784_v27 = vld [vmem:[%s11182_s11 + $0xd8] sm:$0xff] }
 0x12b   : > { %9417 = vmatprep.mubr.msk.f32.mxu0 %vm1800_vm1, %v1761_v12  ;;  %9441 = vmatprep.mubr.msk.f32.mxu1 %vm1800_vm1, %v1777_v13  ;;  %v1769_v28 = vld [vmem:[%s11182_s11 + $0x60] sm:$0xff]  ;;  %v1770_v30 = vld [vmem:[%s11182_s11 + $0x68] sm:$0xff]  ;;  %v1771_v32 = vld [vmem:[%s11182_s11 + $0x70] sm:$0xff]  ;;  %s13083_s28 = smov %s13082_s22 }
 0x12c   : > { %v1785_v29 = vld [vmem:[%s11182_s11 + $0xe0] sm:$0xff]  ;;  %v1786_v31 = vld [vmem:[%s11182_s11 + $0xe8] sm:$0xff]  ;;  %v1787_v33 = vld [vmem:[%s11182_s11 + $0xf0] sm:$0xff] }
 0x12d   : > { %v1772_v34 = vld [vmem:[%s11182_s11 + $0x78] sm:$0xff]  ;;  %v11284_v2 = vld [vmem:[%s13051_s26] ss:$0 sm:$0xff]  ;;  %s13087_s26 = sld [smem:[#allocation43_spill]] }
 0x12e   : > { %9418 = vmatmul.mubr.msk.f32.gmra.mxu0 %vm1800_vm1, %v1762_v14  ;;  %9442 = vmatmul.mubr.msk.f32.gmra.mxu1 %vm1800_vm1, %v1778_v15  ;;  %v1788_v35 = vld [vmem:[%s11182_s11 + $0xf8] sm:$0xff]  ;;  %s13086_s11 = smov %s13085_s18 }
 0x12f   : > { %9420 = vmatprep.mubr.msk.f32.mxu0 %vm1800_vm1, %v1763_v16  ;;  %9444 = vmatprep.mubr.msk.f32.mxu1 %vm1800_vm1, %v1779_v17 }
 0x132   : > { %9421 = vmatmul.mubr.msk.f32.gmra.mxu0 %vm1800_vm1, %v1764_v18  ;;  %9445 = vmatmul.mubr.msk.f32.gmra.mxu1 %vm1800_vm1, %v1780_v19 }
 0x133   : > { %9423 = vmatprep.mubr.msk.f32.mxu0 %vm1800_vm1, %v1765_v20  ;;  %9447 = vmatprep.mubr.msk.f32.mxu1 %vm1800_vm1, %v1781_v21 }
 0x136   : > { %9424 = vmatmul.mubr.msk.f32.gmra.mxu0 %vm1800_vm1, %v1766_v22  ;;  %9448 = vmatmul.mubr.msk.f32.gmra.mxu1 %vm1800_vm1, %v1782_v23 }
 0x137   : > { %9426 = vmatprep.mubr.msk.f32.mxu0 %vm1800_vm1, %v1767_v24  ;;  %9450 = vmatprep.mubr.msk.f32.mxu1 %vm1800_vm1, %v1783_v25 }
 0x13a   : > { %9427 = vmatmul.mubr.msk.f32.gmra.mxu0 %vm1800_vm1, %v1768_v26  ;;  %9451 = vmatmul.mubr.msk.f32.gmra.mxu1 %vm1800_vm1, %v1784_v27 }
 0x13b   : > { %9429 = vmatprep.mubr.msk.f32.mxu0 %vm1800_vm1, %v1769_v28  ;;  %9453 = vmatprep.mubr.msk.f32.mxu1 %vm1800_vm1, %v1785_v29 }
 0x13e   : > { %9430 = vmatmul.mubr.msk.f32.gmra.mxu0 %vm1800_vm1, %v1770_v30  ;;  %9454 = vmatmul.mubr.msk.f32.gmra.mxu1 %vm1800_vm1, %v1786_v31 }
 0x13f   : > { %9432 = vmatprep.mubr.msk.f32.mxu0 %vm1800_vm1, %v1771_v32  ;;  %9456 = vmatprep.mubr.msk.f32.mxu1 %vm1800_vm1, %v1787_v33 }
 0x142   : > { %9433 = vmatmul.mubr.msk.f32.gmra.mxu0 %vm1800_vm1, %v1772_v34  ;;  %9457 = vmatmul.mubr.msk.f32.gmra.mxu1 %vm1800_vm1, %v1788_v35 }
 0x143   : > { %2245 = vmatprep.mubr.f32.mxu1 %v2166_v36  ;;  %2536 = vmatprep.mubr.f32.mxu0 %v8242_v37 }
 0x1e6   : > { %v11251_v38 = vpop.f32.mrf.mxu0  ;;  %v11253_v39 = vpop.f32.mrf.mxu1 }
 0x1e8   : > { %v11255_v40 = vpop.f32.mrf.mxu0  ;;  %v11257_v41 = vpop.f32.mrf.mxu1 }
 0x1ea   : > { %v11259_v42 = vpop.f32.mrf.mxu0  ;;  %v11261_v43 = vpop.f32.mrf.mxu1 }
 0x1ec   : > { %v11263_v44 = vpop.f32.mrf.mxu0  ;;  %v11265_v45 = vpop.f32.mrf.mxu1 }
 0x1ee   : > { %v11267_v46 = vpop.f32.mrf.mxu0  ;;  %v11269_v47 = vpop.f32.mrf.mxu1 }
 0x1f0   : > { %v11271_v48 = vpop.f32.mrf.mxu0  ;;  %v11273_v49 = vpop.f32.mrf.mxu1 }
 0x1f2   : > { %v11275_v50 = vpop.f32.mrf.mxu0  ;;  %v11277_v51 = vpop.f32.mrf.mxu1 }
 0x1f3   : > { %v2083_v35 = vadd.f32 %v11277_v51, %v11284_v2  ;;  %v2003_v37 = vadd.f32 %v11275_v50, %v11284_v2  ;;  %v2073_v50 = vadd.f32 %v11269_v47, %v11284_v2  ;;  %v1988_v47 = vadd.f32 %v11284_v2, %v11271_v48 }
 0x1f4   : > { %v11279_v52 = vpop.f32.mrf.mxu0  ;;  %v11281_v53 = vpop.f32.mrf.mxu1  ;;  %v2058_v48 = vadd.f32 %v11284_v2, %v11265_v45  ;;  %v1973_v45 = vadd.f32 %v11251_v38, %v11284_v2 }
 0x1f5   : > { %v1998_v51 = vadd.f32 %v11284_v2, %v11279_v52  ;;  %v2068_v52 = vadd.f32 %v11284_v2, %v11273_v49  ;;  %v1983_v49 = vadd.f32 %v11259_v42, %v11284_v2  ;;  %v2053_v42 = vadd.f32 %v11253_v39, %v11284_v2 }
 0x1f6   : > { %v9425_v54 = vpop.f32.mrf.mxu0  ;;  %v9449_v55 = vpop.f32.mrf.mxu1  ;;  %v1968_v39 = vadd.f32 %v11284_v2, %v11255_v40 }
 0x1f7   : > { %v2093_v27 = vadd.f32 %v9449_v55, %v11284_v2  ;;  %v2013_v29 = vadd.f32 %v9425_v54, %v11284_v2  ;;  %v2078_v55 = vadd.f32 %v11284_v2, %v11281_v53  ;;  %v1993_v53 = vadd.f32 %v11267_v46, %v11284_v2 }
 0x1f8   : > { %v2007_v56 = vpop.f32.mrf.mxu0  ;;  %v2087_v57 = vpop.f32.mrf.mxu1  ;;  %v2063_v46 = vadd.f32 %v11261_v43, %v11284_v2  ;;  %v1978_v43 = vadd.f32 %v11284_v2, %v11263_v44  ;;  %v2048_v44 = vadd.f32 %v11284_v2, %v11257_v41  ;;  %v11446_v41 = vmax.f32 %v1973_v45, 0.0  ;;  %v8255_v45 = vld [vmem:[%s10761_s17 + $0x170] sm:$0xff] }
 0x1f9   : > { %v2088_v31 = vadd.f32 %v11284_v2, %v2087_v57  ;;  %v2008_v33 = vadd.f32 %v11284_v2, %v2007_v56  ;;  %v11348_v36 = vmax.f32 %v2093_v27, 0.0  ;;  %v11354_v54 = vmax.f32 %v2013_v29, 0.0  ;;  %v8248_v27 = vld [vmem:[%s10761_s17 + $0x138] sm:$0xff]  ;;  %v8247_v29 = vld [vmem:[%s10761_s17 + $0x130] sm:$0xff] }
 0x1fa   : > { %v9428_v58 = vpop.f32.mrf.mxu0  ;;  %v9452_v59 = vpop.f32.mrf.mxu1  ;;  %v11438_v38 = vmax.f32 %v1978_v43, 0.0  ;;  %v11450_v40 = vmax.f32 %v2048_v44, 0.0  ;;  %v2179_v43 = vld [vmem:[%s10761_s17 + $0x70] sm:$0xff]  ;;  %v8224_v44 = vld [vmem:[%s10761_s17 + $0x88] sm:$0xff] }
 0x1fb   : > { %v2103_v19 = vadd.f32 %v9452_v59, %v11284_v2  ;;  %v2023_v21 = vadd.f32 %v9428_v58, %v11284_v2  ;;  %v11360_v56 = vmax.f32 %v2088_v31, 0.0  ;;  %v11366_v57 = vmax.f32 %v2008_v33, 0.0  ;;  %v2174_v31 = vld [vmem:[%s10761_s17 + $0x48] sm:$0xff]  ;;  %v2173_v33 = vld [vmem:[%s10761_s17 + $0x40] sm:$0xff] }
 0x1fc   : > { %v2017_v60 = vpop.f32.mrf.mxu0  ;;  %v2097_v61 = vpop.f32.mrf.mxu1  ;;  %v11372_v58 = vmax.f32 %v2083_v35, 0.0  ;;  %v11378_v59 = vmax.f32 %v2003_v37, 0.0  ;;  %v8250_v35 = vld [vmem:[%s10761_s17 + $0x148] sm:$0xff]  ;;  %v8249_v37 = vld [vmem:[%s10761_s17 + $0x140] sm:$0xff] }
 0x1fd   : > { %v2098_v23 = vadd.f32 %v11284_v2, %v2097_v61  ;;  %v2018_v25 = vadd.f32 %v11284_v2, %v2017_v60  ;;  %v11327_v28 = vmax.f32 %v2103_v19, 0.0  ;;  %v11332_v30 = vmax.f32 %v2023_v21, 0.0  ;;  %v8246_v19 = vld [vmem:[%s10761_s17 + $0x128] sm:$0xff]  ;;  %v8245_v21 = vld [vmem:[%s10761_s17 + $0x120] sm:$0xff] }
 0x1fe   : > { %v9431_v62 = vpop.f32.mrf.mxu0  ;;  %v9455_v63 = vpop.f32.mrf.mxu1  ;;  %v11384_v60 = vmax.f32 %v2078_v55, 0.0  ;;  %v11390_v61 = vmax.f32 %v1998_v51, 0.0  ;;  %v2176_v55 = vld [vmem:[%s10761_s17 + $0x58] sm:$0xff]  ;;  %v2175_v51 = vld [vmem:[%s10761_s17 + $0x50] sm:$0xff] }
 0x1ff   : > { %v2113_v7 = vadd.f32 %v9455_v63, %v11284_v2  ;;  %v2033_v14 = vadd.f32 %v9431_v62, %v11284_v2  ;;  %v11337_v32 = vmax.f32 %v2098_v23, 0.0  ;;  %v11342_v34 = vmax.f32 %v2018_v25, 0.0  ;;  %v2172_v23 = vld [vmem:[%s10761_s17 + $0x38] sm:$0xff]  ;;  %v2171_v25 = vld [vmem:[%s10761_s17 + $0x30] sm:$0xff] }
 0x200   : > { %v2027_v0 = vpop.f32.mrf.mxu0  ;;  %v2107_v1 = vpop.f32.mrf.mxu1  ;;  %v11396_v62 = vmax.f32 %v2073_v50, 0.0  ;;  %v11402_v63 = vmax.f32 %v1993_v53, 0.0  ;;  %v8252_v50 = vld [vmem:[%s10761_s17 + $0x158] sm:$0xff]  ;;  %v8251_v53 = vld [vmem:[%s10761_s17 + $0x150] sm:$0xff] }
 0x201   : > { %v2108_v15 = vadd.f32 %v11284_v2, %v2107_v1  ;;  %v2028_v18 = vadd.f32 %v11284_v2, %v2027_v0  ;;  %v11307_v20 = vmax.f32 %v2113_v7, 0.0  ;;  %v11312_v22 = vmax.f32 %v2033_v14, 0.0  ;;  %v2165_v7 = vld [vmem:[%s10761_s17] sm:$0xff]  ;;  %v8243_v14 = vld [vmem:[%s10761_s17 + $0x110] sm:$0xff] }
 0x202   : > { %v9434_v3 = vpop.f32.mrf.mxu0  ;;  %v9458_v4 = vpop.f32.mrf.mxu1  ;;  %v11408_v0 = vmax.f32 %v2068_v52, 0.0  ;;  %v11414_v1 = vmax.f32 %v1988_v47, 0.0  ;;  %v2178_v52 = vld [vmem:[%s10761_s17 + $0x68] sm:$0xff]  ;;  %v2177_v47 = vld [vmem:[%s10761_s17 + $0x60] sm:$0xff] }
 0x203   : > { %v2043_v5 = vadd.f32 %v9434_v3, %v11284_v2  ;;  %v2123_v6 = vadd.f32 %v9458_v4, %v11284_v2  ;;  %v11317_v24 = vmax.f32 %v2108_v15, 0.0  ;;  %v11322_v26 = vmax.f32 %v2028_v18, 0.0  ;;  %v2170_v15 = vld [vmem:[%s10761_s17 + $0x28] sm:$0xff]  ;;  %v2169_v18 = vld [vmem:[%s10761_s17 + $0x20] sm:$0xff] }
 0x204   : > { %v2037_v8 = vpop.f32.mrf.mxu0  ;;  %v2117_v9 = vpop.f32.mrf.mxu1  ;;  %v11420_v3 = vmax.f32 %v2063_v46, 0.0  ;;  %v11426_v4 = vmax.f32 %v1983_v49, 0.0  ;;  %v8254_v46 = vld [vmem:[%s10761_s17 + $0x168] sm:$0xff]  ;;  %v8253_v49 = vld [vmem:[%s10761_s17 + $0x160] sm:$0xff] }
 0x205   : > { %v11289_v10 = vmax.f32 %v2043_v5, 0.0  ;;  %v11291_v11 = vmax.f32 %v2123_v6, 0.0  ;;  %v2038_v12 = vadd.f32 %v11284_v2, %v2037_v8  ;;  %v2118_v13 = vadd.f32 %v11284_v2, %v2117_v9  ;;  %v8241_v8 = vld [vmem:[%s10761_s17 + $0x100] sm:$0xff]  ;;  %v2168_v9 = vld [vmem:[%s10761_s17 + $0x18] sm:$0xff] }
 0x206   : > { %v11432_v5 = vmax.f32 %v2058_v48, 0.0  ;;  %v11442_v6 = vmax.f32 %v2053_v42, 0.0  ;;  %v11454_v2 = vmax.f32 %v1968_v39, 0.0  ;;  %v2180_v48 = vld [vmem:[%s10761_s17 + $0x78] sm:$0xff]  ;;  %v8223_v39 = vld [vmem:[%s10761_s17 + $0x80] sm:$0xff] }
 0x207   : > { %v11297_v16 = vmax.f32 %v2038_v12, 0.0  ;;  %v11299_v17 = vmax.f32 %v2118_v13, 0.0  ;;  %8624 = vmatprep.subr.mxu1 %v11291_v11  ;;  %8736 = vmatprep.subr.mxu0 %v11291_v11  ;;  %v2167_v12 = vld [vmem:[%s10761_s17 + $0x10] sm:$0xff]  ;;  %v8244_v13 = vld [vmem:[%s10761_s17 + $0x118] sm:$0xff] }
 0x208   : > { %8625 = vmatpush3.msra.mxu1 %v11289_v10  ;;  %8737 = vmatpush3.msra.mxu0 %v11289_v10  ;;  %v8256_v42 = vld [vmem:[%s10761_s17 + $0x178] sm:$0xff] }
 0x209   : > { %8626 = vmatprep.subr.mxu1 %v11299_v17  ;;  %8738 = vmatprep.subr.mxu0 %v11299_v17 }
 0x20a   : > { %8627 = vmatpush3.msra.mxu1 %v11297_v16  ;;  %8739 = vmatpush3.msra.mxu0 %v11297_v16 }
 0x20b   : > { %8628 = vmatprep.subr.mxu1 %v11307_v20  ;;  %8740 = vmatprep.subr.mxu0 %v11307_v20 }
 0x20c   : > { %8629 = vmatpush3.msra.mxu1 %v11312_v22  ;;  %8741 = vmatpush3.msra.mxu0 %v11312_v22 }
 0x20d   : > { %8630 = vmatprep.subr.mxu1 %v11317_v24  ;;  %8742 = vmatprep.subr.mxu0 %v11317_v24 }
 0x20e   : > { %8631 = vmatpush3.msra.mxu1 %v11322_v26  ;;  %8743 = vmatpush3.msra.mxu0 %v11322_v26 }
 0x20f   : > { %8632 = vmatprep.subr.mxu1 %v11327_v28  ;;  %8744 = vmatprep.subr.mxu0 %v11327_v28 }
 0x210   : > { %8633 = vmatpush3.msra.mxu1 %v11332_v30  ;;  %8745 = vmatpush3.msra.mxu0 %v11332_v30 }
 0x211   : > { %8634 = vmatprep.subr.mxu1 %v11337_v32  ;;  %8746 = vmatprep.subr.mxu0 %v11337_v32 }
 0x212   : > { %8635 = vmatpush3.msra.mxu1 %v11342_v34  ;;  %8747 = vmatpush3.msra.mxu0 %v11342_v34 }
 0x213   : > { %8636 = vmatprep.subr.mxu1 %v11348_v36  ;;  %8748 = vmatprep.subr.mxu0 %v11348_v36 }
 0x214   : > { %8637 = vmatpush3.msra.mxu1 %v11354_v54  ;;  %8749 = vmatpush3.msra.mxu0 %v11354_v54 }
 0x215   : > { %8638 = vmatprep.subr.mxu1 %v11360_v56  ;;  %8750 = vmatprep.subr.mxu0 %v11360_v56 }
 0x216   : > { %8639 = vmatpush3.msra.mxu1 %v11366_v57  ;;  %8751 = vmatpush3.msra.mxu0 %v11366_v57 }
 0x217   : > { %8640 = vmatprep.subr.mxu1 %v11372_v58  ;;  %8752 = vmatprep.subr.mxu0 %v11372_v58 }
 0x218   : > { %8641 = vmatpush3.msra.mxu1 %v11378_v59  ;;  %8753 = vmatpush3.msra.mxu0 %v11378_v59 }
 0x219   : > { %8642 = vmatprep.subr.mxu1 %v11384_v60  ;;  %8754 = vmatprep.subr.mxu0 %v11384_v60 }
 0x21a   : > { %8643 = vmatpush3.msra.mxu1 %v11390_v61  ;;  %8755 = vmatpush3.msra.mxu0 %v11390_v61 }
 0x21b   : > { %8644 = vmatprep.subr.mxu1 %v11396_v62  ;;  %8756 = vmatprep.subr.mxu0 %v11396_v62 }
 0x21c   : > { %8645 = vmatpush3.msra.mxu1 %v11402_v63  ;;  %8757 = vmatpush3.msra.mxu0 %v11402_v63 }
 0x21d   : > { %8646 = vmatprep.subr.mxu1 %v11408_v0  ;;  %8758 = vmatprep.subr.mxu0 %v11408_v0 }
 0x21e   : > { %8647 = vmatpush3.msra.mxu1 %v11414_v1  ;;  %8759 = vmatpush3.msra.mxu0 %v11414_v1 }
 0x21f   : > { %8648 = vmatprep.subr.mxu1 %v11420_v3  ;;  %8760 = vmatprep.subr.mxu0 %v11420_v3 }
 0x220   : > { %8649 = vmatpush3.msra.mxu1 %v11426_v4  ;;  %8761 = vmatpush3.msra.mxu0 %v11426_v4 }
 0x221   : > { %8650 = vmatprep.subr.mxu1 %v11432_v5  ;;  %8762 = vmatprep.subr.mxu0 %v11432_v5 }
 0x222   : > { %8651 = vmatpush3.msra.mxu1 %v11438_v38  ;;  %8763 = vmatpush3.msra.mxu0 %v11438_v38 }
 0x223   : > { %8652 = vmatprep.subr.mxu1 %v11442_v6  ;;  %8764 = vmatprep.subr.mxu0 %v11442_v6 }
 0x224   : > { %8653 = vmatpush3.msra.mxu1 %v11446_v41  ;;  %8765 = vmatpush3.msra.mxu0 %v11446_v41 }
 0x225   : > { %8654 = vmatprep.subr.mxu1 %v11450_v40  ;;  %8766 = vmatprep.subr.mxu0 %v11450_v40 }
 0x226   : > { %8655 = vmatpush3.msra.mxu1 %v11454_v2  ;;  %8767 = vmatpush3.msra.mxu0 %v11454_v2 }
 0x227   : > { %2246 = vmatmul.mubr.f32.vlgmr.msra.gmra.mxu1 %v2165_v7  ;;  %8680 = vmatprep.subr.mxu1 %v11291_v11  ;;  %v8278_v7 = vld [vmem:[%s10761_s17 + $0x208] sm:$0xff] }
 0x228   : > { %8848 = vmatprep.subr.mxu0 %v11291_v11  ;;  %8681 = vmatpush3.msra.mxu1 %v11289_v10 }
 0x229   : > { %2537 = vmatmul.mubr.f32.vlgmr.msra.gmra.mxu0 %v8241_v8  ;;  %8682 = vmatprep.subr.mxu1 %v11299_v17  ;;  %v8277_v8 = vld [vmem:[%s10761_s17 + $0x200] sm:$0xff] }
 0x22a   : > { %8849 = vmatpush3.msra.mxu0 %v11289_v10  ;;  %2250 = vmatprep.mubr.f32.mxu1 %v2168_v9  ;;  %v8226_v9 = vld [vmem:[%s10761_s17 + $0x98] sm:$0xff] }
 0x22b   : > { %8850 = vmatprep.subr.mxu0 %v11299_v17  ;;  %8683 = vmatpush3.msra.mxu1 %v11297_v16 }
 0x22c   : > { %8851 = vmatpush3.msra.mxu0 %v11297_v16  ;;  %2251 = vmatmul.mubr.f32.gmra.mxu1 %v2167_v12  ;;  %v8225_v12 = vld [vmem:[%s10761_s17 + $0x90] sm:$0xff] }
 0x22d   : > { %8684 = vmatprep.subr.mxu1 %v11307_v20  ;;  %2541 = vmatprep.mubr.f32.mxu0 %v8244_v13  ;;  %v8280_v13 = vld [vmem:[%s10761_s17 + $0x218] sm:$0xff] }
 0x22e   : > { %8852 = vmatprep.subr.mxu0 %v11307_v20  ;;  %8685 = vmatpush3.msra.mxu1 %v11312_v22 }
 0x22f   : > { %2542 = vmatmul.mubr.f32.gmra.mxu0 %v8243_v14  ;;  %8686 = vmatprep.subr.mxu1 %v11317_v24  ;;  %v8279_v14 = vld [vmem:[%s10761_s17 + $0x210] sm:$0xff] }
 0x230   : > { %8853 = vmatpush3.msra.mxu0 %v11312_v22  ;;  %2255 = vmatprep.mubr.f32.mxu1 %v2170_v15  ;;  %v8228_v15 = vld [vmem:[%s10761_s17 + $0xa8] sm:$0xff] }
 0x231   : > { %8854 = vmatprep.subr.mxu0 %v11317_v24  ;;  %8687 = vmatpush3.msra.mxu1 %v11322_v26 }
 0x232   : > { %8855 = vmatpush3.msra.mxu0 %v11322_v26  ;;  %2256 = vmatmul.mubr.f32.gmra.mxu1 %v2169_v18  ;;  %v8227_v18 = vld [vmem:[%s10761_s17 + $0xa0] sm:$0xff] }
 0x233   : > { %8688 = vmatprep.subr.mxu1 %v11327_v28  ;;  %2546 = vmatprep.mubr.f32.mxu0 %v8246_v19  ;;  %v8282_v19 = vld [vmem:[%s10761_s17 + $0x228] sm:$0xff] }
 0x234   : > { %8856 = vmatprep.subr.mxu0 %v11327_v28  ;;  %8689 = vmatpush3.msra.mxu1 %v11332_v30 }
 0x235   : > { %2547 = vmatmul.mubr.f32.gmra.mxu0 %v8245_v21  ;;  %8690 = vmatprep.subr.mxu1 %v11337_v32  ;;  %v8281_v21 = vld [vmem:[%s10761_s17 + $0x220] sm:$0xff] }
 0x236   : > { %8857 = vmatpush3.msra.mxu0 %v11332_v30  ;;  %2260 = vmatprep.mubr.f32.mxu1 %v2172_v23  ;;  %v8230_v23 = vld [vmem:[%s10761_s17 + $0xb8] sm:$0xff] }
 0x237   : > { %8858 = vmatprep.subr.mxu0 %v11337_v32  ;;  %8691 = vmatpush3.msra.mxu1 %v11342_v34 }
 0x238   : > { %8859 = vmatpush3.msra.mxu0 %v11342_v34  ;;  %2261 = vmatmul.mubr.f32.gmra.mxu1 %v2171_v25  ;;  %v8229_v25 = vld [vmem:[%s10761_s17 + $0xb0] sm:$0xff] }
 0x239   : > { %8692 = vmatprep.subr.mxu1 %v11348_v36  ;;  %2551 = vmatprep.mubr.f32.mxu0 %v8248_v27  ;;  %v8284_v27 = vld [vmem:[%s10761_s17 + $0x238] sm:$0xff] }
 0x23a   : > { %8860 = vmatprep.subr.mxu0 %v11348_v36  ;;  %8693 = vmatpush3.msra.mxu1 %v11354_v54 }
 0x23b   : > { %2552 = vmatmul.mubr.f32.gmra.mxu0 %v8247_v29  ;;  %8694 = vmatprep.subr.mxu1 %v11360_v56  ;;  %v8283_v29 = vld [vmem:[%s10761_s17 + $0x230] sm:$0xff] }
 0x23c   : > { %8861 = vmatpush3.msra.mxu0 %v11354_v54  ;;  %2265 = vmatprep.mubr.f32.mxu1 %v2174_v31  ;;  %v8232_v31 = vld [vmem:[%s10761_s17 + $0xc8] sm:$0xff] }
 0x23d   : > { %8862 = vmatprep.subr.mxu0 %v11360_v56  ;;  %8695 = vmatpush3.msra.mxu1 %v11366_v57 }
 0x23e   : > { %8863 = vmatpush3.msra.mxu0 %v11366_v57  ;;  %2266 = vmatmul.mubr.f32.gmra.mxu1 %v2173_v33  ;;  %v8231_v33 = vld [vmem:[%s10761_s17 + $0xc0] sm:$0xff] }
 0x23f   : > { %8696 = vmatprep.subr.mxu1 %v11372_v58  ;;  %2556 = vmatprep.mubr.f32.mxu0 %v8250_v35  ;;  %v8286_v35 = vld [vmem:[%s10761_s17 + $0x248] sm:$0xff] }
 0x240   : > { %8864 = vmatprep.subr.mxu0 %v11372_v58  ;;  %8697 = vmatpush3.msra.mxu1 %v11378_v59 }
 0x241   : > { %2557 = vmatmul.mubr.f32.gmra.mxu0 %v8249_v37  ;;  %8698 = vmatprep.subr.mxu1 %v11384_v60  ;;  %v8285_v37 = vld [vmem:[%s10761_s17 + $0x240] sm:$0xff] }
 0x242   : > { %8865 = vmatpush3.msra.mxu0 %v11378_v59  ;;  %2270 = vmatprep.mubr.f32.mxu1 %v2176_v55  ;;  %v8234_v55 = vld [vmem:[%s10761_s17 + $0xd8] sm:$0xff] }
 0x243   : > { %8866 = vmatprep.subr.mxu0 %v11384_v60  ;;  %8699 = vmatpush3.msra.mxu1 %v11390_v61 }
 0x244   : > { %8867 = vmatpush3.msra.mxu0 %v11390_v61  ;;  %2271 = vmatmul.mubr.f32.gmra.mxu1 %v2175_v51  ;;  %v8233_v51 = vld [vmem:[%s10761_s17 + $0xd0] sm:$0xff] }
 0x245   : > { %8700 = vmatprep.subr.mxu1 %v11396_v62  ;;  %2561 = vmatprep.mubr.f32.mxu0 %v8252_v50  ;;  %v8288_v50 = vld [vmem:[%s10761_s17 + $0x258] sm:$0xff] }
 0x246   : > { %8868 = vmatprep.subr.mxu0 %v11396_v62  ;;  %8701 = vmatpush3.msra.mxu1 %v11402_v63 }
 0x247   : > { %2562 = vmatmul.mubr.f32.gmra.mxu0 %v8251_v53  ;;  %8702 = vmatprep.subr.mxu1 %v11408_v0  ;;  %v8287_v53 = vld [vmem:[%s10761_s17 + $0x250] sm:$0xff] }
 0x248   : > { %8869 = vmatpush3.msra.mxu0 %v11402_v63  ;;  %2275 = vmatprep.mubr.f32.mxu1 %v2178_v52  ;;  %v8236_v52 = vld [vmem:[%s10761_s17 + $0xe8] sm:$0xff] }
 0x249   : > { %8870 = vmatprep.subr.mxu0 %v11408_v0  ;;  %8703 = vmatpush3.msra.mxu1 %v11414_v1 }
 0x24a   : > { %8871 = vmatpush3.msra.mxu0 %v11414_v1  ;;  %2276 = vmatmul.mubr.f32.gmra.mxu1 %v2177_v47  ;;  %v8235_v47 = vld [vmem:[%s10761_s17 + $0xe0] sm:$0xff] }
 0x24b   : > { %8704 = vmatprep.subr.mxu1 %v11420_v3  ;;  %2566 = vmatprep.mubr.f32.mxu0 %v8254_v46  ;;  %v8290_v46 = vld [vmem:[%s10761_s17 + $0x268] sm:$0xff] }
 0x24c   : > { %8872 = vmatprep.subr.mxu0 %v11420_v3  ;;  %8705 = vmatpush3.msra.mxu1 %v11426_v4 }
 0x24d   : > { %2567 = vmatmul.mubr.f32.gmra.mxu0 %v8253_v49  ;;  %8706 = vmatprep.subr.mxu1 %v11432_v5  ;;  %v8289_v49 = vld [vmem:[%s10761_s17 + $0x260] sm:$0xff] }
 0x24e   : > { %8873 = vmatpush3.msra.mxu0 %v11426_v4  ;;  %2280 = vmatprep.mubr.f32.mxu1 %v2180_v48  ;;  %v8238_v48 = vld [vmem:[%s10761_s17 + $0xf8] sm:$0xff] }
 0x24f   : > { %8874 = vmatprep.subr.mxu0 %v11432_v5  ;;  %8707 = vmatpush3.msra.mxu1 %v11438_v38 }
 0x250   : > { %8875 = vmatpush3.msra.mxu0 %v11438_v38  ;;  %2281 = vmatmul.mubr.f32.gmra.mxu1 %v2179_v43  ;;  %v8237_v43 = vld [vmem:[%s10761_s17 + $0xf0] sm:$0xff] }
 0x251   : > { %8708 = vmatprep.subr.mxu1 %v11442_v6  ;;  %2571 = vmatprep.mubr.f32.mxu0 %v8256_v42  ;;  %v8292_v42 = vld [vmem:[%s10761_s17 + $0x278] sm:$0xff] }
 0x252   : > { %8876 = vmatprep.subr.mxu0 %v11442_v6  ;;  %8709 = vmatpush3.msra.mxu1 %v11446_v41 }
 0x253   : > { %2572 = vmatmul.mubr.f32.gmra.mxu0 %v8255_v45  ;;  %8710 = vmatprep.subr.mxu1 %v11450_v40  ;;  %v8291_v45 = vld [vmem:[%s10761_s17 + $0x270] sm:$0xff] }
 0x254   : > { %8877 = vmatpush3.msra.mxu0 %v11446_v41  ;;  %8711 = vmatpush3.msra.mxu1 %v11454_v2 }
 0x255   : > { %8878 = vmatprep.subr.mxu0 %v11450_v40  ;;  %2390 = vmatprep.mubr.f32.mxu1 %v8224_v44  ;;  %v8260_v44 = vld [vmem:[%s10761_s17 + $0x188] sm:$0xff] }
 0x256   : > { %8879 = vmatpush3.msra.mxu0 %v11454_v2  ;;  %2391 = vmatmul.mubr.f32.vlgmr.msra.gmra.mxu1 %v8223_v39  ;;  %v8259_v39 = vld [vmem:[%s10761_s17 + $0x180] sm:$0xff] }
 0x257   : > { %8792 = vmatprep.subr.mxu1 %v11291_v11  ;;  %2828 = vmatprep.mubr.f32.mxu0 %v8278_v7  ;;  %v8314_v7 = vld [vmem:[%s10761_s17 + $0x308] sm:$0xff] }
 0x258   : > { %8960 = vmatprep.subr.mxu0 %v11291_v11  ;;  %8793 = vmatpush3.msra.mxu1 %v11289_v10 }
 0x259   : > { %2829 = vmatmul.mubr.f32.vlgmr.msra.gmra.mxu0 %v8277_v8  ;;  %8794 = vmatprep.subr.mxu1 %v11299_v17  ;;  %v8313_v8 = vld [vmem:[%s10761_s17 + $0x300] sm:$0xff] }
 0x25a   : > { %8961 = vmatpush3.msra.mxu0 %v11289_v10  ;;  %2395 = vmatprep.mubr.f32.mxu1 %v8226_v9  ;;  %v8262_v9 = vld [vmem:[%s10761_s17 + $0x198] sm:$0xff] }
 0x25b   : > { %8962 = vmatprep.subr.mxu0 %v11299_v17  ;;  %8795 = vmatpush3.msra.mxu1 %v11297_v16 }
 0x25c   : > { %8963 = vmatpush3.msra.mxu0 %v11297_v16  ;;  %2396 = vmatmul.mubr.f32.gmra.mxu1 %v8225_v12  ;;  %v8261_v12 = vld [vmem:[%s10761_s17 + $0x190] sm:$0xff] }
 0x25d   : > { %8796 = vmatprep.subr.mxu1 %v11307_v20  ;;  %2833 = vmatprep.mubr.f32.mxu0 %v8280_v13  ;;  %v8264_v13 = vld [vmem:[%s10761_s17 + $0x1a8] sm:$0xff] }
 0x25e   : > { %8964 = vmatprep.subr.mxu0 %v11307_v20  ;;  %8797 = vmatpush3.msra.mxu1 %v11312_v22 }
 0x25f   : > { %2834 = vmatmul.mubr.f32.gmra.mxu0 %v8279_v14  ;;  %8798 = vmatprep.subr.mxu1 %v11317_v24  ;;  %v8263_v14 = vld [vmem:[%s10761_s17 + $0x1a0] sm:$0xff] }
 0x260   : > { %8965 = vmatpush3.msra.mxu0 %v11312_v22  ;;  %2400 = vmatprep.mubr.f32.mxu1 %v8228_v15  ;;  %v8266_v15 = vld [vmem:[%s10761_s17 + $0x1b8] sm:$0xff] }
 0x261   : > { %8966 = vmatprep.subr.mxu0 %v11317_v24  ;;  %8799 = vmatpush3.msra.mxu1 %v11322_v26 }
 0x262   : > { %8967 = vmatpush3.msra.mxu0 %v11322_v26  ;;  %2401 = vmatmul.mubr.f32.gmra.mxu1 %v8227_v18  ;;  %v8265_v18 = vld [vmem:[%s10761_s17 + $0x1b0] sm:$0xff] }
 0x263   : > { %8800 = vmatprep.subr.mxu1 %v11327_v28  ;;  %2838 = vmatprep.mubr.f32.mxu0 %v8282_v19  ;;  %v8268_v19 = vld [vmem:[%s10761_s17 + $0x1c8] sm:$0xff] }
 0x264   : > { %8968 = vmatprep.subr.mxu0 %v11327_v28  ;;  %8801 = vmatpush3.msra.mxu1 %v11332_v30 }
 0x265   : > { %2839 = vmatmul.mubr.f32.gmra.mxu0 %v8281_v21  ;;  %8802 = vmatprep.subr.mxu1 %v11337_v32  ;;  %v8267_v21 = vld [vmem:[%s10761_s17 + $0x1c0] sm:$0xff] }
 0x266   : > { %8969 = vmatpush3.msra.mxu0 %v11332_v30  ;;  %2405 = vmatprep.mubr.f32.mxu1 %v8230_v23  ;;  %v8270_v23 = vld [vmem:[%s10761_s17 + $0x1d8] sm:$0xff] }
 0x267   : > { %8970 = vmatprep.subr.mxu0 %v11337_v32  ;;  %8803 = vmatpush3.msra.mxu1 %v11342_v34 }
 0x268   : > { %8971 = vmatpush3.msra.mxu0 %v11342_v34  ;;  %2406 = vmatmul.mubr.f32.gmra.mxu1 %v8229_v25  ;;  %v8269_v25 = vld [vmem:[%s10761_s17 + $0x1d0] sm:$0xff] }
 0x269   : > { %8804 = vmatprep.subr.mxu1 %v11348_v36  ;;  %2843 = vmatprep.mubr.f32.mxu0 %v8284_v27  ;;  %v8272_v27 = vld [vmem:[%s10761_s17 + $0x1e8] sm:$0xff] }
 0x26a   : > { %8972 = vmatprep.subr.mxu0 %v11348_v36  ;;  %8805 = vmatpush3.msra.mxu1 %v11354_v54 }
 0x26b   : > { %2844 = vmatmul.mubr.f32.gmra.mxu0 %v8283_v29  ;;  %8806 = vmatprep.subr.mxu1 %v11360_v56  ;;  %v8271_v29 = vld [vmem:[%s10761_s17 + $0x1e0] sm:$0xff] }
 0x26c   : > { %8973 = vmatpush3.msra.mxu0 %v11354_v54  ;;  %2410 = vmatprep.mubr.f32.mxu1 %v8232_v31  ;;  %v8274_v31 = vld [vmem:[%s10761_s17 + $0x1f8] sm:$0xff] }
 0x26d   : > { %8974 = vmatprep.subr.mxu0 %v11360_v56  ;;  %8807 = vmatpush3.msra.mxu1 %v11366_v57 }
 0x26e   : > { %8975 = vmatpush3.msra.mxu0 %v11366_v57  ;;  %2411 = vmatmul.mubr.f32.gmra.mxu1 %v8231_v33  ;;  %v8273_v33 = vld [vmem:[%s10761_s17 + $0x1f0] sm:$0xff] }
 0x26f   : > { %8808 = vmatprep.subr.mxu1 %v11372_v58  ;;  %2848 = vmatprep.mubr.f32.mxu0 %v8286_v35  ;;  %v8296_v35 = vld [vmem:[%s10761_s17 + $0x288] sm:$0xff] }
 0x270   : > { %8976 = vmatprep.subr.mxu0 %v11372_v58  ;;  %8809 = vmatpush3.msra.mxu1 %v11378_v59 }
 0x271   : > { %2849 = vmatmul.mubr.f32.gmra.mxu0 %v8285_v37  ;;  %8810 = vmatprep.subr.mxu1 %v11384_v60  ;;  %v8295_v37 = vld [vmem:[%s10761_s17 + $0x280] sm:$0xff] }
 0x272   : > { %8977 = vmatpush3.msra.mxu0 %v11378_v59  ;;  %2415 = vmatprep.mubr.f32.mxu1 %v8234_v55  ;;  %v8298_v55 = vld [vmem:[%s10761_s17 + $0x298] sm:$0xff] }
 0x273   : > { %8978 = vmatprep.subr.mxu0 %v11384_v60  ;;  %8811 = vmatpush3.msra.mxu1 %v11390_v61 }
 0x274   : > { %8979 = vmatpush3.msra.mxu0 %v11390_v61  ;;  %2416 = vmatmul.mubr.f32.gmra.mxu1 %v8233_v51  ;;  %v8316_v51 = vld [vmem:[%s10761_s17 + $0x318] sm:$0xff] }
 0x275   : > { %8812 = vmatprep.subr.mxu1 %v11396_v62  ;;  %2853 = vmatprep.mubr.f32.mxu0 %v8288_v50  ;;  %v8315_v50 = vld [vmem:[%s10761_s17 + $0x310] sm:$0xff] }
 0x276   : > { %8980 = vmatprep.subr.mxu0 %v11396_v62  ;;  %8813 = vmatpush3.msra.mxu1 %v11402_v63 }
 0x277   : > { %2854 = vmatmul.mubr.f32.gmra.mxu0 %v8287_v53  ;;  %8814 = vmatprep.subr.mxu1 %v11408_v0  ;;  %v8318_v53 = vld [vmem:[%s10761_s17 + $0x328] sm:$0xff] }
 0x278   : > { %8981 = vmatpush3.msra.mxu0 %v11402_v63  ;;  %2420 = vmatprep.mubr.f32.mxu1 %v8236_v52  ;;  %v8297_v52 = vld [vmem:[%s10761_s17 + $0x290] sm:$0xff] }
 0x279   : > { %8982 = vmatprep.subr.mxu0 %v11408_v0  ;;  %8815 = vmatpush3.msra.mxu1 %v11414_v1 }
 0x27a   : > { %8983 = vmatpush3.msra.mxu0 %v11414_v1  ;;  %2421 = vmatmul.mubr.f32.gmra.mxu1 %v8235_v47  ;;  %v8300_v47 = vld [vmem:[%s10761_s17 + $0x2a8] sm:$0xff] }
 0x27b   : > { %8816 = vmatprep.subr.mxu1 %v11420_v3  ;;  %2858 = vmatprep.mubr.f32.mxu0 %v8290_v46  ;;  %v8317_v46 = vld [vmem:[%s10761_s17 + $0x320] sm:$0xff] }
 0x27c   : > { %8984 = vmatprep.subr.mxu0 %v11420_v3  ;;  %8817 = vmatpush3.msra.mxu1 %v11426_v4 }
 0x27d   : > { %2859 = vmatmul.mubr.f32.gmra.mxu0 %v8289_v49  ;;  %8818 = vmatprep.subr.mxu1 %v11432_v5  ;;  %v8336_v49 = vld [vmem:[%s10761_s17 + $0x3a8] sm:$0xff] }
 0x27e   : > { %8985 = vmatpush3.msra.mxu0 %v11426_v4  ;;  %2425 = vmatprep.mubr.f32.mxu1 %v8238_v48  ;;  %v8356_v48 = vld [vmem:[%s10761_s17 + $0x438] sm:$0xff] }
 0x27f   : > { %8986 = vmatprep.subr.mxu0 %v11432_v5  ;;  %8819 = vmatpush3.msra.mxu1 %v11438_v38 }
 0x280   : > { %8987 = vmatpush3.msra.mxu0 %v11438_v38  ;;  %2426 = vmatmul.mubr.f32.gmra.mxu1 %v8237_v43  ;;  %v8338_v43 = vld [vmem:[%s10761_s17 + $0x3b8] sm:$0xff] }
 0x281   : > { %8820 = vmatprep.subr.mxu1 %v11442_v6  ;;  %2863 = vmatprep.mubr.f32.mxu0 %v8292_v42  ;;  %v8355_v42 = vld [vmem:[%s10761_s17 + $0x430] sm:$0xff] }
 0x282   : > { %8988 = vmatprep.subr.mxu0 %v11442_v6  ;;  %8821 = vmatpush3.msra.mxu1 %v11446_v41 }
 0x283   : > { %2864 = vmatmul.mubr.f32.gmra.mxu0 %v8291_v45  ;;  %8822 = vmatprep.subr.mxu1 %v11450_v40  ;;  %v8358_v45 = vld [vmem:[%s10761_s17 + $0x448] sm:$0xff] }
 0x284   : > { %8989 = vmatpush3.msra.mxu0 %v11446_v41  ;;  %8823 = vmatpush3.msra.mxu1 %v11454_v2 }
 0x285   : > { %8990 = vmatprep.subr.mxu0 %v11450_v40  ;;  %2682 = vmatprep.mubr.f32.mxu1 %v8260_v44  ;;  %v8337_v44 = vld [vmem:[%s10761_s17 + $0x3b0] sm:$0xff] }
 0x286   : > { %8991 = vmatpush3.msra.mxu0 %v11454_v2  ;;  %2683 = vmatmul.mubr.f32.vlgmr.msra.gmra.mxu1 %v8259_v39  ;;  %v8340_v39 = vld [vmem:[%s10761_s17 + $0x3c8] sm:$0xff] }
 0x287   : > { %8904 = vmatprep.subr.mxu1 %v11291_v11  ;;  %3120 = vmatprep.mubr.f32.mxu0 %v8314_v7  ;;  %v8357_v7 = vld [vmem:[%s10761_s17 + $0x440] sm:$0xff] }
 0x288   : > { %9072 = vmatprep.subr.mxu0 %v11291_v11  ;;  %8905 = vmatpush3.msra.mxu1 %v11289_v10 }
 0x289   : > { %3121 = vmatmul.mubr.f32.vlgmr.msra.gmra.mxu0 %v8313_v8  ;;  %8906 = vmatprep.subr.mxu1 %v11299_v17  ;;  %v8360_v8 = vld [vmem:[%s10761_s17 + $0x458] sm:$0xff] }
 0x28a   : > { %9073 = vmatpush3.msra.mxu0 %v11289_v10  ;;  %2687 = vmatprep.mubr.f32.mxu1 %v8262_v9  ;;  %v8339_v9 = vld [vmem:[%s10761_s17 + $0x3c0] sm:$0xff] }
 0x28b   : > { %9074 = vmatprep.subr.mxu0 %v11299_v17  ;;  %8907 = vmatpush3.msra.mxu1 %v11297_v16 }
 0x28c   : > { %9075 = vmatpush3.msra.mxu0 %v11297_v16  ;;  %2688 = vmatmul.mubr.f32.gmra.mxu1 %v8261_v12  ;;  %v8342_v12 = vld [vmem:[%s10761_s17 + $0x3d8] sm:$0xff] }
 0x28d   : > { %8908 = vmatprep.subr.mxu1 %v11307_v20  ;;  %9076 = vmatprep.subr.mxu0 %v11307_v20 }
 0x28e   : > { %8909 = vmatpush3.msra.mxu1 %v11312_v22  ;;  %9077 = vmatpush3.msra.mxu0 %v11312_v22 }
 0x28f   : > { %8910 = vmatprep.subr.mxu1 %v11317_v24  ;;  %9078 = vmatprep.subr.mxu0 %v11317_v24 }
 0x290   : > { %2692 = vmatprep.mubr.f32.mxu1 %v8264_v13  ;;  %8911 = vmatpush3.msra.mxu1 %v11322_v26  ;;  %v8359_v13 = vld [vmem:[%s10761_s17 + $0x450] sm:$0xff] }
 0x291   : > { %9079 = vmatpush3.msra.mxu0 %v11322_v26  ;;  %2693 = vmatmul.mubr.f32.gmra.mxu1 %v8263_v14  ;;  %v8362_v14 = vld [vmem:[%s10761_s17 + $0x468] sm:$0xff] }
 0x292   : > { %8912 = vmatprep.subr.mxu1 %v11327_v28  ;;  %9080 = vmatprep.subr.mxu0 %v11327_v28 }
 0x293   : > { %8913 = vmatpush3.msra.mxu1 %v11332_v30  ;;  %9081 = vmatpush3.msra.mxu0 %v11332_v30 }
 0x294   : > { %8914 = vmatprep.subr.mxu1 %v11337_v32  ;;  %9082 = vmatprep.subr.mxu0 %v11337_v32 }
 0x295   : > { %2697 = vmatprep.mubr.f32.mxu1 %v8266_v15  ;;  %8915 = vmatpush3.msra.mxu1 %v11342_v34  ;;  %v8341_v15 = vld [vmem:[%s10761_s17 + $0x3d0] sm:$0xff] }
 0x296   : > { %9083 = vmatpush3.msra.mxu0 %v11342_v34  ;;  %2698 = vmatmul.mubr.f32.gmra.mxu1 %v8265_v18  ;;  %v8344_v18 = vld [vmem:[%s10761_s17 + $0x3e8] sm:$0xff] }
 0x297   : > { %8916 = vmatprep.subr.mxu1 %v11348_v36  ;;  %9084 = vmatprep.subr.mxu0 %v11348_v36 }
 0x298   : > { %8917 = vmatpush3.msra.mxu1 %v11354_v54  ;;  %9085 = vmatpush3.msra.mxu0 %v11354_v54 }
 0x299   : > { %8918 = vmatprep.subr.mxu1 %v11360_v56  ;;  %9086 = vmatprep.subr.mxu0 %v11360_v56 }
 0x29a   : > { %2702 = vmatprep.mubr.f32.mxu1 %v8268_v19  ;;  %8919 = vmatpush3.msra.mxu1 %v11366_v57  ;;  %v8361_v19 = vld [vmem:[%s10761_s17 + $0x460] sm:$0xff] }
 0x29b   : > { %9087 = vmatpush3.msra.mxu0 %v11366_v57  ;;  %2703 = vmatmul.mubr.f32.gmra.mxu1 %v8267_v21  ;;  %v8364_v21 = vld [vmem:[%s10761_s17 + $0x478] sm:$0xff] }
 0x29c   : > { %8920 = vmatprep.subr.mxu1 %v11372_v58  ;;  %9088 = vmatprep.subr.mxu0 %v11372_v58 }
 0x29d   : > { %8921 = vmatpush3.msra.mxu1 %v11378_v59  ;;  %9089 = vmatpush3.msra.mxu0 %v11378_v59 }
 0x29e   : > { %8922 = vmatprep.subr.mxu1 %v11384_v60  ;;  %9090 = vmatprep.subr.mxu0 %v11384_v60 }
 0x29f   : > { %2707 = vmatprep.mubr.f32.mxu1 %v8270_v23  ;;  %8923 = vmatpush3.msra.mxu1 %v11390_v61  ;;  %v8343_v23 = vld [vmem:[%s10761_s17 + $0x3e0] sm:$0xff] }
 0x2a0   : > { %9091 = vmatpush3.msra.mxu0 %v11390_v61  ;;  %2708 = vmatmul.mubr.f32.gmra.mxu1 %v8269_v25  ;;  %v8346_v25 = vld [vmem:[%s10761_s17 + $0x3f8] sm:$0xff] }
 0x2a1   : > { %8924 = vmatprep.subr.mxu1 %v11396_v62  ;;  %9092 = vmatprep.subr.mxu0 %v11396_v62 }
 0x2a2   : > { %8925 = vmatpush3.msra.mxu1 %v11402_v63  ;;  %9093 = vmatpush3.msra.mxu0 %v11402_v63 }
 0x2a3   : > { %8926 = vmatprep.subr.mxu1 %v11408_v0  ;;  %9094 = vmatprep.subr.mxu0 %v11408_v0 }
 0x2a4   : > { %2712 = vmatprep.mubr.f32.mxu1 %v8272_v27  ;;  %8927 = vmatpush3.msra.mxu1 %v11414_v1  ;;  %v8363_v27 = vld [vmem:[%s10761_s17 + $0x470] sm:$0xff] }
 0x2a5   : > { %9095 = vmatpush3.msra.mxu0 %v11414_v1  ;;  %2713 = vmatmul.mubr.f32.gmra.mxu1 %v8271_v29 }
 0x2a6   : > { %8928 = vmatprep.subr.mxu1 %v11420_v3  ;;  %9096 = vmatprep.subr.mxu0 %v11420_v3 }
 0x2a7   : > { %8929 = vmatpush3.msra.mxu1 %v11426_v4  ;;  %9097 = vmatpush3.msra.mxu0 %v11426_v4 }
 0x2a8   : > { %8930 = vmatprep.subr.mxu1 %v11432_v5  ;;  %9098 = vmatprep.subr.mxu0 %v11432_v5 }
 0x2a9   : > { %2717 = vmatprep.mubr.f32.mxu1 %v8274_v31  ;;  %8931 = vmatpush3.msra.mxu1 %v11438_v38  ;;  %v8345_v31 = vld [vmem:[%s10761_s17 + $0x3f0] sm:$0xff] }
 0x2aa   : > { %9099 = vmatpush3.msra.mxu0 %v11438_v38  ;;  %2718 = vmatmul.mubr.f32.gmra.mxu1 %v8273_v33 }
 0x2ab   : > { %8932 = vmatprep.subr.mxu1 %v11442_v6  ;;  %9100 = vmatprep.subr.mxu0 %v11442_v6 }
 0x2ac   : > { %8933 = vmatpush3.msra.mxu1 %v11446_v41  ;;  %9101 = vmatpush3.msra.mxu0 %v11446_v41 }
 0x2ad   : > { %8934 = vmatprep.subr.mxu1 %v11450_v40  ;;  %9102 = vmatprep.subr.mxu0 %v11450_v40 }
 0x2ae   : > { %8935 = vmatpush3.msra.mxu1 %v11454_v2  ;;  %2974 = vmatprep.mubr.f32.mxu1 %v8296_v35 }
 0x2af   : > { %9103 = vmatpush3.msra.mxu0 %v11454_v2  ;;  %2975 = vmatmul.mubr.f32.vlgmr.msra.gmra.mxu1 %v8295_v37 }
 0x2b0   : > { %9016 = vmatprep.subr.mxu1 %v11291_v11  ;;  %2979 = vmatprep.mubr.f32.mxu1 %v8298_v55  ;;  %v8320_v11 = vld [vmem:[%s10761_s17 + $0x338] sm:$0xff] }
 0x2b1   : > { %9017 = vmatpush3.msra.mxu1 %v11289_v10  ;;  %3125 = vmatprep.mubr.f32.mxu0 %v8316_v51  ;;  %v8299_v10 = vld [vmem:[%s10761_s17 + $0x2a0] sm:$0xff] }
 0x2b2   : > { %9018 = vmatprep.subr.mxu1 %v11299_v17  ;;  %3126 = vmatmul.mubr.f32.gmra.mxu0 %v8315_v50  ;;  %v8302_v17 = vld [vmem:[%s10761_s17 + $0x2b8] sm:$0xff] }
 0x2b3   : > { %9019 = vmatpush3.msra.mxu1 %v11297_v16  ;;  %3130 = vmatprep.mubr.f32.mxu0 %v8318_v53  ;;  %v8319_v16 = vld [vmem:[%s10761_s17 + $0x330] sm:$0xff] }
 0x2b4   : > { %2980 = vmatmul.mubr.f32.gmra.mxu1 %v8297_v52  ;;  %9020 = vmatprep.subr.mxu1 %v11307_v20  ;;  %v8322_v20 = vld [vmem:[%s10761_s17 + $0x348] sm:$0xff] }
 0x2b5   : > { %9021 = vmatpush3.msra.mxu1 %v11312_v22  ;;  %2984 = vmatprep.mubr.f32.mxu1 %v8300_v47  ;;  %v8301_v22 = vld [vmem:[%s10761_s17 + $0x2b0] sm:$0xff] }
 0x2b6   : > { %9022 = vmatprep.subr.mxu1 %v11317_v24  ;;  %3131 = vmatmul.mubr.f32.gmra.mxu0 %v8317_v46  ;;  %v8304_v24 = vld [vmem:[%s10761_s17 + $0x2c8] sm:$0xff] }
 0x2b7   : > { %9023 = vmatpush3.msra.mxu1 %v11322_v26  ;;  %3135 = vmatprep.mubr.f32.mxu0 %v8320_v11  ;;  %v8321_v26 = vld [vmem:[%s10761_s17 + $0x340] sm:$0xff] }
 0x2b8   : > { %2985 = vmatmul.mubr.f32.gmra.mxu1 %v8299_v10  ;;  %9024 = vmatprep.subr.mxu1 %v11327_v28  ;;  %v8324_v28 = vld [vmem:[%s10761_s17 + $0x358] sm:$0xff] }
 0x2b9   : > { %9025 = vmatpush3.msra.mxu1 %v11332_v30  ;;  %2989 = vmatprep.mubr.f32.mxu1 %v8302_v17  ;;  %v8303_v30 = vld [vmem:[%s10761_s17 + $0x2c0] sm:$0xff] }
 0x2ba   : > { %9026 = vmatprep.subr.mxu1 %v11337_v32  ;;  %3136 = vmatmul.mubr.f32.gmra.mxu0 %v8319_v16  ;;  %v8306_v32 = vld [vmem:[%s10761_s17 + $0x2d8] sm:$0xff] }
 0x2bb   : > { %9027 = vmatpush3.msra.mxu1 %v11342_v34  ;;  %3140 = vmatprep.mubr.f32.mxu0 %v8322_v20  ;;  %v8323_v34 = vld [vmem:[%s10761_s17 + $0x350] sm:$0xff] }
 0x2bc   : > { %2990 = vmatmul.mubr.f32.gmra.mxu1 %v8301_v22  ;;  %9028 = vmatprep.subr.mxu1 %v11348_v36  ;;  %v8326_v36 = vld [vmem:[%s10761_s17 + $0x368] sm:$0xff] }
 0x2bd   : > { %9029 = vmatpush3.msra.mxu1 %v11354_v54  ;;  %2994 = vmatprep.mubr.f32.mxu1 %v8304_v24  ;;  %v8305_v54 = vld [vmem:[%s10761_s17 + $0x2d0] sm:$0xff] }
 0x2be   : > { %9030 = vmatprep.subr.mxu1 %v11360_v56  ;;  %3141 = vmatmul.mubr.f32.gmra.mxu0 %v8321_v26  ;;  %v8308_v56 = vld [vmem:[%s10761_s17 + $0x2e8] sm:$0xff] }
 0x2bf   : > { %9031 = vmatpush3.msra.mxu1 %v11366_v57  ;;  %3145 = vmatprep.mubr.f32.mxu0 %v8324_v28  ;;  %v8325_v57 = vld [vmem:[%s10761_s17 + $0x360] sm:$0xff] }
 0x2c0   : > { %2995 = vmatmul.mubr.f32.gmra.mxu1 %v8303_v30  ;;  %9032 = vmatprep.subr.mxu1 %v11372_v58  ;;  %v8328_v58 = vld [vmem:[%s10761_s17 + $0x378] sm:$0xff] }
 0x2c1   : > { %9033 = vmatpush3.msra.mxu1 %v11378_v59  ;;  %2999 = vmatprep.mubr.f32.mxu1 %v8306_v32  ;;  %v8307_v59 = vld [vmem:[%s10761_s17 + $0x2e0] sm:$0xff] }
 0x2c2   : > { %9034 = vmatprep.subr.mxu1 %v11384_v60  ;;  %3146 = vmatmul.mubr.f32.gmra.mxu0 %v8323_v34  ;;  %v8310_v60 = vld [vmem:[%s10761_s17 + $0x2f8] sm:$0xff] }
 0x2c3   : > { %9035 = vmatpush3.msra.mxu1 %v11390_v61  ;;  %3150 = vmatprep.mubr.f32.mxu0 %v8326_v36  ;;  %v8327_v61 = vld [vmem:[%s10761_s17 + $0x370] sm:$0xff] }
 0x2c4   : > { %3000 = vmatmul.mubr.f32.gmra.mxu1 %v8305_v54  ;;  %9036 = vmatprep.subr.mxu1 %v11396_v62  ;;  %v8350_v62 = vld [vmem:[%s10761_s17 + $0x408] sm:$0xff] }
 0x2c5   : > { %9037 = vmatpush3.msra.mxu1 %v11402_v63  ;;  %3004 = vmatprep.mubr.f32.mxu1 %v8308_v56  ;;  %v8309_v63 = vld [vmem:[%s10761_s17 + $0x2f0] sm:$0xff] }
 0x2c6   : > { %9038 = vmatprep.subr.mxu1 %v11408_v0  ;;  %3151 = vmatmul.mubr.f32.gmra.mxu0 %v8325_v57  ;;  %v8332_v0 = vld [vmem:[%s10761_s17 + $0x388] sm:$0xff] }
 0x2c7   : > { %9039 = vmatpush3.msra.mxu1 %v11414_v1  ;;  %3155 = vmatprep.mubr.f32.mxu0 %v8328_v58  ;;  %v8349_v1 = vld [vmem:[%s10761_s17 + $0x400] sm:$0xff] }
 0x2c8   : > { %3005 = vmatmul.mubr.f32.gmra.mxu1 %v8307_v59  ;;  %9040 = vmatprep.subr.mxu1 %v11420_v3  ;;  %v8352_v3 = vld [vmem:[%s10761_s17 + $0x418] sm:$0xff] }
 0x2c9   : > { %9041 = vmatpush3.msra.mxu1 %v11426_v4  ;;  %3009 = vmatprep.mubr.f32.mxu1 %v8310_v60  ;;  %v8331_v4 = vld [vmem:[%s10761_s17 + $0x380] sm:$0xff] }
 0x2ca   : > { %9042 = vmatprep.subr.mxu1 %v11432_v5  ;;  %3156 = vmatmul.mubr.f32.gmra.mxu0 %v8327_v61  ;;  %v8334_v5 = vld [vmem:[%s10761_s17 + $0x398] sm:$0xff] }
 0x2cb   : > { %9043 = vmatpush3.msra.mxu1 %v11438_v38  ;;  %3412 = vmatprep.mubr.f32.mxu0 %v8350_v62  ;;  %v8351_v38 = vld [vmem:[%s10761_s17 + $0x410] sm:$0xff] }
 0x2cc   : > { %3010 = vmatmul.mubr.f32.gmra.mxu1 %v8309_v63  ;;  %9044 = vmatprep.subr.mxu1 %v11442_v6  ;;  %v8354_v6 = vld [vmem:[%s10761_s17 + $0x428] sm:$0xff] }
 0x2cd   : > { %9045 = vmatpush3.msra.mxu1 %v11446_v41  ;;  %3266 = vmatprep.mubr.f32.mxu1 %v8332_v0  ;;  %v8333_v41 = vld [vmem:[%s10761_s17 + $0x390] sm:$0xff] }
 0x2ce   : > { %9046 = vmatprep.subr.mxu1 %v11450_v40  ;;  %3413 = vmatmul.mubr.f32.vlgmr.msra.gmra.mxu0 %v8349_v1  ;;  %v8353_v40 = vld [vmem:[%s10761_s17 + $0x420] sm:$0xff] }
 0x2cf   : > { %9047 = vmatpush3.msra.mxu1 %v11454_v2  ;;  %3417 = vmatprep.mubr.f32.mxu0 %v8352_v3  ;;  %v8335_v2 = vld [vmem:[%s10761_s17 + $0x3a0] sm:$0xff] }
 0x2d0   : > { %3267 = vmatmul.mubr.f32.vlgmr.msra.gmra.mxu1 %v8331_v4 }
 0x2d1   : > { %3271 = vmatprep.mubr.f32.mxu1 %v8334_v5 }
 0x2d2   : > { %3418 = vmatmul.mubr.f32.gmra.mxu0 %v8351_v38 }
 0x2d3   : > { %3422 = vmatprep.mubr.f32.mxu0 %v8354_v6  ;;  %v11851_v6 = vld [vmem:[%s13052_s10] ss:$0 sm:$0xff] }
 0x2d4   : > { %3272 = vmatmul.mubr.f32.gmra.mxu1 %v8333_v41 }
 0x2d5   : > { %3276 = vmatprep.mubr.f32.mxu1 %v8336_v49 }
 0x2d6   : > { %3423 = vmatmul.mubr.f32.gmra.mxu0 %v8353_v40 }
 0x2d7   : > { %3427 = vmatprep.mubr.f32.mxu0 %v8356_v48 }
 0x2d8   : > { %3277 = vmatmul.mubr.f32.gmra.mxu1 %v8335_v2  ;;  %v11857_v2 = vld [vmem:[%s13053_s3] ss:$0 sm:$0xff]  ;;  %s13088_s3 = sld [smem:[#allocation47_spill]] }
 0x2d9   : > { %3281 = vmatprep.mubr.f32.mxu1 %v8338_v43 }
 0x2da   : > { %3428 = vmatmul.mubr.f32.gmra.mxu0 %v8355_v42  ;;  %v11860_v42 = vld [vmem:[%s13052_s10 + $0x1] ss:$0 sm:$0xff] }
 0x2db   : > { %3432 = vmatprep.mubr.f32.mxu0 %v8358_v45 }
 0x2dc   : > { %3282 = vmatmul.mubr.f32.gmra.mxu1 %v8337_v44 }
 0x2dd   : > { %3286 = vmatprep.mubr.f32.mxu1 %v8340_v39  ;;  %v11863_v39 = vld [vmem:[%s13052_s10 + $0x2] ss:$0 sm:$0xff] }
 0x2de   : > { %3433 = vmatmul.mubr.f32.gmra.mxu0 %v8357_v7 }
 0x2df   : > { %3437 = vmatprep.mubr.f32.mxu0 %v8360_v8 }
 0x2e0   : > { %3287 = vmatmul.mubr.f32.gmra.mxu1 %v8339_v9 }
 0x2e1   : > { %3291 = vmatprep.mubr.f32.mxu1 %v8342_v12 }
 0x2e2   : > { %3438 = vmatmul.mubr.f32.gmra.mxu0 %v8359_v13 }
 0x2e3   : > { %3442 = vmatprep.mubr.f32.mxu0 %v8362_v14 }
 0x2e4   : > { %3292 = vmatmul.mubr.f32.gmra.mxu1 %v8341_v15 }
 0x2e5   : > { %3296 = vmatprep.mubr.f32.mxu1 %v8344_v18  ;;  %v3485_v18 = vld [vmem:[%s13054_s1] sm:$0xff]  ;;  %s13089_s1 = sld [smem:[#allocation45_spill]] }
 0x2e6   : > { %3443 = vmatmul.mubr.f32.gmra.mxu0 %v8361_v19  ;;  %9459 = vmatprep.subr.mxu1 %v3485_v18 }
 0x2e7   : > { %3447 = vmatprep.mubr.f32.mxu0 %v8364_v21  ;;  %v8656_v29 = vpop.f32.mrf.mxu1  ;;  %9460 = vmatpush3.msra.mxu1 %v3485_v18 }
 0x2e8   : > { %3297 = vmatmul.mubr.f32.gmra.mxu1 %v8343_v23 }
 0x2e9   : > { %3301 = vmatprep.mubr.f32.mxu1 %v8346_v25  ;;  %v8657_v33 = vpop.f32.mrf.mxu1  ;;  %v8768_v35 = vpop.f32.mrf.mxu0 }
 0x2ea   : > { %3448 = vmatmul.mubr.f32.gmra.mxu0 %v8363_v27  ;;  %v8658_v5 = vadd.f32 %v8657_v33, %v8656_v29 }
 0x2eb   : > { %v8769_v37 = vpop.f32.mrf.mxu0 }
 0x2ec   : > { %3302 = vmatmul.mubr.f32.gmra.mxu1 %v8345_v31  ;;  %v8659_v55 = vpop.f32.mrf.mxu1  ;;  %v8770_v51 = vadd.f32 %v8769_v37, %v8768_v35  ;;  %v2293_v48 = vmul.f32 %v8658_v5, %v11851_v6 }
 0x2ee   : > { %v8660_v50 = vpop.f32.mrf.mxu1  ;;  %v2301_v7 = vadd.f32 %v11857_v2, %v2293_v48  ;;  %v2585_v14 = vmul.f32 %v8770_v51, %v11863_v39 }
 0x2ef   : > { %v8771_v53 = vpop.f32.mrf.mxu0  ;;  %v8661_v45 = vadd.f32 %v8660_v50, %v8659_v55 }
 0x2f1   : > { %v8772_v52 = vpop.f32.mrf.mxu0  ;;  %v2294_v12 = vmul.f32 %v8661_v45, %v11851_v6 }
 0x2f2   : > { %v8662_v47 = vpop.f32.mrf.mxu1  ;;  %v8773_v46 = vadd.f32 %v8772_v52, %v8771_v53 }
 0x2f3   : > { %v2302_v25 = vadd.f32 %v11857_v2, %v2294_v12 }
 0x2f4   : > { %v8663_v11 = vpop.f32.mrf.mxu1  ;;  %v2586_v35 = vmul.f32 %v8773_v46, %v11863_v39 }
 0x2f5   : > { %v8774_v10 = vpop.f32.mrf.mxu0  ;;  %v8664_v19 = vadd.f32 %v8663_v11, %v8662_v47 }
 0x2f7   : > { %v8775_v17 = vpop.f32.mrf.mxu0  ;;  %v2295_v31 = vmul.f32 %v8664_v19, %v11851_v6 }
 0x2f8   : > { %v8665_v16 = vpop.f32.mrf.mxu1  ;;  %v11828_v20 = vadd.f32 %v8775_v17, %v8774_v10 }
 0x2f9   : > { %v2303_v53 = vadd.f32 %v11857_v2, %v2295_v31 }
 0x2fa   : > { %v8666_v22 = vpop.f32.mrf.mxu1  ;;  %v2587_v17 = vmul.f32 %v11828_v20, %v11863_v39 }
 0x2fb   : > { %v8777_v24 = vpop.f32.mrf.mxu0  ;;  %v8667_v55 = vadd.f32 %v8666_v22, %v8665_v16 }
 0x2fd   : > { %v8778_v26 = vpop.f32.mrf.mxu0  ;;  %v2296_v11 = vmul.f32 %v8667_v55, %v11851_v6 }
 0x2fe   : > { %v8668_v28 = vpop.f32.mrf.mxu1  ;;  %v11830_v30 = vadd.f32 %v8778_v26, %v8777_v24 }
 0x2ff   : > { %v2304_v22 = vadd.f32 %v11857_v2, %v2296_v11 }
 0x300   : > { %v8669_v32 = vpop.f32.mrf.mxu1  ;;  %v2588_v20 = vmul.f32 %v11830_v30, %v11863_v39 }
 0x301   : > { %v8780_v34 = vpop.f32.mrf.mxu0  ;;  %v8670_v46 = vadd.f32 %v8669_v32, %v8668_v28 }
 0x303   : > { %v8781_v36 = vpop.f32.mrf.mxu0 }
 0x304   : > { %v11832_v54 = vpop.f32.mrf.mxu1  ;;  %v11834_v56 = vadd.f32 %v8781_v36, %v8780_v34 }
 0x306   : > { %v11836_v57 = vpop.f32.mrf.mxu1  ;;  %v2589_v30 = vmul.f32 %v11834_v56, %v11863_v39 }
 0x307   : > { %v8783_v58 = vpop.f32.mrf.mxu0  ;;  %v8673_v28 = vadd.f32 %v11836_v57, %v11832_v54 }
 0x309   : > { %v8784_v59 = vpop.f32.mrf.mxu0  ;;  %v2298_v45 = vmul.f32 %v8673_v28, %v11851_v6 }
 0x30a   : > { %v11838_v60 = vpop.f32.mrf.mxu1  ;;  %v11840_v61 = vadd.f32 %v8784_v59, %v8783_v58 }
 0x30b   : > { %v2306_v12 = vadd.f32 %v11857_v2, %v2298_v45 }
 0x30c   : > { %v11842_v62 = vpop.f32.mrf.mxu1  ;;  %v2590_v56 = vmul.f32 %v11840_v61, %v11863_v39 }
 0x30d   : > { %v8786_v63 = vpop.f32.mrf.mxu0  ;;  %v8676_v54 = vadd.f32 %v11842_v62, %v11838_v60 }
 0x30f   : > { %v8787_v0 = vpop.f32.mrf.mxu0  ;;  %v2299_v18 = vmul.f32 %v8676_v54, %v11851_v6 }
 0x310   : > { %v11844_v1 = vpop.f32.mrf.mxu1  ;;  %v11846_v3 = vadd.f32 %v8787_v0, %v8786_v63  ;;  %v2297_v63 = vmul.f32 %v8670_v46, %v11851_v6 }
 0x312   : > { %v11848_v4 = vpop.f32.mrf.mxu1  ;;  %v2591_v61 = vmul.f32 %v11846_v3, %v11863_v39 }
 0x313   : > { %v8789_v38 = vpop.f32.mrf.mxu0  ;;  %v8679_v60 = vadd.f32 %v11848_v4, %v11844_v1 }
 0x315   : > { %v8790_v41 = vpop.f32.mrf.mxu0 }
 0x316   : > { %v8712_v49 = vpop.f32.mrf.mxu1  ;;  %v11853_v40 = vadd.f32 %v8790_v41, %v8789_v38 }
 0x318   : > { %v8713_v43 = vpop.f32.mrf.mxu1 }
 0x319   : > { %v8714_v44 = vadd.f32 %v8713_v43, %v8712_v49  ;;  %v11883_v26 = vpop.f32.mrf.mxu0  ;;  %v2305_v49 = vadd.f32 %v11857_v2, %v2297_v63 }
 0x31b   : > { %v2439_v8 = vmul.f32 %v8714_v44, %v11860_v42  ;;  %v11889_v59 = vpop.f32.mrf.mxu0 }
 0x31c   : > { %v8715_v9 = vpop.f32.mrf.mxu1 }
 0x31d   : > { %v2447_v13 = vadd.f32 %v2439_v8, %v2301_v7 }
 0x31e   : > { %v8716_v15 = vpop.f32.mrf.mxu1 }
 0x31f   : > { %v11870_v21 = vadd.f32 %v2585_v14, %v2447_v13  ;;  %v8717_v23 = vadd.f32 %v8716_v15, %v8715_v9  ;;  %v11898_v41 = vpop.f32.mrf.mxu0 }
 0x321   : > { %v2440_v27 = vmul.f32 %v8717_v23, %v11860_v42  ;;  %v11905_v8 = vpop.f32.mrf.mxu0 }
 0x322   : > { %v8718_v29 = vpop.f32.mrf.mxu1 }
 0x323   : > { %v2448_v33 = vadd.f32 %v2440_v27, %v2302_v25 }
 0x324   : > { %v8719_v37 = vpop.f32.mrf.mxu1 }
 0x325   : > { %v11876_v51 = vadd.f32 %v2586_v35, %v2448_v33  ;;  %v8720_v50 = vadd.f32 %v8719_v37, %v8718_v29  ;;  %v11913_v15 = vpop.f32.mrf.mxu0  ;;  %v2307_v29 = vadd.f32 %v11857_v2, %v2299_v18  ;;  %v2300_v35 = vmul.f32 %v8679_v60, %v11851_v6 }
 0x326   : > { %v2592_v6 = vmul.f32 %v11853_v40, %v11863_v39 }
 0x327   : > { %v2441_v52 = vmul.f32 %v8720_v50, %v11860_v42  ;;  %v11922_v27 = vpop.f32.mrf.mxu0 }
 0x328   : > { %v8721_v47 = vpop.f32.mrf.mxu1 }
 0x329   : > { %v2449_v10 = vadd.f32 %v2441_v52, %v2303_v53  ;;  %v2308_v53 = vadd.f32 %v11857_v2, %v2300_v35 }
 0x32a   : > { %v8722_v24 = vpop.f32.mrf.mxu1 }
 0x32b   : > { %v11885_v34 = vadd.f32 %v2587_v17, %v2449_v10  ;;  %v8723_v16 = vadd.f32 %v8722_v24, %v8721_v47  ;;  %v11929_v50 = vpop.f32.mrf.mxu0 }
 0x32d   : > { %v2442_v36 = vmul.f32 %v8723_v16, %v11860_v42  ;;  %v11935_v11 = vpop.f32.mrf.mxu0 }
 0x32e   : > { %v8724_v58 = vpop.f32.mrf.mxu1 }
 0x32f   : > { %v2450_v0 = vadd.f32 %v2442_v36, %v2304_v22 }
 0x330   : > { %v8725_v5 = vpop.f32.mrf.mxu1 }
 0x331   : > { %v11896_v32 = vadd.f32 %v2588_v20, %v2450_v0  ;;  %v8726_v38 = vadd.f32 %v8725_v5, %v8724_v58  ;;  %v11941_v3 = vpop.f32.mrf.mxu0 }
 0x333   : > { %v2443_v48 = vmul.f32 %v8726_v38, %v11860_v42  ;;  %v11943_v22 = vpop.f32.mrf.mxu0 }
 0x334   : > { %v8727_v43 = vpop.f32.mrf.mxu1 }
 0x335   : > { %v2451_v44 = vadd.f32 %v2443_v48, %v2305_v49 }
 0x336   : > { %v8728_v7 = vpop.f32.mrf.mxu1 }
 0x337   : > { %v11909_v57 = vadd.f32 %v2589_v30, %v2451_v44  ;;  %v8729_v9 = vadd.f32 %v8728_v7, %v8727_v43  ;;  %v11945_v2 = vpop.f32.mrf.mxu0 }
 0x339   : > { %v2444_v13 = vmul.f32 %v8729_v9, %v11860_v42  ;;  %v11947_v63 = vpop.f32.mrf.mxu0 }
 0x33a   : > { %v8730_v14 = vpop.f32.mrf.mxu1 }
 0x33b   : > { %v2452_v19 = vadd.f32 %v2444_v13, %v2306_v12 }
 0x33c   : > { %v8731_v23 = vpop.f32.mrf.mxu1 }
 0x33d   : > { %v11920_v62 = vadd.f32 %v2590_v56, %v2452_v19  ;;  %v8732_v25 = vadd.f32 %v8731_v23, %v8730_v14  ;;  %v11949_v20 = vpop.f32.mrf.mxu0 }
 0x33f   : > { %v2445_v31 = vmul.f32 %v8732_v25, %v11860_v42  ;;  %v11955_v5 = vpop.f32.mrf.mxu0 }
 0x340   : > { %v8733_v33 = vpop.f32.mrf.mxu1 }
 0x341   : > { %v2453_v37 = vadd.f32 %v2445_v31, %v2307_v29 }
 0x342   : > { %v8734_v55 = vpop.f32.mrf.mxu1 }
 0x343   : > { %v11931_v1 = vadd.f32 %v2591_v61, %v2453_v37  ;;  %v8735_v4 = vadd.f32 %v8734_v55, %v8733_v33  ;;  %v11961_v49 = vpop.f32.mrf.mxu0 }
 0x344   : > { %13057 = vst [vmem:[#allocation83_spill] sm:$0xff] %v11961_v49 }
 0x345   : > { %13055 = vst [vmem:[#allocation81_spill] sm:$0xff] %v11931_v1  ;;  %v2446_v52 = vmul.f32 %v8735_v4, %v11860_v42  ;;  %v11965_v43 = vpop.f32.mrf.mxu0 }
 0x346   : > { %v8824_v47 = vpop.f32.mrf.mxu1  ;;  %13058 = vst [vmem:[#allocation84_spill] sm:$0xff] %v11965_v43 }
 0x347   : > { %v2454_v10 = vadd.f32 %v2446_v52, %v2308_v53 }
 0x348   : > { %v8825_v17 = vpop.f32.mrf.mxu1 }
 0x349   : > { %v11939_v24 = vadd.f32 %v2592_v6, %v2454_v10  ;;  %v8992_v30 = vpop.f32.mrf.mxu0  ;;  %v8826_v52 = vadd.f32 %v8825_v17, %v8824_v47  ;;  %v12000_v10 = vld [vmem:[%s13052_s10 + $0x3] ss:$0 sm:$0xff]  ;;  %v8882_v47 = vadd.f32 %v11889_v59, %v11883_v26  ;;  %v8888_v26 = vadd.f32 %v11922_v27, %v11913_v15 }
 0x34b   : > { %13056 = vst [vmem:[#allocation82_spill] sm:$0xff] %v11939_v24  ;;  %v8993_v54 = vpop.f32.mrf.mxu0 }
 0x34c   : > { %v8827_v46 = vpop.f32.mrf.mxu1 }
 0x34e   : > { %v8828_v16 = vpop.f32.mrf.mxu1 }
 0x34f   : > { %v8829_v43 = vadd.f32 %v8828_v16, %v8827_v46  ;;  %v12022_v16 = vld [vmem:[%s13052_s10 + $0x5] ss:$0 sm:$0xff] }
 0x351   : > { %v8830_v36 = vpop.f32.mrf.mxu1 }
 0x353   : > { %v8831_v42 = vpop.f32.mrf.mxu1 }
 0x356   : > { %v8833_v58 = vpop.f32.mrf.mxu1 }
 0x358   : > { %v8834_v0 = vpop.f32.mrf.mxu1 }
 0x359   : > { %v8835_v46 = vadd.f32 %v8834_v0, %v8833_v58 }
 0x35b   : > { %v11951_v40 = vpop.f32.mrf.mxu1  ;;  %v2734_v15 = vmul.f32 %v8835_v46, %v12000_v10  ;;  %v12068_v46 = vld [vmem:[%s13052_s10 + $0x7] ss:$0 sm:$0xff] }
 0x35d   : > { %v11953_v39 = vpop.f32.mrf.mxu1 }
 0x35e   : > { %v8838_v27 = vadd.f32 %v11953_v39, %v11951_v40 }
 0x360   : > { %v11957_v28 = vpop.f32.mrf.mxu1 }
 0x362   : > { %v11959_v38 = vpop.f32.mrf.mxu1 }
 0x365   : > { %v11963_v48 = vpop.f32.mrf.mxu1 }
 0x367   : > { %v11967_v45 = vpop.f32.mrf.mxu1 }
 0x36a   : > { %v11969_v44 = vpop.f32.mrf.mxu1 }
 0x36b   : > { %13059 = vst [vmem:[#allocation85_spill] sm:$0xff] %v11969_v44 }
 0x36c   : > { %v11971_v7 = vpop.f32.mrf.mxu1 }
 0x36d   : > { %13060 = vst [vmem:[#allocation86_spill] sm:$0xff] %v11971_v7 }
 0x36f   : > { %v8936_v9 = vpop.f32.mrf.mxu1 }
 0x371   : > { %v8937_v12 = vpop.f32.mrf.mxu1 }
 0x372   : > { %v11973_v13 = vpop.f32.mrf.mxu0  ;;  %v8938_v17 = vadd.f32 %v8937_v12, %v8936_v9 }
 0x374   : > { %v8939_v14 = vpop.f32.mrf.mxu1  ;;  %v11975_v18 = vpop.f32.mrf.mxu0 }
 0x376   : > { %v8940_v19 = vpop.f32.mrf.mxu1  ;;  %v11977_v56 = vpop.f32.mrf.mxu0 }
 0x377   : > { %v8941_v59 = vadd.f32 %v8940_v19, %v8939_v14 }
 0x378   : > { %v8942_v23 = vpop.f32.mrf.mxu1  ;;  %v11979_v60 = vpop.f32.mrf.mxu0 }
 0x379   : > { %v3024_v40 = vmul.f32 %v8941_v59, %v12022_v16 }
 0x37a   : > { %v8943_v25 = vpop.f32.mrf.mxu1  ;;  %v11981_v29 = vpop.f32.mrf.mxu0 }
 0x37c   : > { %v11983_v31 = vpop.f32.mrf.mxu1  ;;  %v11985_v33 = vpop.f32.mrf.mxu0 }
 0x37e   : > { %v11987_v35 = vpop.f32.mrf.mxu1  ;;  %v11989_v37 = vpop.f32.mrf.mxu0 }
 0x37f   : > { %13061 = vst [vmem:[#allocation87_spill] sm:$0xff] %v11989_v37  ;;  %v8832_v37 = vadd.f32 %v8831_v42, %v8830_v36  ;;  %v8885_v42 = vadd.f32 %v11905_v8, %v11898_v41  ;;  %v3023_v41 = vmul.f32 %v8938_v17, %v12022_v16 }
 0x380   : > { %v11991_v61 = vpop.f32.mrf.mxu1  ;;  %v11993_v55 = vpop.f32.mrf.mxu0 }
 0x381   : > { %13062 = vst [vmem:[#allocation88_spill] sm:$0xff] %v11993_v55  ;;  %v2731_v55 = vmul.f32 %v8826_v52, %v12000_v10  ;;  %v2733_v52 = vmul.f32 %v8832_v37, %v12000_v10 }
 0x382   : > { %v11995_v4 = vpop.f32.mrf.mxu1  ;;  %v11997_v53 = vpop.f32.mrf.mxu0 }
 0x383   : > { %13063 = vst [vmem:[#allocation89_spill] sm:$0xff] %v11997_v53  ;;  %v12018_v53 = vld [vmem:[%s13052_s10 + $0x4] ss:$0 sm:$0xff]  ;;  %v2739_v36 = vadd.f32 %v2731_v55, %v11870_v21  ;;  %v8894_v21 = vadd.f32 %v11943_v22, %v11941_v3  ;;  %v2741_v3 = vadd.f32 %v2733_v52, %v11885_v34  ;;  %v12058_v22 = vld [vmem:[%s13052_s10 + $0x6] ss:$0 sm:$0xff]  ;;  %v2742_v34 = vadd.f32 %v2734_v15, %v11896_v32 }
 0x384   : > { %v12002_v6 = vpop.f32.mrf.mxu1  ;;  %v12004_v24 = vpop.f32.mrf.mxu0  ;;  %v2877_v0 = vmul.f32 %v8882_v47, %v12018_v53  ;;  %v2878_v37 = vmul.f32 %v8885_v42, %v12018_v53  ;;  %v8841_v32 = vadd.f32 %v11959_v38, %v11957_v28  ;;  %v9000_v38 = vadd.f32 %v11979_v60, %v11977_v56 }
 0x385   : > { %13064 = vst [vmem:[#allocation90_spill] sm:$0xff] %v12004_v24  ;;  %v2732_v24 = vmul.f32 %v8829_v43, %v12000_v10  ;;  %v8891_v43 = vadd.f32 %v11935_v11, %v11929_v50  ;;  %v8897_v50 = vadd.f32 %v11947_v63, %v11945_v2  ;;  %v8994_v11 = vadd.f32 %v8993_v54, %v8992_v30 }
 0x386   : > { %v12006_v49 = vpop.f32.mrf.mxu1  ;;  %v12008_v1 = vpop.f32.mrf.mxu0  ;;  %v2885_v19 = vadd.f32 %v2877_v0, %v2739_v36  ;;  %v2881_v17 = vmul.f32 %v8894_v21, %v12018_v53  ;;  %v8944_v63 = vadd.f32 %v8943_v25, %v8942_v23  ;;  %v2735_v54 = vmul.f32 %v8838_v27, %v12000_v10 }
 0x387   : > { %13065 = vst [vmem:[#allocation91_spill] sm:$0xff] %v12006_v49  ;;  %13066 = vst [vmem:[#allocation92_spill] sm:$0xff] %v12008_v1  ;;  %v2740_v8 = vadd.f32 %v2732_v24, %v11876_v51  ;;  %v2879_v51 = vmul.f32 %v8888_v26, %v12018_v53  ;;  %v8900_v24 = vadd.f32 %v11955_v5, %v11949_v20 }
 0x388   : > { %v12011_v7 = vpop.f32.mrf.mxu1  ;;  %v12013_v44 = vpop.f32.mrf.mxu0  ;;  %v2880_v47 = vmul.f32 %v8891_v43, %v12018_v53  ;;  %v3031_v2 = vadd.f32 %v3023_v41, %v2885_v19  ;;  %v8997_v20 = vadd.f32 %v11975_v18, %v11973_v13  ;;  %v12071_v42 = vmul.f32 %v8897_v50, %v12018_v53  ;;  %v12080_v18 = vld [vmem:[%s13052_s10 + $0x8] ss:$0 sm:$0xff] }
 0x389   : > { %v2886_v30 = vadd.f32 %v2878_v37, %v2740_v8  ;;  %v3169_v52 = vmul.f32 %v8994_v11, %v12058_v22  ;;  %v2887_v26 = vadd.f32 %v2879_v51, %v2741_v3  ;;  %v12077_v59 = vmul.f32 %v8900_v24, %v12018_v53 }
 0x38a   : > { %v12024_v49 = vpop.f32.mrf.mxu1  ;;  %v12026_v1 = vpop.f32.mrf.mxu0  ;;  %v3025_v41 = vmul.f32 %v8944_v63, %v12022_v16  ;;  %v8947_v8 = vadd.f32 %v11987_v35, %v11983_v31  ;;  %v2888_v27 = vadd.f32 %v2880_v47, %v2742_v34  ;;  %v3170_v28 = vmul.f32 %v8997_v20, %v12058_v22 }
 0x38b   : > { %v3032_v13 = vadd.f32 %v3024_v40, %v2886_v30  ;;  %v3177_v21 = vadd.f32 %v3169_v52, %v3031_v2  ;;  %v2736_v24 = vmul.f32 %v8841_v32, %v12000_v10  ;;  %v8844_v31 = vadd.f32 %v11967_v45, %v11963_v48 }
 0x38c   : > { %v12034_v9 = vpop.f32.mrf.mxu1  ;;  %v12036_v58 = vpop.f32.mrf.mxu0  ;;  %v3026_v56 = vmul.f32 %v8947_v8, %v12022_v16  ;;  %v3171_v63 = vmul.f32 %v9000_v38, %v12058_v22  ;;  %v9003_v30 = vadd.f32 %v11985_v33, %v11981_v29  ;;  %v13071_v8 = vld [vmem:[#allocation88_spill] sm:$0xff] }
 0x38d   : > { %v3178_v35 = vadd.f32 %v3170_v28, %v3032_v13 }
 0x38e   : > { %v12048_v12 = vpop.f32.mrf.mxu1  ;;  %v9104_v14 = vpop.f32.mrf.mxu0  ;;  %v3034_v33 = vadd.f32 %v3026_v56, %v2888_v27 }
 0x390   : > { %v9048_v39 = vpop.f32.mrf.mxu1  ;;  %v9105_v55 = vpop.f32.mrf.mxu0 }
 0x391   : > { %v9106_v25 = vadd.f32 %v9105_v55, %v9104_v14  ;;  %v2743_v14 = vadd.f32 %v2735_v54, %v11909_v57  ;;  %v8950_v57 = vadd.f32 %v11995_v4, %v11991_v61  ;;  %v3033_v55 = vadd.f32 %v3025_v41, %v2887_v26  ;;  %v13070_v41 = vld [vmem:[#allocation87_spill] sm:$0xff] }
 0x392   : > { %v9049_v5 = vpop.f32.mrf.mxu1  ;;  %v9107_v36 = vpop.f32.mrf.mxu0 }
 0x393   : > { %v9050_v23 = vadd.f32 %v9049_v5, %v9048_v39  ;;  %v3461_v11 = vmul.f32 %v9106_v25, %v12080_v18  ;;  %v2889_v2 = vadd.f32 %v2881_v17, %v2743_v14  ;;  %v2744_v5 = vadd.f32 %v2736_v24, %v11920_v62  ;;  %v13067_v17 = vld [vmem:[#allocation91_spill] sm:$0xff] }
 0x394   : > { %v9051_v0 = vpop.f32.mrf.mxu1  ;;  %v9108_v43 = vpop.f32.mrf.mxu0  ;;  %v3027_v52 = vmul.f32 %v8950_v57, %v12022_v16  ;;  %v3179_v29 = vadd.f32 %v3171_v63, %v3033_v55  ;;  %v3172_v62 = vmul.f32 %v9003_v30, %v12058_v22 }
 0x395   : > { %v3315_v15 = vmul.f32 %v9050_v23, %v12068_v46  ;;  %v9109_v51 = vadd.f32 %v9108_v43, %v9107_v36  ;;  %v2737_v36 = vmul.f32 %v8844_v31, %v12000_v10  ;;  %v8953_v23 = vadd.f32 %v13067_v17, %v12002_v6  ;;  %v13069_v43 = vld [vmem:[#allocation86_spill] sm:$0xff] }
 0x396   : > { %v9052_v19 = vpop.f32.mrf.mxu1  ;;  %v9110_v37 = vpop.f32.mrf.mxu0  ;;  %v3180_v57 = vadd.f32 %v3172_v62, %v3034_v33 }
 0x397   : > { %v3323_v50 = vadd.f32 %v3315_v15, %v3177_v21  ;;  %v9053_v3 = vadd.f32 %v9052_v19, %v9051_v0  ;;  %v3462_v61 = vmul.f32 %v9109_v51, %v12080_v18  ;;  %v13068_v0 = vld [vmem:[#allocation85_spill] sm:$0xff]  ;;  %v9006_v15 = vadd.f32 %v13071_v8, %v13070_v41 }
 0x398   : > { %v9054_v40 = vpop.f32.mrf.mxu1  ;;  %v9111_v39 = vpop.f32.mrf.mxu0  ;;  %v8847_v21 = vadd.f32 %v13069_v43, %v13068_v0  ;;  %v3035_v51 = vadd.f32 %v3027_v52, %v2889_v2  ;;  %v3028_v24 = vmul.f32 %v8953_v23, %v12022_v16  ;;  %v8959_v23 = vadd.f32 %v12048_v12, %v12034_v9 }
 0x399   : > { %v3469_v60 = vadd.f32 %v3461_v11, %v3323_v50  ;;  %v3316_v47 = vmul.f32 %v9053_v3, %v12068_v46  ;;  %v9112_v48 = vadd.f32 %v9111_v39, %v9110_v37  ;;  %v2890_v50 = vadd.f32 %v12071_v42, %v2744_v5  ;;  %v13072_v11 = vld [vmem:[#allocation81_spill] sm:$0xff] }
 0x39a   : > { %v9055_v34 = vpop.f32.mrf.mxu1  ;;  %v9113_v45 = vpop.f32.mrf.mxu0  ;;  %v2745_v3 = vadd.f32 %v2737_v36, %v13072_v11  ;;  %v2738_v56 = vmul.f32 %v8847_v21, %v12000_v10  ;;  %v3173_v42 = vmul.f32 %v9006_v15, %v12058_v22 }
 0x39b   : > { %v3477_v54 = vmax.f32 %v3469_v60, 0.0  ;;  %v3324_v20 = vadd.f32 %v3316_v47, %v3178_v35  ;;  %v9056_v4 = vadd.f32 %v9055_v34, %v9054_v40  ;;  %v3463_v14 = vmul.f32 %v9112_v48, %v12080_v18  ;;  %v13073_v60 = vld [vmem:[#allocation89_spill] sm:$0xff]  ;;  %v13074_v47 = vld [vmem:[#allocation90_spill] sm:$0xff] }
 0x39c   : > { %v9057_v25 = vpop.f32.mrf.mxu1  ;;  %v9114_v26 = vpop.f32.mrf.mxu0  ;;  %v8956_v40 = vadd.f32 %v12024_v49, %v12011_v7  ;;  %v9009_v2 = vadd.f32 %v13074_v47, %v13073_v60  ;;  %v2891_v7 = vadd.f32 %v12077_v59, %v2745_v3  ;;  %v3181_v5 = vadd.f32 %v3173_v42, %v3035_v51 }
 0x39d   : > { %v3470_v32 = vadd.f32 %v3462_v61, %v3324_v20  ;;  %v3317_v13 = vmul.f32 %v9056_v4, %v12068_v46  ;;  %9461 = vmatprep.mubr.msk.f32.mxu1 %vm3493_vm2, %v3477_v54  ;;  %v9115_v37 = vadd.f32 %v9114_v26, %v9113_v45  ;;  %v13075_v20 = vld [vmem:[#allocation83_spill] sm:$0xff]  ;;  %v13076_v61 = vld [vmem:[#allocation84_spill] sm:$0xff]  ;;  %v3036_v10 = vadd.f32 %v3028_v24, %v2890_v50 }
 0x39e   : > { %v9058_v6 = vpop.f32.mrf.mxu1  ;;  %v9116_v28 = vpop.f32.mrf.mxu0  ;;  %v8903_v4 = vadd.f32 %v13076_v61, %v13075_v20  ;;  %v3029_v17 = vmul.f32 %v8956_v40, %v12022_v16  ;;  %v3174_v59 = vmul.f32 %v9009_v2, %v12058_v22  ;;  %v9015_v50 = vadd.f32 %v12036_v58, %v12026_v1  ;;  %v3638_v20 = vld [vmem:[%s13079_s6] sm:$0xff]  ;;  %v8380_v61 = vld [vmem:[%s13079_s6 + $0x10] sm:$0xff] }
 0x39f   : > { %v3478_v38 = vmax.f32 %v3470_v32, 0.0  ;;  %v3325_v19 = vadd.f32 %v3317_v13, %v3179_v29  ;;  %v9059_v27 = vadd.f32 %v9058_v6, %v9057_v25  ;;  %v3464_v54 = vmul.f32 %v9115_v37, %v12080_v18  ;;  %v13077_v29 = vld [vmem:[#allocation82_spill] sm:$0xff]  ;;  %v13078_v32 = vld [vmem:[#allocation92_spill] sm:$0xff]  ;;  %9489 = vmatprep.mubr.msk.f32.mxu0 %vm3640_vm3, %v3638_v20 }
 0x3a0   : > { %v9060_v31 = vpop.f32.mrf.mxu1  ;;  %v9117_v35 = vpop.f32.mrf.mxu0  ;;  %v2746_v33 = vadd.f32 %v2738_v56, %v13077_v29  ;;  %v9012_v13 = vadd.f32 %v12013_v44, %v13078_v32  ;;  %v2884_v12 = vmul.f32 %v8903_v4, %v12018_v53  ;;  %v3182_v15 = vadd.f32 %v3174_v59, %v3036_v10 }
 0x3a1   : > { %v3471_v39 = vadd.f32 %v3463_v14, %v3325_v19  ;;  %v3318_v55 = vmul.f32 %v9059_v27, %v12068_v46  ;;  %9462 = vmatmul.mubr.msk.f32.vlgmr.msra.gmra.mxu1 %vm3493_vm2, %v3478_v38  ;;  %v9118_v30 = vadd.f32 %v9117_v35, %v9116_v28  ;;  %v3037_v28 = vadd.f32 %v3029_v17, %v2891_v7 }
 0x3a2   : > { %v9061_v63 = vpop.f32.mrf.mxu1  ;;  %v9119_v34 = vpop.f32.mrf.mxu0  ;;  %v3030_v38 = vmul.f32 %v8959_v23, %v12022_v16  ;;  %v2892_v44 = vadd.f32 %v2884_v12, %v2746_v33  ;;  %v3175_v37 = vmul.f32 %v9012_v13, %v12058_v22  ;;  %v3176_v42 = vmul.f32 %v9015_v50, %v12058_v22  ;;  %v8404_v50 = vld [vmem:[%s13079_s6 + $0x50] sm:$0xff] }
 0x3a3   : > { %v3479_v48 = vmax.f32 %v3471_v39, 0.0  ;;  %v3326_v45 = vadd.f32 %v3318_v55, %v3180_v57  ;;  %v9062_v49 = vadd.f32 %v9061_v63, %v9060_v31  ;;  %v3465_v0 = vmul.f32 %v9118_v30, %v12080_v18 }
 0x3a4   : > { %v9063_v36 = vpop.f32.mrf.mxu1  ;;  %v9120_v52 = vpop.f32.mrf.mxu0  ;;  %v3183_v40 = vadd.f32 %v3175_v37, %v3037_v28  ;;  %v3038_v39 = vadd.f32 %v3030_v38, %v2892_v44  ;;  %v8386_v28 = vld [vmem:[%s13079_s6 + $0x20] sm:$0xff]  ;;  %v8387_v38 = vld [vmem:[%s13079_s6 + $0x28] sm:$0xff] }
 0x3a5   : > { %v3472_v25 = vadd.f32 %v3464_v54, %v3326_v45  ;;  %v3319_v26 = vmul.f32 %v9062_v49, %v12068_v46  ;;  %9464 = vmatprep.mubr.msk.f32.mxu1 %vm3493_vm2, %v3479_v48  ;;  %v9121_v9 = vadd.f32 %v9120_v52, %v9119_v34  ;;  %v8367_v52 = vld [vmem:[%s13080_s2] ss:$0 sm:$0xff]  ;;  %v8399_v37 = vld [vmem:[%s13079_s6 + $0x48] sm:$0xff]  ;;  %s13090_s2 = sld [smem:[#allocation46_spill]] }
 0x3a6   : > { %v9064_v43 = vpop.f32.mrf.mxu1  ;;  %v9122_v21 = vpop.f32.mrf.mxu0  ;;  %v3184_v30 = vadd.f32 %v3176_v42, %v3038_v39  ;;  %v8398_v44 = vld [vmem:[%s13079_s6 + $0x40] sm:$0xff] }
 0x3a7   : > { %v3480_v62 = vmax.f32 %v3472_v25, 0.0  ;;  %v3327_v41 = vadd.f32 %v3319_v26, %v3181_v5  ;;  %v9065_v8 = vadd.f32 %v9064_v43, %v9063_v36  ;;  %v3466_v31 = vmul.f32 %v9121_v9, %v12080_v18  ;;  %v8379_v39 = vld [vmem:[%s13082_s22] ss:$0 sm:$0xff]  ;;  %s13091_s22 = sld [smem:[#allocation48_spill]] }
 0x3a8   : > { %v9066_v14 = vpop.f32.mrf.mxu1  ;;  %v9123_v6 = vpop.f32.mrf.mxu0 }
 0x3a9   : > { %v3473_v19 = vadd.f32 %v3465_v0, %v3327_v41  ;;  %v3320_v27 = vmul.f32 %v9065_v8, %v12068_v46  ;;  %9465 = vmatmul.mubr.msk.f32.gmra.mxu1 %vm3493_vm2, %v3480_v62  ;;  %v9124_v3 = vadd.f32 %v9123_v6, %v9122_v21  ;;  %v8381_v6 = vld [vmem:[%s13079_s6 + $0x18] sm:$0xff] }
 0x3aa   : > { %v9067_v11 = vpop.f32.mrf.mxu1  ;;  %v9125_v53 = vpop.f32.mrf.mxu0 }
 0x3ab   : > { %v3481_v51 = vmax.f32 %v3473_v19, 0.0  ;;  %v3328_v24 = vadd.f32 %v3320_v27, %v3182_v15  ;;  %v9068_v35 = vadd.f32 %v9067_v11, %v9066_v14  ;;  %v3467_v1 = vmul.f32 %v9124_v3, %v12080_v18  ;;  %v3639_v14 = vld [vmem:[%s13079_s6 + $0x8] sm:$0xff]  ;;  %v8392_v19 = vld [vmem:[%s13079_s6 + $0x30] sm:$0xff]  ;;  %v8393_v27 = vld [vmem:[%s13079_s6 + $0x38] sm:$0xff] }
 0x3ac   : > { %v9069_v16 = vpop.f32.mrf.mxu1  ;;  %v9126_v57 = vpop.f32.mrf.mxu0  ;;  %v8405_v11 = vld [vmem:[%s13079_s6 + $0x58] sm:$0xff]  ;;  %v8410_v3 = vld [vmem:[%s13079_s6 + $0x60] sm:$0xff] }
 0x3ad   : > { %v3474_v55 = vadd.f32 %v3466_v31, %v3328_v24  ;;  %v3321_v56 = vmul.f32 %v9068_v35, %v12068_v46  ;;  %9467 = vmatprep.mubr.msk.f32.mxu1 %vm3493_vm2, %v3481_v51  ;;  %v9127_v63 = vadd.f32 %v9126_v57, %v9125_v53  ;;  %v8411_v53 = vld [vmem:[%s13079_s6 + $0x68] sm:$0xff]  ;;  %v8416_v51 = vld [vmem:[%s13079_s6 + $0x70] sm:$0xff]  ;;  %v8417_v24 = vld [vmem:[%s13079_s6 + $0x78] sm:$0xff] }
 0x3ae   : > { %v9070_v58 = vpop.f32.mrf.mxu1  ;;  %v8422_v31 = vld [vmem:[%s13079_s6 + $0x80] sm:$0xff]  ;;  %v8423_v35 = vld [vmem:[%s13079_s6 + $0x88] sm:$0xff]  ;;  %s8586_s6 = sshll.u32 %s11039_s0, 8 }
 0x3af   : > { %v3482_v60 = vmax.f32 %v3474_v55, 0.0  ;;  %v3329_v47 = vadd.f32 %v3321_v56, %v3183_v40  ;;  %v9071_v2 = vadd.f32 %v9070_v58, %v9069_v16  ;;  %v3468_v49 = vmul.f32 %v9127_v63, %v12080_v18  ;;  %v4504_v16 = vld [vmem:[%s13081_s23 + $0x8] sm:$0xff]  ;;  %v4503_v57 = vld [vmem:[%s13081_s23] sm:$0xff] }
 0x3b0   : > { %v8376_v58 = vld [vmem:[%s13084_s15] ss:$0 sm:$0xff]  ;;  %v8391_v63 = vld [vmem:[%s13083_s28 + $0x2] ss:$0 sm:$0xff]  ;;  %s13092_s15 = sld [smem:[#allocation49_spill]] }
 0x3b1   : > { %v3475_v34 = vadd.f32 %v3467_v1, %v3329_v47  ;;  %v3322_v48 = vmul.f32 %v9071_v2, %v12068_v46  ;;  %9468 = vmatmul.mubr.msk.f32.gmra.mxu1 %vm3493_vm2, %v3482_v60  ;;  %v8385_v47 = vld [vmem:[%s13083_s28 + $0x1] ss:$0 sm:$0xff] }
 0x3b3   : > { %v3483_v45 = vmax.f32 %v3475_v34, 0.0  ;;  %v3330_v54 = vadd.f32 %v3322_v48, %v3184_v30 }
 0x3b5   : > { %v3476_v22 = vadd.f32 %v3468_v49, %v3330_v54  ;;  %9470 = vmatprep.mubr.msk.f32.mxu1 %vm3493_vm2, %v3483_v45 }
 0x3b7   : > { %v3484_v7 = vmax.f32 %v3476_v22, 0.0 }
 0x3b9   : > { %9471 = vmatmul.mubr.msk.f32.gmra.mxu1 %vm3493_vm2, %v3484_v7 }
 0x3ba   : > { %9508 = vmatprep.mubr.msk.f32.mxu1 %vm3640_vm3, %v8380_v61  ;;  %v8397_v61 = vld [vmem:[%s13083_s28 + $0x3] ss:$0 sm:$0xff] }
 0x461   : > { %v9463_v46 = vpop.f32.mrf.mxu1 }
 0x462   : > { %v3590_v62 = vadd.f32 %v9463_v46, %v8367_v52 }
 0x463   : > { %v3584_v4 = vpop.f32.mrf.mxu1 }
 0x464   : > { %v3585_v8 = vadd.f32 %v8367_v52, %v3584_v4  ;;  %v12194_v12 = vmax.f32 %v3590_v62, 0.0 }
 0x466   : > { %v12200_v15 = vmax.f32 %v3585_v8, 0.0 }
 0x469   : > { %v9466_v5 = vpop.f32.mrf.mxu1 }
 0x46a   : > { %v3600_v13 = vadd.f32 %v9466_v5, %v8367_v52 }
 0x46b   : > { %v3594_v10 = vpop.f32.mrf.mxu1 }
 0x46c   : > { %v3595_v43 = vadd.f32 %v8367_v52, %v3594_v10  ;;  %v12182_v41 = vmax.f32 %v3600_v13, 0.0  ;;  %v8403_v10 = vld [vmem:[%s13083_s28 + $0x4] ss:$0 sm:$0xff] }
 0x46e   : > { %v12188_v9 = vmax.f32 %v3595_v43, 0.0  ;;  %v8415_v43 = vld [vmem:[%s13083_s28 + $0x6] ss:$0 sm:$0xff] }
 0x471   : > { %v9469_v36 = vpop.f32.mrf.mxu1 }
 0x472   : > { %v3610_v26 = vadd.f32 %v9469_v36, %v8367_v52 }
 0x473   : > { %v3604_v18 = vpop.f32.mrf.mxu1 }
 0x474   : > { %v3605_v59 = vadd.f32 %v8367_v52, %v3604_v18  ;;  %v12170_v0 = vmax.f32 %v3610_v26, 0.0 }
 0x476   : > { %v12176_v21 = vmax.f32 %v3605_v59, 0.0  ;;  %v8409_v59 = vld [vmem:[%s13083_s28 + $0x5] ss:$0 sm:$0xff] }
 0x479   : > { %v9472_v17 = vpop.f32.mrf.mxu1 }
 0x47a   : > { %v3620_v23 = vadd.f32 %v9472_v17, %v8367_v52 }
 0x47b   : > { %v3614_v25 = vpop.f32.mrf.mxu1 }
 0x47c   : > { %v12162_v29 = vmax.f32 %v3620_v23, 0.0  ;;  %v3615_v33 = vadd.f32 %v8367_v52, %v3614_v25 }
 0x47e   : > { %v12164_v32 = vmax.f32 %v3615_v33, 0.0  ;;  %9473 = vmatprep.subr.mxu0 %v12162_v29  ;;  %9492 = vmatprep.subr.mxu1 %v12162_v29 }
 0x47f   : > { %9474 = vmatpush3.msra.mxu0 %v12162_v29  ;;  %9493 = vmatpush3.msra.mxu1 %v12162_v29 }
 0x480   : > { %9475 = vmatprep.subr.mxu0 %v12164_v32  ;;  %9494 = vmatprep.subr.mxu1 %v12164_v32 }
 0x481   : > { %9476 = vmatpush3.msra.mxu0 %v12164_v32  ;;  %9495 = vmatpush3.msra.mxu1 %v12164_v32 }
 0x482   : > { %9477 = vmatprep.subr.mxu0 %v12170_v0  ;;  %9496 = vmatprep.subr.mxu1 %v12170_v0 }
 0x483   : > { %9478 = vmatpush3.msra.mxu0 %v12170_v0  ;;  %9497 = vmatpush3.msra.mxu1 %v12170_v0 }
 0x484   : > { %9479 = vmatprep.subr.mxu0 %v12176_v21  ;;  %9498 = vmatprep.subr.mxu1 %v12176_v21 }
 0x485   : > { %9480 = vmatpush3.msra.mxu0 %v12176_v21  ;;  %9499 = vmatpush3.msra.mxu1 %v12176_v21 }
 0x486   : > { %9481 = vmatprep.subr.mxu0 %v12182_v41  ;;  %9500 = vmatprep.subr.mxu1 %v12182_v41 }
 0x487   : > { %9482 = vmatpush3.msra.mxu0 %v12182_v41  ;;  %9501 = vmatpush3.msra.mxu1 %v12182_v41 }
 0x488   : > { %9483 = vmatprep.subr.mxu0 %v12188_v9  ;;  %9502 = vmatprep.subr.mxu1 %v12188_v9 }
 0x489   : > { %9484 = vmatpush3.msra.mxu0 %v12188_v9  ;;  %9503 = vmatpush3.msra.mxu1 %v12188_v9 }
 0x48a   : > { %9485 = vmatprep.subr.mxu0 %v12194_v12  ;;  %9504 = vmatprep.subr.mxu1 %v12194_v12 }
 0x48b   : > { %9486 = vmatpush3.msra.mxu0 %v12194_v12  ;;  %9505 = vmatpush3.msra.mxu1 %v12194_v12 }
 0x48c   : > { %9487 = vmatprep.subr.mxu0 %v12200_v15  ;;  %9506 = vmatprep.subr.mxu1 %v12200_v15 }
 0x48d   : > { %9488 = vmatpush3.msra.mxu0 %v12200_v15  ;;  %9507 = vmatpush3.msra.mxu1 %v12200_v15 }
 0x48e   : > { %9511 = vmatprep.subr.mxu0 %v12162_v29  ;;  %9530 = vmatprep.subr.mxu1 %v12162_v29 }
 0x48f   : > { %9490 = vmatmul.mubr.msk.f32.vlgmr.msra.gmra.mxu0 %vm3640_vm3, %v3639_v14  ;;  %9509 = vmatmul.mubr.msk.f32.vlgmr.msra.gmra.mxu1 %vm3640_vm3, %v8381_v6  ;;  %v8421_v6 = vld [vmem:[%s13083_s28 + $0x7] ss:$0 sm:$0xff] }
 0x490   : > { %9512 = vmatpush3.msra.mxu0 %v12162_v29  ;;  %9531 = vmatpush3.msra.mxu1 %v12162_v29 }
 0x491   : > { %9513 = vmatprep.subr.mxu0 %v12164_v32  ;;  %9532 = vmatprep.subr.mxu1 %v12164_v32 }
 0x492   : > { %9514 = vmatpush3.msra.mxu0 %v12164_v32  ;;  %9533 = vmatpush3.msra.mxu1 %v12164_v32 }
 0x493   : > { %9515 = vmatprep.subr.mxu0 %v12170_v0  ;;  %9534 = vmatprep.subr.mxu1 %v12170_v0 }
 0x494   : > { %9516 = vmatpush3.msra.mxu0 %v12170_v0  ;;  %9535 = vmatpush3.msra.mxu1 %v12170_v0 }
 0x495   : > { %9517 = vmatprep.subr.mxu0 %v12176_v21  ;;  %9536 = vmatprep.subr.mxu1 %v12176_v21 }
 0x496   : > { %9518 = vmatpush3.msra.mxu0 %v12176_v21  ;;  %9537 = vmatpush3.msra.mxu1 %v12176_v21 }
 0x497   : > { %9519 = vmatprep.subr.mxu0 %v12182_v41  ;;  %9538 = vmatprep.subr.mxu1 %v12182_v41 }
 0x498   : > { %9520 = vmatpush3.msra.mxu0 %v12182_v41  ;;  %9539 = vmatpush3.msra.mxu1 %v12182_v41 }
 0x499   : > { %9521 = vmatprep.subr.mxu0 %v12188_v9  ;;  %9540 = vmatprep.subr.mxu1 %v12188_v9 }
 0x49a   : > { %9522 = vmatpush3.msra.mxu0 %v12188_v9  ;;  %9541 = vmatpush3.msra.mxu1 %v12188_v9 }
 0x49b   : > { %9523 = vmatprep.subr.mxu0 %v12194_v12  ;;  %9542 = vmatprep.subr.mxu1 %v12194_v12 }
 0x49c   : > { %9524 = vmatpush3.msra.mxu0 %v12194_v12  ;;  %9543 = vmatpush3.msra.mxu1 %v12194_v12 }
 0x49d   : > { %9525 = vmatprep.subr.mxu0 %v12200_v15  ;;  %9544 = vmatprep.subr.mxu1 %v12200_v15 }
 0x49e   : > { %9526 = vmatpush3.msra.mxu0 %v12200_v15  ;;  %9527 = vmatprep.mubr.msk.f32.mxu0 %vm3640_vm3, %v8386_v28 }
 0x49f   : > { %9545 = vmatpush3.msra.mxu1 %v12200_v15  ;;  %9528 = vmatmul.mubr.msk.f32.vlgmr.msra.gmra.mxu0 %vm3640_vm3, %v8387_v38 }
 0x4a0   : > { %9546 = vmatprep.mubr.msk.f32.mxu1 %vm3640_vm3, %v8392_v19  ;;  %9549 = vmatprep.subr.mxu0 %v12162_v29 }
 0x4a1   : > { %9568 = vmatprep.subr.mxu1 %v12162_v29  ;;  %9547 = vmatmul.mubr.msk.f32.vlgmr.msra.gmra.mxu1 %vm3640_vm3, %v8393_v27 }
 0x4a2   : > { %9550 = vmatpush3.msra.mxu0 %v12162_v29  ;;  %9569 = vmatpush3.msra.mxu1 %v12162_v29 }
 0x4a3   : > { %9551 = vmatprep.subr.mxu0 %v12164_v32  ;;  %9570 = vmatprep.subr.mxu1 %v12164_v32 }
 0x4a4   : > { %9552 = vmatpush3.msra.mxu0 %v12164_v32  ;;  %9571 = vmatpush3.msra.mxu1 %v12164_v32 }
 0x4a5   : > { %9553 = vmatprep.subr.mxu0 %v12170_v0  ;;  %9572 = vmatprep.subr.mxu1 %v12170_v0 }
 0x4a6   : > { %9554 = vmatpush3.msra.mxu0 %v12170_v0  ;;  %9573 = vmatpush3.msra.mxu1 %v12170_v0 }
 0x4a7   : > { %9555 = vmatprep.subr.mxu0 %v12176_v21  ;;  %9574 = vmatprep.subr.mxu1 %v12176_v21 }
 0x4a8   : > { %9556 = vmatpush3.msra.mxu0 %v12176_v21  ;;  %9575 = vmatpush3.msra.mxu1 %v12176_v21 }
 0x4a9   : > { %9557 = vmatprep.subr.mxu0 %v12182_v41  ;;  %9576 = vmatprep.subr.mxu1 %v12182_v41 }
 0x4aa   : > { %9558 = vmatpush3.msra.mxu0 %v12182_v41  ;;  %9577 = vmatpush3.msra.mxu1 %v12182_v41 }
 0x4ab   : > { %9559 = vmatprep.subr.mxu0 %v12188_v9  ;;  %9578 = vmatprep.subr.mxu1 %v12188_v9 }
 0x4ac   : > { %9560 = vmatpush3.msra.mxu0 %v12188_v9  ;;  %9579 = vmatpush3.msra.mxu1 %v12188_v9 }
 0x4ad   : > { %9561 = vmatprep.subr.mxu0 %v12194_v12  ;;  %9580 = vmatprep.subr.mxu1 %v12194_v12 }
 0x4ae   : > { %9562 = vmatpush3.msra.mxu0 %v12194_v12  ;;  %9581 = vmatpush3.msra.mxu1 %v12194_v12 }
 0x4af   : > { %9563 = vmatprep.subr.mxu0 %v12200_v15  ;;  %9582 = vmatprep.subr.mxu1 %v12200_v15 }
 0x4b0   : > { %9564 = vmatpush3.msra.mxu0 %v12200_v15  ;;  %9565 = vmatprep.mubr.msk.f32.mxu0 %vm3640_vm3, %v8398_v44 }
 0x4b1   : > { %9583 = vmatpush3.msra.mxu1 %v12200_v15  ;;  %9566 = vmatmul.mubr.msk.f32.vlgmr.msra.gmra.mxu0 %vm3640_vm3, %v8399_v37  ;;  %v8427_v37 = vld [vmem:[%s13083_s28 + $0x8] ss:$0 sm:$0xff] }
 0x4b2   : > { %9584 = vmatprep.mubr.msk.f32.mxu1 %vm3640_vm3, %v8404_v50  ;;  %9587 = vmatprep.subr.mxu0 %v12162_v29 }
 0x4b3   : > { %9606 = vmatprep.subr.mxu1 %v12162_v29  ;;  %9585 = vmatmul.mubr.msk.f32.vlgmr.msra.gmra.mxu1 %vm3640_vm3, %v8405_v11 }
 0x4b4   : > { %9588 = vmatpush3.msra.mxu0 %v12162_v29  ;;  %9607 = vmatpush3.msra.mxu1 %v12162_v29 }
 0x4b5   : > { %9589 = vmatprep.subr.mxu0 %v12164_v32  ;;  %9608 = vmatprep.subr.mxu1 %v12164_v32 }
 0x4b6   : > { %9590 = vmatpush3.msra.mxu0 %v12164_v32  ;;  %9609 = vmatpush3.msra.mxu1 %v12164_v32 }
 0x4b7   : > { %9591 = vmatprep.subr.mxu0 %v12170_v0  ;;  %9610 = vmatprep.subr.mxu1 %v12170_v0 }
 0x4b8   : > { %9592 = vmatpush3.msra.mxu0 %v12170_v0  ;;  %9611 = vmatpush3.msra.mxu1 %v12170_v0 }
 0x4b9   : > { %9593 = vmatprep.subr.mxu0 %v12176_v21  ;;  %9612 = vmatprep.subr.mxu1 %v12176_v21 }
 0x4ba   : > { %9594 = vmatpush3.msra.mxu0 %v12176_v21  ;;  %9613 = vmatpush3.msra.mxu1 %v12176_v21 }
 0x4bb   : > { %9595 = vmatprep.subr.mxu0 %v12182_v41  ;;  %9614 = vmatprep.subr.mxu1 %v12182_v41 }
 0x4bc   : > { %9596 = vmatpush3.msra.mxu0 %v12182_v41  ;;  %9615 = vmatpush3.msra.mxu1 %v12182_v41 }
 0x4bd   : > { %9597 = vmatprep.subr.mxu0 %v12188_v9  ;;  %9616 = vmatprep.subr.mxu1 %v12188_v9 }
 0x4be   : > { %9598 = vmatpush3.msra.mxu0 %v12188_v9  ;;  %9617 = vmatpush3.msra.mxu1 %v12188_v9 }
 0x4bf   : > { %9599 = vmatprep.subr.mxu0 %v12194_v12  ;;  %9618 = vmatprep.subr.mxu1 %v12194_v12 }
 0x4c0   : > { %9600 = vmatpush3.msra.mxu0 %v12194_v12  ;;  %9619 = vmatpush3.msra.mxu1 %v12194_v12 }
 0x4c1   : > { %9601 = vmatprep.subr.mxu0 %v12200_v15  ;;  %9620 = vmatprep.subr.mxu1 %v12200_v15 }
 0x4c2   : > { %9602 = vmatpush3.msra.mxu0 %v12200_v15  ;;  %9603 = vmatprep.mubr.msk.f32.mxu0 %vm3640_vm3, %v8410_v3 }
 0x4c3   : > { %9621 = vmatpush3.msra.mxu1 %v12200_v15  ;;  %9604 = vmatmul.mubr.msk.f32.vlgmr.msra.gmra.mxu0 %vm3640_vm3, %v8411_v53 }
 0x4c4   : > { %9625 = vmatprep.subr.mxu0 %v12162_v29  ;;  %9622 = vmatprep.mubr.msk.f32.mxu1 %vm3640_vm3, %v8416_v51 }
 0x4c5   : > { %9626 = vmatpush3.msra.mxu0 %v12162_v29  ;;  %9623 = vmatmul.mubr.msk.f32.vlgmr.msra.gmra.mxu1 %vm3640_vm3, %v8417_v24 }
 0x4c6   : > { %9627 = vmatprep.subr.mxu0 %v12164_v32  ;;  %9641 = vmatprep.mubr.msk.f32.mxu0 %vm3640_vm3, %v8422_v31 }
 0x4c7   : > { %9628 = vmatpush3.msra.mxu0 %v12164_v32 }
 0x4c8   : > { %9629 = vmatprep.subr.mxu0 %v12170_v0 }
 0x4c9   : > { %9630 = vmatpush3.msra.mxu0 %v12170_v0 }
 0x4ca   : > { %9631 = vmatprep.subr.mxu0 %v12176_v21 }
 0x4cb   : > { %9632 = vmatpush3.msra.mxu0 %v12176_v21 }
 0x4cc   : > { %9633 = vmatprep.subr.mxu0 %v12182_v41 }
 0x4cd   : > { %9634 = vmatpush3.msra.mxu0 %v12182_v41 }
 0x4ce   : > { %9635 = vmatprep.subr.mxu0 %v12188_v9 }
 0x4cf   : > { %9636 = vmatpush3.msra.mxu0 %v12188_v9 }
 0x4d0   : > { %9637 = vmatprep.subr.mxu0 %v12194_v12 }
 0x4d1   : > { %9638 = vmatpush3.msra.mxu0 %v12194_v12 }
 0x4d2   : > { %9639 = vmatprep.subr.mxu0 %v12200_v15 }
 0x4d3   : > { %9640 = vmatpush3.msra.mxu0 %v12200_v15 }
 0x4d4   : > { %9642 = vmatmul.mubr.msk.f32.vlgmr.msra.gmra.mxu0 %vm3640_vm3, %v8423_v35  ;;  %9644 = vmatprep.subr.mxu0 %v4504_v16 }
 0x4d5   : > { %9645 = vmatpush3.msra.mxu0 %v4504_v16 }
 0x4d6   : > { %9646 = vmatprep.subr.mxu0 %v4503_v57 }
 0x4d7   : > { %9647 = vmatpush3.msra.mxu0 %v4503_v57 }
 0x54f   : > { %v9491_v40 = vpop.f32.mrf.mxu0  ;;  %v9510_v56 = vpop.f32.mrf.mxu1 }
 0x550   : > { %v3730_v42 = vmul.f32 %v9491_v40, %v8379_v39  ;;  %v3826_v34 = vmul.f32 %v9510_v56, %v8385_v47  ;;  %v8435_v56 = vld [vmem:[%s13086_s11 + $0x10] sm:$0xff] }
 0x551   : > { %v3713_v55 = vpop.f32.mrf.mxu0  ;;  %v3808_v2 = vpop.f32.mrf.mxu1 }
 0x552   : > { %v3729_v60 = vmul.f32 %v8379_v39, %v3713_v55  ;;  %v3732_v30 = vadd.f32 %v8376_v58, %v3730_v42  ;;  %v3825_v49 = vmul.f32 %v8385_v47, %v3808_v2  ;;  %v4603_v55 = vld [vmem:[%s13085_s18] sm:$0xff]  ;;  %s12462_s18 = sand.u32 1, %s10655_s16  }
 0x553   : > { %9655 = vmatprep.mubr.msk.f32.mxu1 %vm4512_vm4, %v4603_v55  ;;  %v8428_v42 = vld [vmem:[%s13087_s26] ss:$0 sm:$0xff]  ;;  %s13093_s26 = smov %s13092_s15 }
 0x554   : > { %v3731_v54 = vadd.f32 %v8376_v58, %v3729_v60  ;;  %v3828_v46 = vadd.f32 %v3826_v34, %v3732_v30  ;;  %v4604_v30 = vld [vmem:[%s13086_s11 + $0x8] sm:$0xff]  ;;  %v8436_v34 = vld [vmem:[%s13086_s11 + $0x18] sm:$0xff] }
 0x556   : > { %v3827_v5 = vadd.f32 %v3825_v49, %v3731_v54  ;;  %v8447_v54 = vld [vmem:[%s13086_s11 + $0x30] sm:$0xff]  ;;  %v8448_v49 = vld [vmem:[%s13086_s11 + $0x38] sm:$0xff] }
 0x55f   : > { %v9529_v1 = vpop.f32.mrf.mxu0 }
 0x560   : > { %v3922_v22 = vmul.f32 %v9529_v1, %v8391_v63 }
 0x561   : > { %v3904_v48 = vpop.f32.mrf.mxu0  ;;  %v9548_v45 = vpop.f32.mrf.mxu1 }
 0x562   : > { %v3921_v20 = vmul.f32 %v8391_v63, %v3904_v48  ;;  %v3924_v36 = vadd.f32 %v3922_v22, %v3828_v46  ;;  %v4018_v18 = vmul.f32 %v9548_v45, %v8397_v61  ;;  %v8441_v48 = vld [vmem:[%s13086_s11 + $0x20] sm:$0xff]  ;;  %v8442_v45 = vld [vmem:[%s13086_s11 + $0x28] sm:$0xff] }
 0x563   : > { %v4000_v4 = vpop.f32.mrf.mxu1  ;;  %v8455_v22 = vld [vmem:[%s13086_s11 + $0x40] sm:$0xff] }
 0x564   : > { %v3923_v23 = vadd.f32 %v3921_v20, %v3827_v5  ;;  %v4017_v25 = vmul.f32 %v8397_v61, %v4000_v4  ;;  %v4020_v32 = vadd.f32 %v4018_v18, %v3924_v36  ;;  %v8456_v20 = vld [vmem:[%s13086_s11 + $0x48] sm:$0xff]  ;;  %v8462_v61 = vld [vmem:[%s13086_s11 + $0x58] sm:$0xff]  ;;  %v8467_v46 = vld [vmem:[%s13086_s11 + $0x60] sm:$0xff] }
 0x565   : > { %v8473_v4 = vld [vmem:[%s13086_s11 + $0x70] sm:$0xff]  ;;  %v8468_v5 = vld [vmem:[%s13086_s11 + $0x68] sm:$0xff]  ;;  %v5386_v36 = vld [vmem:[%s13088_s3 + $0x18] sm:$0xff] }
 0x566   : > { %v4019_v0 = vadd.f32 %v4017_v25, %v3923_v23  ;;  %v5385_v18 = vld [vmem:[%s13088_s3 + $0x10] sm:$0xff]  ;;  %v8434_v23 = vld [vmem:[%s13089_s1] ss:$0 sm:$0xff]  ;;  %v8440_v25 = vld [vmem:[%s13089_s1 + $0x1] ss:$0 sm:$0xff] }
 0x571   : > { %v9567_v7 = vpop.f32.mrf.mxu0 }
 0x572   : > { %v4114_v26 = vmul.f32 %v9567_v7, %v8403_v10  ;;  %v8461_v7 = vld [vmem:[%s13086_s11 + $0x50] sm:$0xff] }
 0x573   : > { %v4096_v52 = vpop.f32.mrf.mxu0  ;;  %v9586_v17 = vpop.f32.mrf.mxu1 }
 0x574   : > { %v4113_v33 = vmul.f32 %v8403_v10, %v4096_v52  ;;  %v4116_v21 = vadd.f32 %v4114_v26, %v4020_v32  ;;  %v4210_v62 = vmul.f32 %v9586_v17, %v8409_v59  ;;  %v8474_v10 = vld [vmem:[%s13086_s11 + $0x78] sm:$0xff]  ;;  %v5384_v52 = vld [vmem:[%s13088_s3 + $0x8] sm:$0xff]  ;;  %v5383_v17 = vld [vmem:[%s13088_s3] sm:$0xff] }
 0x575   : > { %v4192_v13 = vpop.f32.mrf.mxu1  ;;  %v8431_v26 = vld [vmem:[%s13090_s2] ss:$0 sm:$0xff]  ;;  %s8182_s2 = sshll.u32 %s12462_s18, 4 }
 0x576   : > { %v4115_v9 = vadd.f32 %v4113_v33, %v4019_v0  ;;  %v4209_v12 = vmul.f32 %v8409_v59, %v4192_v13  ;;  %v4212_v28 = vadd.f32 %v4210_v62, %v4116_v21  ;;  %v8446_v62 = vld [vmem:[%s13089_s1 + $0x2] ss:$0 sm:$0xff] }
 0x578   : > { %v4211_v19 = vadd.f32 %v4209_v12, %v4115_v9 }
 0x583   : > { %v9605_v29 = vpop.f32.mrf.mxu0 }
 0x584   : > { %v4306_v15 = vmul.f32 %v9605_v29, %v8415_v43 }
 0x585   : > { %v4288_v41 = vpop.f32.mrf.mxu0  ;;  %v9624_v8 = vpop.f32.mrf.mxu1 }
 0x586   : > { %v4305_v14 = vmul.f32 %v8415_v43, %v4288_v41  ;;  %v4308_v27 = vadd.f32 %v4306_v15, %v4212_v28  ;;  %v4402_v44 = vmul.f32 %v9624_v8, %v8421_v6  ;;  %v8452_v15 = vld [vmem:[%s13089_s1 + $0x3] ss:$0 sm:$0xff] }
 0x587   : > { %v4384_v38 = vpop.f32.mrf.mxu1 }
 0x588   : > { %v4307_v50 = vadd.f32 %v4305_v14, %v4211_v19  ;;  %v4401_v11 = vmul.f32 %v8421_v6, %v4384_v38  ;;  %v4404_v51 = vadd.f32 %v4402_v44, %v4308_v27  ;;  %v8454_v19 = vld [vmem:[%s13089_s1 + $0x4] ss:$0 sm:$0xff] }
 0x58a   : > { %v4403_v31 = vadd.f32 %v4401_v11, %v4307_v50 }
 0x594   : > { %v9643_v3 = vpop.f32.mrf.mxu0 }
 0x595   : > { %v4498_v53 = vmul.f32 %v9643_v3, %v8427_v37 }
 0x596   : > { %v4480_v24 = vpop.f32.mrf.mxu0 }
 0x597   : > { %v4497_v35 = vmul.f32 %v8427_v37, %v4480_v24  ;;  %v4500_v16 = vadd.f32 %v4498_v53, %v4404_v51  ;;  %v8460_v24 = vld [vmem:[%s13089_s1 + $0x5] ss:$0 sm:$0xff] }
 0x599   : > { %v4499_v57 = vadd.f32 %v4497_v35, %v4403_v31  ;;  %v4502_v39 = vmax.f32 %v4500_v16, 0.0  ;;  %v8466_v31 = vld [vmem:[%s13089_s1 + $0x6] ss:$0 sm:$0xff] }
 0x59b   : > { %v4501_v40 = vmax.f32 %v4499_v57, 0.0 }
 0x59d   : > { %9648 = vmatprep.mubr.msk.f32.mxu0 %vm4512_vm4, %v4501_v40 }
 0x59e   : > { %9649 = vmatmul.mubr.msk.f32.vlgmr.msra.gmra.mxu0 %vm4512_vm4, %v4502_v39 }
 0x59f   : > { %9662 = vmatprep.mubr.msk.f32.mxu0 %vm4512_vm4, %v8435_v56 }
 0x65e   : > { %v9650_v1 = vpop.f32.mrf.mxu0 }
 0x65f   : > { %v4591_v58 = vadd.f32 %v9650_v1, %v8428_v42 }
 0x660   : > { %v4585_v60 = vpop.f32.mrf.mxu0 }
 0x661   : > { %v12373_v47 = vmax.f32 %v4591_v58, 0.0  ;;  %v4586_v2 = vadd.f32 %v8428_v42, %v4585_v60 }
 0x663   : > { %v12375_v63 = vmax.f32 %v4586_v2, 0.0  ;;  %9651 = vmatprep.subr.mxu1 %v12373_v47  ;;  %9658 = vmatprep.subr.mxu0 %v12373_v47  ;;  %v4994_v51 = vmul.f32 %v8454_v19, %v12373_v47 }
 0x664   : > { %9652 = vmatpush3.msra.mxu1 %v12373_v47  ;;  %9659 = vmatpush3.msra.mxu0 %v12373_v47 }
 0x665   : > { %9653 = vmatprep.subr.mxu1 %v12375_v63  ;;  %9660 = vmatprep.subr.mxu0 %v12375_v63  ;;  %v4993_v57 = vmul.f32 %v8454_v19, %v12375_v63 }
 0x666   : > { %9654 = vmatpush3.msra.mxu1 %v12375_v63  ;;  %9661 = vmatpush3.msra.mxu0 %v12375_v63 }
 0x667   : > { %9656 = vmatmul.mubr.msk.f32.vlgmr.msra.gmra.mxu1 %vm4512_vm4, %v4604_v30  ;;  %9665 = vmatprep.subr.mxu1 %v12373_v47  ;;  %v8472_v30 = vld [vmem:[%s13089_s1 + $0x7] ss:$0 sm:$0xff] }
 0x668   : > { %9672 = vmatprep.subr.mxu0 %v12373_v47  ;;  %9663 = vmatmul.mubr.msk.f32.vlgmr.msra.gmra.mxu0 %vm4512_vm4, %v8436_v34  ;;  %v8478_v34 = vld [vmem:[%s13089_s1 + $0x8] ss:$0 sm:$0xff]  ;;  %s12467_s1 = scalar_lea.vmem [#allocation20], %s8182_s2 }
 0x669   : > { %9666 = vmatpush3.msra.mxu1 %v12373_v47  ;;  %9673 = vmatpush3.msra.mxu0 %v12373_v47 }
 0x66a   : > { %9667 = vmatprep.subr.mxu1 %v12375_v63  ;;  %9674 = vmatprep.subr.mxu0 %v12375_v63 }
 0x66b   : > { %9668 = vmatpush3.msra.mxu1 %v12375_v63  ;;  %9669 = vmatprep.mubr.msk.f32.mxu1 %vm4512_vm4, %v8441_v48 }
 0x66c   : > { %9675 = vmatpush3.msra.mxu0 %v12375_v63  ;;  %9670 = vmatmul.mubr.msk.f32.vlgmr.msra.gmra.mxu1 %vm4512_vm4, %v8442_v45 }
 0x66d   : > { %9676 = vmatprep.mubr.msk.f32.mxu0 %vm4512_vm4, %v8447_v54  ;;  %9679 = vmatprep.subr.mxu1 %v12373_v47 }
 0x66e   : > { %9686 = vmatprep.subr.mxu0 %v12373_v47  ;;  %9677 = vmatmul.mubr.msk.f32.vlgmr.msra.gmra.mxu0 %vm4512_vm4, %v8448_v49 }
 0x66f   : > { %9680 = vmatpush3.msra.mxu1 %v12373_v47  ;;  %9687 = vmatpush3.msra.mxu0 %v12373_v47 }
 0x670   : > { %9681 = vmatprep.subr.mxu1 %v12375_v63  ;;  %9688 = vmatprep.subr.mxu0 %v12375_v63 }
 0x671   : > { %9682 = vmatpush3.msra.mxu1 %v12375_v63  ;;  %9689 = vmatpush3.msra.mxu0 %v12375_v63 }
 0x672   : > { %9683 = vmatprep.mubr.msk.f32.mxu1 %vm4512_vm4, %v8455_v22  ;;  %9690 = vmatprep.mubr.msk.f32.mxu0 %vm4512_vm4, %v8461_v7 }
 0x673   : > { %9693 = vmatprep.subr.mxu1 %v12373_v47  ;;  %9700 = vmatprep.subr.mxu0 %v12373_v47 }
 0x674   : > { %9684 = vmatmul.mubr.msk.f32.vlgmr.msra.gmra.mxu1 %vm4512_vm4, %v8456_v20  ;;  %9691 = vmatmul.mubr.msk.f32.vlgmr.msra.gmra.mxu0 %vm4512_vm4, %v8462_v61 }
 0x675   : > { %9694 = vmatpush3.msra.mxu1 %v12373_v47  ;;  %9701 = vmatpush3.msra.mxu0 %v12373_v47 }
 0x676   : > { %9695 = vmatprep.subr.mxu1 %v12375_v63  ;;  %9702 = vmatprep.subr.mxu0 %v12375_v63 }
 0x677   : > { %9696 = vmatpush3.msra.mxu1 %v12375_v63  ;;  %9703 = vmatpush3.msra.mxu0 %v12375_v63 }
 0x678   : > { %9697 = vmatprep.mubr.msk.f32.mxu1 %vm4512_vm4, %v8467_v46  ;;  %9704 = vmatprep.mubr.msk.f32.mxu0 %vm4512_vm4, %v8473_v4 }
 0x679   : > { %9698 = vmatmul.mubr.msk.f32.vlgmr.msra.gmra.mxu1 %vm4512_vm4, %v8468_v5  ;;  %9705 = vmatmul.mubr.msk.f32.vlgmr.msra.gmra.mxu0 %vm4512_vm4, %v8474_v10 }
 0x67a   : > { %9707 = vmatprep.subr.mxu1 %v5386_v36 }
 0x67b   : > { %9708 = vmatpush3.msra.mxu1 %v5386_v36 }
 0x67c   : > { %9709 = vmatprep.subr.mxu1 %v5385_v18 }
 0x67d   : > { %9710 = vmatpush3.msra.mxu1 %v5385_v18 }
 0x67e   : > { %9711 = vmatprep.subr.mxu1 %v5384_v52 }
 0x67f   : > { %9712 = vmatpush3.msra.mxu1 %v5384_v52 }
 0x680   : > { %9713 = vmatprep.subr.mxu1 %v5383_v17 }
 0x681   : > { %9714 = vmatpush3.msra.mxu1 %v5383_v17 }
 0x727   : > { %v9657_v29 = vpop.f32.mrf.mxu1 }
 0x728   : > { %v4694_v33 = vmul.f32 %v9657_v29, %v8434_v23  ;;  %v9664_v59 = vpop.f32.mrf.mxu0 }
 0x729   : > { %v4677_v32 = vpop.f32.mrf.mxu1  ;;  %v4790_v13 = vmul.f32 %v9664_v59, %v8440_v25 }
 0x72a   : > { %v4696_v0 = vadd.f32 %v8431_v26, %v4694_v33  ;;  %v4693_v43 = vmul.f32 %v8434_v23, %v4677_v32  ;;  %v4772_v21 = vpop.f32.mrf.mxu0  ;;  %v10730_v23 = vmov 0.0  }
 0x72b   : > { %v4789_v9 = vmul.f32 %v8440_v25, %v4772_v21  ;;  %9718 = vmatprep.subr.mxu0 %v10730_v23  ;;  %9732 = vmatprep.subr.mxu1 %v10730_v23  ;;  %v8479_v25 = vld [vmem:[%s13091_s22] ss:$0 sm:$0xff]  ;;  %v8485_v21 = vld [vmem:[%s13093_s26 + $0x4] sm:$0xf]  ;;  %s13094_s22 = sld [smem:[#allocation52_spill]] }
 0x72c   : > { %v4695_v41 = vadd.f32 %v8431_v26, %v4693_v43  ;;  %v4792_v8 = vadd.f32 %v4790_v13, %v4696_v0  ;;  %v9671_v12 = vpop.f32.mrf.mxu1  ;;  %9722 = vmatprep.mubr.msk.f32.mxu0 %vm10731_vm6, %v10730_v23  ;;  %v5487_v0 = vld [vmem:[%s13092_s15] sm:$0xf]  ;;  %v8489_v43 = vld [vmem:[%s13093_s26 + $0x8] sm:$0xf]  ;;  %s13096_s15 = sld [smem:[#allocation50_spill]] }
 0x72d   : > { %v4886_v14 = vmul.f32 %v9671_v12, %v8446_v62  ;;  %v8513_v12 = vld [vmem:[%s13093_s26 + $0x20] sm:$0xf] }
 0x72e   : > { %v4791_v6 = vadd.f32 %v4789_v9, %v4695_v41  ;;  %v4868_v28 = vpop.f32.mrf.mxu1  ;;  %v9678_v38 = vpop.f32.mrf.mxu0  ;;  %v8493_v41 = vld [vmem:[%s13093_s26 + $0xc] sm:$0xf]  ;;  %v8501_v9 = vld [vmem:[%s13093_s26 + $0x14] sm:$0xf] }
 0x72f   : > { %v4888_v27 = vadd.f32 %v4886_v14, %v4792_v8  ;;  %v4885_v44 = vmul.f32 %v8446_v62, %v4868_v28  ;;  %v4982_v37 = vmul.f32 %v9678_v38, %v8452_v15  ;;  %v8497_v62 = vld [vmem:[%s13093_s26 + $0x10] sm:$0xf]  ;;  %v8505_v8 = vld [vmem:[%s13093_s26 + $0x18] sm:$0xf] }
 0x730   : > { %v4964_v50 = vpop.f32.mrf.mxu0 }
 0x731   : > { %v4887_v11 = vadd.f32 %v4885_v44, %v4791_v6  ;;  %v4984_v3 = vadd.f32 %v4982_v37, %v4888_v27  ;;  %v4981_v53 = vmul.f32 %v8452_v15, %v4964_v50  ;;  %s13095_s2 = smov %s13094_s22  ;;  %v8509_v15 = vld [vmem:[%s13093_s26 + $0x1c] sm:$0xf] }
 0x732   : > { %s13097_s3 = smov %s13096_s15  ;;  %v6254_v14 = vld [vmem:[%s13094_s22 + $0x18] sm:$0xff]  ;;  %v6253_v6 = vld [vmem:[%s13095_s2 + $0x10] sm:$0xff]  ;;  %v6252_v28 = vld [vmem:[%s13095_s2 + $0x8] sm:$0xff]  ;;  %s13100_s22 = sld [smem:[#allocation54_spill]] }
 0x733   : > { %v4983_v35 = vadd.f32 %v4981_v53, %v4887_v11  ;;  %v4996_v16 = vadd.f32 %v4994_v51, %v4984_v3  ;;  %v6251_v38 = vld [vmem:[%s13095_s2] sm:$0xff] }
 0x734   : > { %v9685_v40 = vpop.f32.mrf.mxu1  ;;  %v9692_v39 = vpop.f32.mrf.mxu0  ;;  %v8484_v19 = vld [vmem:[%s13096_s15] ss:$0 sm:$0xff]  ;;  %v8488_v3 = vld [vmem:[%s13097_s3 + $0x1] ss:$0 sm:$0xff]  ;;  %v8492_v53 = vld [vmem:[%s13097_s3 + $0x2] ss:$0 sm:$0xff] }
 0x735   : > { %v5090_v55 = vmul.f32 %v9685_v40, %v8460_v24  ;;  %v4995_v56 = vadd.f32 %v4993_v57, %v4983_v35  ;;  %v5186_v42 = vmul.f32 %v9692_v39, %v8466_v31  ;;  %v8482_v11 = vld [vmem:[%s13098_s4] ss:$0 sm:$0xff]  ;;  %s13099_s4 = sld [smem:[#allocation53_spill]] }
 0x736   : > { %v5072_v1 = vpop.f32.mrf.mxu1  ;;  %v5168_v58 = vpop.f32.mrf.mxu0  ;;  %s13102_s15 = sld [smem:[#allocation57_spill]] }
 0x737   : > { %v5092_v60 = vadd.f32 %v5090_v55, %v4996_v16  ;;  %v5089_v2 = vmul.f32 %v8460_v24, %v5072_v1  ;;  %v5185_v45 = vmul.f32 %v8466_v31, %v5168_v58  ;;  %v8496_v55 = vld [vmem:[%s13097_s3 + $0x3] ss:$0 sm:$0xff] }
 0x738   : > { %s13101_s2 = smov %s13100_s22 }
 0x739   : > { %v5091_v48 = vadd.f32 %v5089_v2, %v4995_v56  ;;  %v5188_v47 = vadd.f32 %v5186_v42, %v5092_v60  ;;  %v9699_v54 = vpop.f32.mrf.mxu1  ;;  %v9706_v49 = vpop.f32.mrf.mxu0  ;;  %v8500_v56 = vld [vmem:[%s13097_s3 + $0x4] ss:$0 sm:$0xff] }
 0x73a   : > { %v5282_v22 = vmul.f32 %v9699_v54, %v8472_v30  ;;  %v5378_v63 = vmul.f32 %v9706_v49, %v8478_v34 }
 0x73b   : > { %v5187_v7 = vadd.f32 %v5185_v45, %v5091_v48  ;;  %v5264_v20 = vpop.f32.mrf.mxu1  ;;  %v5360_v61 = vpop.f32.mrf.mxu0  ;;  %v8508_v45 = vld [vmem:[%s13097_s3 + $0x6] ss:$0 sm:$0xff] }
 0x73c   : > { %v5284_v46 = vadd.f32 %v5282_v22, %v5188_v47  ;;  %v5281_v4 = vmul.f32 %v8472_v30, %v5264_v20  ;;  %v5377_v10 = vmul.f32 %v8478_v34, %v5360_v61  ;;  %v8504_v47 = vld [vmem:[%s13097_s3 + $0x5] ss:$0 sm:$0xff] }
 0x73e   : > { %v5283_v5 = vadd.f32 %v5281_v4, %v5187_v7  ;;  %v5380_v36 = vadd.f32 %v5378_v63, %v5284_v46  ;;  %v8512_v46 = vld [vmem:[%s13097_s3 + $0x7] ss:$0 sm:$0xff] }
 0x740   : > { %v5379_v18 = vadd.f32 %v5377_v10, %v5283_v5  ;;  %v5382_v17 = vmax.f32 %v5380_v36, 0.0  ;;  %v8516_v5 = vld [vmem:[%s13097_s3 + $0x8] ss:$0 sm:$0xff]  ;;  %s13106_s3 = sld [smem:[#allocation56_spill]] }
 0x742   : > { %v5381_v52 = vmax.f32 %v5379_v18, 0.0 }
 0x744   : > { %9715 = vmatprep.mubr.msk.f32.mxu1 %vm5394_vm5, %v5381_v52 }
 0x745   : > { %9716 = vmatmul.mubr.msk.f32.vlgmr.msra.gmra.mxu1 %vm5394_vm5, %v5382_v17 }
 0x746   : > { %9736 = vmatprep.mubr.msk.f32.mxu1 %vm10731_vm6, %v10730_v23 }
 0x805   : > { %v9717_v26 = vpop.f32.mrf.mxu1 }
 0x806   : > { %v5473_v29 = vadd.f32 %v9717_v26, %v8479_v25 }
 0x807   : > { %v5467_v33 = vpop.f32.mrf.mxu1 }
 0x808   : > { %v5477_v59 = vmax.f32 %v5473_v29, 0.0  ;;  %v5468_v32 = vadd.f32 %v8479_v25, %v5467_v33 }
 0x80a   : > { %v5476_v13 = vmax.f32 %v5468_v32, 0.0  ;;  %9719 = vmatpush3.msra.mxu0 %v5477_v59  ;;  %9733 = vmatpush3.msra.mxu1 %v5477_v59  ;;  %5479 = vst.msk [vmem:[%s12467_s1 + $0x8] sm:$0xff] %vm5394_vm5, %v5477_v59 }
 0x80b   : > { %9720 = vmatprep.subr.mxu0 %v10730_v23  ;;  %9734 = vmatprep.subr.mxu1 %v10730_v23 }
 0x80c   : > { %9721 = vmatpush3.msra.mxu0 %v5476_v13  ;;  %9735 = vmatpush3.msra.mxu1 %v5476_v13  ;;  %5478 = vst.msk [vmem:[%s12467_s1] sm:$0xff] %vm5394_vm5, %v5476_v13 }
 0x80d   : > { %9723 = vmatmul.mubr.msk.f32.vlgmr.msra.gmra.mxu0 %vm4512_vm4, %v5487_v0  ;;  %9725 = vmatprep.subr.mxu0 %v10730_v23 }
 0x80e   : > { %9746 = vmatprep.subr.mxu1 %v10730_v23  ;;  %9726 = vmatpush3.msra.mxu0 %v5477_v59 }
 0x80f   : > { %9737 = vmatmul.mubr.msk.f32.vlgmr.msra.gmra.mxu1 %vm4512_vm4, %v8489_v43  ;;  %9727 = vmatprep.subr.mxu0 %v10730_v23 }
 0x810   : > { %9747 = vmatpush3.msra.mxu1 %v5477_v59  ;;  %9728 = vmatpush3.msra.mxu0 %v5476_v13 }
 0x811   : > { %9748 = vmatprep.subr.mxu1 %v10730_v23  ;;  %9729 = vmatprep.mubr.msk.f32.mxu0 %vm10731_vm6, %v10730_v23 }
 0x812   : > { %9749 = vmatpush3.msra.mxu1 %v5476_v13  ;;  %9730 = vmatmul.mubr.msk.f32.vlgmr.msra.gmra.mxu0 %vm4512_vm4, %v8485_v21  ;;  %v6343_v21 = vld [vmem:[%s13100_s22] sm:$0xf]  ;;  %s13104_s22 = sld [smem:[#allocation55_spill]] }
 0x813   : > { %9739 = vmatprep.subr.mxu0 %v10730_v23  ;;  %9750 = vmatprep.mubr.msk.f32.mxu1 %vm10731_vm6, %v10730_v23 }
 0x814   : > { %9760 = vmatprep.subr.mxu1 %v10730_v23  ;;  %9740 = vmatpush3.msra.mxu0 %v5477_v59 }
 0x815   : > { %9751 = vmatmul.mubr.msk.f32.vlgmr.msra.gmra.mxu1 %vm4512_vm4, %v8497_v62  ;;  %9741 = vmatprep.subr.mxu0 %v10730_v23  ;;  %v8528_v62 = vld [vmem:[%s13101_s2 + $0x8] sm:$0xf] }
 0x816   : > { %9761 = vmatpush3.msra.mxu1 %v5477_v59  ;;  %9742 = vmatpush3.msra.mxu0 %v5476_v13 }
 0x817   : > { %9762 = vmatprep.subr.mxu1 %v10730_v23  ;;  %9743 = vmatprep.mubr.msk.f32.mxu0 %vm10731_vm6, %v10730_v23 }
 0x818   : > { %9763 = vmatpush3.msra.mxu1 %v5476_v13  ;;  %9744 = vmatmul.mubr.msk.f32.vlgmr.msra.gmra.mxu0 %vm4512_vm4, %v8493_v41  ;;  %v8523_v41 = vld [vmem:[%s13101_s2 + $0x4] sm:$0xf] }
 0x819   : > { %9753 = vmatprep.subr.mxu0 %v10730_v23  ;;  %9764 = vmatprep.mubr.msk.f32.mxu1 %vm10731_vm6, %v10730_v23 }
 0x81a   : > { %9774 = vmatprep.subr.mxu1 %v10730_v23  ;;  %9754 = vmatpush3.msra.mxu0 %v5477_v59 }
 0x81b   : > { %9765 = vmatmul.mubr.msk.f32.vlgmr.msra.gmra.mxu1 %vm4512_vm4, %v8505_v8  ;;  %9755 = vmatprep.subr.mxu0 %v10730_v23  ;;  %v8540_v8 = vld [vmem:[%s13101_s2 + $0x10] sm:$0xf] }
 0x81c   : > { %9775 = vmatpush3.msra.mxu1 %v5477_v59  ;;  %9756 = vmatpush3.msra.mxu0 %v5476_v13 }
 0x81d   : > { %9776 = vmatprep.subr.mxu1 %v10730_v23  ;;  %9757 = vmatprep.mubr.msk.f32.mxu0 %vm10731_vm6, %v10730_v23 }
 0x81e   : > { %9777 = vmatpush3.msra.mxu1 %v5476_v13  ;;  %9758 = vmatmul.mubr.msk.f32.vlgmr.msra.gmra.mxu0 %vm4512_vm4, %v8501_v9  ;;  %v8533_v9 = vld [vmem:[%s13101_s2 + $0xc] sm:$0xf] }
 0x81f   : > { %9767 = vmatprep.subr.mxu0 %v10730_v23  ;;  %9771 = vmatprep.mubr.msk.f32.mxu0 %vm10731_vm6, %v10730_v23 }
 0x820   : > { %9768 = vmatpush3.msra.mxu0 %v5477_v59  ;;  %9778 = vmatprep.mubr.msk.f32.mxu1 %vm10731_vm6, %v10730_v23  ;;  %v8517_v59 = vld [vmem:[%s13099_s4] ss:$0 sm:$0xff]  ;;  %s13103_s4 = smov %s13102_s15 }
 0x821   : > { %9769 = vmatprep.subr.mxu0 %v10730_v23  ;;  %9779 = vmatmul.mubr.msk.f32.vlgmr.msra.gmra.mxu1 %vm4512_vm4, %v8513_v12  ;;  %v8550_v12 = vld [vmem:[%s13101_s2 + $0x18] sm:$0xf] }
 0x822   : > { %9770 = vmatpush3.msra.mxu0 %v5476_v13  ;;  %9792 = vmatprep.subr.mxu1 %v10730_v23 }
 0x823   : > { %9772 = vmatmul.mubr.msk.f32.vlgmr.msra.gmra.mxu0 %vm4512_vm4, %v8509_v15  ;;  %9781 = vmatprep.subr.mxu0 %v10730_v23  ;;  %v8545_v15 = vld [vmem:[%s13101_s2 + $0x14] sm:$0xf] }
 0x824   : > { %9789 = vmatprep.mubr.msk.f32.mxu0 %vm10731_vm6, %v10730_v23  ;;  %9794 = vmatprep.mubr.msk.f32.mxu1 %vm10731_vm6, %v10730_v23 }
 0x825   : > { %9782 = vmatpush3.msra.mxu0 %v6254_v14  ;;  %v8555_v14 = vld [vmem:[%s13101_s2 + $0x1c] sm:$0xf]  ;;  %s13105_s2 = smov %s13104_s22 }
 0x826   : > { %9783 = vmatprep.subr.mxu0 %v10730_v23 }
 0x827   : > { %9784 = vmatpush3.msra.mxu0 %v6253_v6  ;;  %v7044_v6 = vld [vmem:[%s13102_s15 + $0x38] sm:$0xff]  ;;  %s13108_s15 = sld [smem:[#allocation63_spill]] }
 0x828   : > { %9785 = vmatprep.subr.mxu0 %v10730_v23 }
 0x829   : > { %9786 = vmatpush3.msra.mxu0 %v6252_v28  ;;  %v7043_v28 = vld [vmem:[%s13103_s4 + $0x30] sm:$0xff] }
 0x82a   : > { %9787 = vmatprep.subr.mxu0 %v10730_v23 }
 0x82b   : > { %9788 = vmatpush3.msra.mxu0 %v6251_v38  ;;  %v7042_v38 = vld [vmem:[%s13103_s4 + $0x28] sm:$0xff] }
 0x82c   : > { %9802 = vmatprep.subr.mxu0 %v10730_v23 }
 0x8cd   : > { %v5557_v27 = vpop.f32.mrf.mxu0 }
 0x8ce   : > { %v5568_v44 = vmul.f32 %v8484_v19, %v5557_v27  ;;  %v7041_v19 = vld [vmem:[%s13103_s4 + $0x20] sm:$0xff]  ;;  %v7040_v27 = vld [vmem:[%s13103_s4 + $0x18] sm:$0xff] }
 0x8cf   : > { %v9724_v37 = vpop.f32.mrf.mxu0  ;;  %v5726_v50 = vpop.f32.mrf.mxu1 }
 0x8d0   : > { %v5569_v31 = vadd.f32 %v8482_v11, %v5568_v44  ;;  %v5738_v16 = vmul.f32 %v8492_v53, %v5726_v50  ;;  %v7039_v44 = vld [vmem:[%s13103_s4 + $0x10] sm:$0xff]  ;;  %v7038_v37 = vld [vmem:[%s13103_s4 + $0x8] sm:$0xff]  ;;  %v7037_v50 = vld [vmem:[%s13103_s4] sm:$0xff]  ;;  %s8183_s4 = sshll.u32 %s12462_s18, 2 }
 0x8d1   : > { %v9738_v51 = vpop.f32.mrf.mxu1  ;;  %v8522_v11 = vld [vmem:[%s13104_s22] ss:$0 sm:$0xff]  ;;  %s13110_s22 = sld [smem:[#allocation58_spill]] }
 0x8d2   : > { %v5641_v24 = vpop.f32.mrf.mxu0  ;;  %v8519_v51 = vld [vmem:[%s13106_s3] ss:$0 sm:$0xff]  ;;  %s13107_s3 = sld [smem:[#allocation61_spill]] }
 0x8d3   : > { %v5653_v35 = vmul.f32 %v8488_v3, %v5641_v24 }
 0x8d4   : > { %v9731_v57 = vpop.f32.mrf.mxu0 }
 0x8d5   : > { %v5654_v40 = vadd.f32 %v5653_v35, %v5569_v31  ;;  %v5896_v39 = vpop.f32.mrf.mxu1  ;;  %v8527_v31 = vld [vmem:[%s13105_s2 + $0x1] ss:$0 sm:$0xff] }
 0x8d6   : > { %v5908_v2 = vmul.f32 %v8500_v56, %v5896_v39 }
 0x8d7   : > { %v5739_v42 = vadd.f32 %v5738_v16, %v5654_v40  ;;  %v9752_v1 = vpop.f32.mrf.mxu1  ;;  %v8532_v16 = vld [vmem:[%s13105_s2 + $0x2] ss:$0 sm:$0xff] }
 0x8d8   : > { %v5811_v58 = vpop.f32.mrf.mxu0  ;;  %v8537_v1 = vld [vmem:[%s13105_s2 + $0x3] ss:$0 sm:$0xff] }
 0x8d9   : > { %v5823_v60 = vmul.f32 %v8496_v55, %v5811_v58 }
 0x8da   : > { %v9745_v30 = vpop.f32.mrf.mxu0 }
 0x8db   : > { %v5824_v34 = vadd.f32 %v5823_v60, %v5739_v42  ;;  %v6066_v48 = vpop.f32.mrf.mxu1  ;;  %v8539_v30 = vld [vmem:[%s13105_s2 + $0x4] ss:$0 sm:$0xff] }
 0x8dc   : > { %v6078_v20 = vmul.f32 %v8508_v45, %v6066_v48 }
 0x8dd   : > { %v5909_v54 = vadd.f32 %v5908_v2, %v5824_v34  ;;  %v9766_v49 = vpop.f32.mrf.mxu1  ;;  %v8544_v34 = vld [vmem:[%s13105_s2 + $0x5] ss:$0 sm:$0xff] }
 0x8de   : > { %v5981_v22 = vpop.f32.mrf.mxu0  ;;  %v8549_v49 = vld [vmem:[%s13105_s2 + $0x6] ss:$0 sm:$0xff] }
 0x8df   : > { %v5993_v7 = vmul.f32 %v8504_v47, %v5981_v22 }
 0x8e0   : > { %v9759_v63 = vpop.f32.mrf.mxu0 }
 0x8e1   : > { %v5994_v61 = vadd.f32 %v5993_v7, %v5909_v54  ;;  %v6236_v4 = vpop.f32.mrf.mxu1 }
 0x8e2   : > { %v6248_v17 = vmul.f32 %v8516_v5, %v6236_v4 }
 0x8e3   : > { %v6079_v10 = vadd.f32 %v6078_v20, %v5994_v61  ;;  %v6151_v36 = vpop.f32.mrf.mxu0  ;;  %v9780_v18 = vpop.f32.mrf.mxu1 }
 0x8e4   : > { %v6163_v52 = vmul.f32 %v8512_v46, %v6151_v36  ;;  %v8554_v46 = vld [vmem:[%s13105_s2 + $0x7] ss:$0 sm:$0xff]  ;;  %v8559_v18 = vld [vmem:[%s13105_s2 + $0x8] ss:$0 sm:$0xff]  ;;  %s13109_s2 = smov %s13108_s15 }
 0x8e5   : > { %v9773_v25 = vpop.f32.mrf.mxu0 }
 0x8e6   : > { %v6164_v26 = vadd.f32 %v6163_v52, %v6079_v10 }
 0x8e8   : > { %v6249_v29 = vadd.f32 %v6248_v17, %v6164_v26 }
 0x8ea   : > { %v6250_v33 = vmax.f32 %v6249_v29, 0.0 }
 0x8ec   : > { %9790 = vmatmul.mubr.msk.f32.vlgmr.msra.gmra.mxu0 %vm5394_vm5, %v6250_v33 }
 0x8ed   : > { %9804 = vmatprep.mubr.msk.f32.mxu0 %vm10731_vm6, %v10730_v23 }
 0x9ac   : > { %v6331_v32 = vpop.f32.mrf.mxu0 }
 0x9ad   : > { %v6332_v13 = vadd.f32 %v8517_v59, %v6331_v32 }
 0x9ae   : > { %v9791_v0 = vpop.f32.mrf.mxu0 }
 0x9af   : > { %v12548_v43 = vmax.f32 %v6332_v13, 0.0  ;;  %v7223_v0 = vld [vmem:[%s13107_s3 + $0x38] sm:$0xff] }
 0x9b1   : > { %9793 = vmatpush3.msk.msra.mxu1 %vm6348_vm7, %v12548_v43  ;;  %9803 = vmatpush3.msk.msra.mxu0 %vm6348_vm7, %v12548_v43  ;;  %v6694_v7 = vmul.f32 %v8539_v30, %v12548_v43 }
 0x9b2   : > { %9795 = vmatmul.mubr.msk.f32.vlgmr.msra.gmra.mxu1 %vm6344_vm8, %v6343_v21  ;;  %9797 = vmatprep.subr.mxu1 %v10730_v23  ;;  %v7221_v21 = vld [vmem:[%s13107_s3 + $0x28] sm:$0xff] }
 0x9b3   : > { %9798 = vmatpush3.msk.msra.mxu1 %vm6348_vm7, %v12548_v43  ;;  %9799 = vmatprep.mubr.msk.f32.mxu1 %vm10731_vm6, %v10730_v23 }
 0x9b4   : > { %9805 = vmatmul.mubr.msk.f32.vlgmr.msra.gmra.mxu0 %vm6344_vm8, %v8528_v62  ;;  %9807 = vmatprep.subr.mxu1 %v10730_v23  ;;  %v7220_v62 = vld [vmem:[%s13107_s3 + $0x20] sm:$0xff] }
 0x9b5   : > { %9812 = vmatprep.subr.mxu0 %v10730_v23  ;;  %9814 = vmatprep.mubr.msk.f32.mxu0 %vm10731_vm6, %v10730_v23 }
 0x9b6   : > { %9800 = vmatmul.mubr.msk.f32.vlgmr.msra.gmra.mxu1 %vm6344_vm8, %v8523_v41  ;;  %9813 = vmatpush3.msk.msra.mxu0 %vm6348_vm7, %v12548_v43  ;;  %v7219_v41 = vld [vmem:[%s13107_s3 + $0x18] sm:$0xff] }
 0x9b7   : > { %9808 = vmatpush3.msk.msra.mxu1 %vm6348_vm7, %v12548_v43  ;;  %9809 = vmatprep.mubr.msk.f32.mxu1 %vm10731_vm6, %v10730_v23 }
 0x9b8   : > { %9817 = vmatprep.subr.mxu1 %v10730_v23  ;;  %9822 = vmatprep.subr.mxu0 %v10730_v23 }
 0x9b9   : > { %9815 = vmatmul.mubr.msk.f32.vlgmr.msra.gmra.mxu0 %vm6344_vm8, %v8540_v8  ;;  %v7218_v8 = vld [vmem:[%s13107_s3 + $0x10] sm:$0xff] }
 0x9ba   : > { %9810 = vmatmul.mubr.msk.f32.vlgmr.msra.gmra.mxu1 %vm6344_vm8, %v8533_v9  ;;  %9823 = vmatpush3.msk.msra.mxu0 %vm6348_vm7, %v12548_v43  ;;  %v7217_v9 = vld [vmem:[%s13107_s3 + $0x8] sm:$0xff] }
 0x9bb   : > { %9818 = vmatpush3.msk.msra.mxu1 %vm6348_vm7, %v12548_v43  ;;  %9819 = vmatprep.mubr.msk.f32.mxu1 %vm10731_vm6, %v10730_v23 }
 0x9bc   : > { %9827 = vmatprep.subr.mxu1 %v10730_v23  ;;  %9824 = vmatprep.mubr.msk.f32.mxu0 %vm10731_vm6, %v10730_v23 }
 0x9bd   : > { %9825 = vmatmul.mubr.msk.f32.vlgmr.msra.gmra.mxu0 %vm6344_vm8, %v8550_v12  ;;  %9832 = vmatprep.subr.mxu0 %v10730_v23  ;;  %v7216_v12 = vld [vmem:[%s13107_s3] sm:$0xff] }
 0x9be   : > { %9820 = vmatmul.mubr.msk.f32.vlgmr.msra.gmra.mxu1 %vm6344_vm8, %v8545_v15  ;;  %9848 = vmatprep.mubr.msk.f32.mxu0 %vm10731_vm6, %v10730_v23  ;;  %v7320_v15 = vld [vmem:[%s13108_s15 + $0x78] sm:$0xff]  ;;  %s13111_s15 = sld [smem:[#allocation59_spill]] }
 0x9bf   : > { %9828 = vmatpush3.msk.msra.mxu1 %vm6348_vm7, %v12548_v43  ;;  %9829 = vmatprep.mubr.msk.f32.mxu1 %vm10731_vm6, %v10730_v23  ;;  %v7222_v43 = vld [vmem:[%s13107_s3 + $0x30] sm:$0xff] }
 0x9c0   : > { %9851 = vmatprep.subr.mxu1 %v10730_v23  ;;  %9833 = vmatpush3.msra.mxu0 %v7044_v6  ;;  %v7318_v6 = vld [vmem:[%s13109_s2 + $0x68] sm:$0xff] }
 0x9c1   : > { %9834 = vmatprep.subr.mxu0 %v10730_v23 }
 0x9c2   : > { %9830 = vmatmul.mubr.msk.f32.vlgmr.msra.gmra.mxu1 %vm6344_vm8, %v8555_v14  ;;  %9835 = vmatpush3.msra.mxu0 %v7043_v28  ;;  %v7319_v14 = vld [vmem:[%s13109_s2 + $0x70] sm:$0xff]  ;;  %v7317_v28 = vld [vmem:[%s13109_s2 + $0x60] sm:$0xff] }
 0x9c3   : > { %9867 = vmatprep.mubr.msk.f32.mxu1 %vm10731_vm6, %v10730_v23  ;;  %9836 = vmatprep.subr.mxu0 %v10730_v23 }
 0x9c4   : > { %9837 = vmatpush3.msra.mxu0 %v7042_v38  ;;  %9852 = vmatpush3.msra.mxu1 %v7223_v0  ;;  %v7316_v38 = vld [vmem:[%s13109_s2 + $0x58] sm:$0xff]  ;;  %s13112_s3 = smov %s13111_s15 }
 0x9c5   : > { %9838 = vmatprep.subr.mxu0 %v10730_v23  ;;  %9853 = vmatprep.subr.mxu1 %v10730_v23 }
 0x9c6   : > { %9839 = vmatpush3.msra.mxu0 %v7041_v19  ;;  %9854 = vmatpush3.msra.mxu1 %v7222_v43  ;;  %v7315_v19 = vld [vmem:[%s13109_s2 + $0x50] sm:$0xff] }
 0x9c7   : > { %9840 = vmatprep.subr.mxu0 %v10730_v23  ;;  %9855 = vmatprep.subr.mxu1 %v10730_v23 }
 0x9c8   : > { %9841 = vmatpush3.msra.mxu0 %v7040_v27  ;;  %9856 = vmatpush3.msra.mxu1 %v7221_v21  ;;  %v7314_v27 = vld [vmem:[%s13109_s2 + $0x48] sm:$0xff] }
 0x9c9   : > { %9842 = vmatprep.subr.mxu0 %v10730_v23  ;;  %9857 = vmatprep.subr.mxu1 %v10730_v23 }
 0x9ca   : > { %9843 = vmatpush3.msra.mxu0 %v7039_v44  ;;  %9858 = vmatpush3.msra.mxu1 %v7220_v62  ;;  %v7313_v44 = vld [vmem:[%s13109_s2 + $0x40] sm:$0xff] }
 0x9cb   : > { %9844 = vmatprep.subr.mxu0 %v10730_v23  ;;  %9859 = vmatprep.subr.mxu1 %v10730_v23 }
 0x9cc   : > { %9845 = vmatpush3.msra.mxu0 %v7038_v37  ;;  %9860 = vmatpush3.msra.mxu1 %v7219_v41  ;;  %v7312_v37 = vld [vmem:[%s13109_s2 + $0x38] sm:$0xff] }
 0x9cd   : > { %9846 = vmatprep.subr.mxu0 %v10730_v23  ;;  %9861 = vmatprep.subr.mxu1 %v10730_v23 }
 0x9ce   : > { %9847 = vmatpush3.msra.mxu0 %v7037_v50  ;;  %9862 = vmatpush3.msra.mxu1 %v7218_v8  ;;  %v7311_v50 = vld [vmem:[%s13109_s2 + $0x30] sm:$0xff] }
 0x9cf   : > { %9870 = vmatprep.subr.mxu0 %v10730_v23  ;;  %9863 = vmatprep.subr.mxu1 %v10730_v23 }
 0x9d0   : > { %9864 = vmatpush3.msra.mxu1 %v7217_v9  ;;  %v7224_v9 = vld [vmem:[#allocation5] sm:$0x1] }
 0x9d1   : > { %9865 = vmatprep.subr.mxu1 %v10730_v23 }
 0x9d2   : > { %9866 = vmatpush3.msra.mxu1 %v7216_v12 }
 0x9d3   : > { %9905 = vmatprep.subr.mxu1 %v10730_v23 }
 0xa72   : > { %v6418_v3 = vpop.f32.mrf.mxu1 }
 0xa73   : > { %v6429_v53 = vmul.f32 %v8522_v11, %v6418_v3  ;;  %v10732_v11 = vmov 1966171168  }
 0xa74   : > { %v9796_v24 = vpop.f32.mrf.mxu1  ;;  %v6587_v35 = vpop.f32.mrf.mxu0  ;;  %v7144_v3 = vunpack.c.l.s4 %v10732_v11 }
 0xa75   : > { %v6430_v39 = vadd.f32 %v8519_v51, %v6429_v53  ;;  %v6599_v56 = vmul.f32 %v8532_v16, %v6587_v35  ;;  %v7146_v53 = vlaneseq  ;;  %v8560_v51 = vld [vmem:[%s13110_s22] ss:$0 sm:$0xff]  ;;  %s12684_s22 = scalar_lea.vmem [#allocation21], %s8183_s4  ;;  %s13113_s4 = sld [smem:[#allocation66_spill]] }
 0xa76   : > { %v6502_v57 = vpop.f32.mrf.mxu1  ;;  %v9806_v40 = vpop.f32.mrf.mxu0  ;;  %v7145_v24 = vunpack.c.0.s8 %v7144_v3  ;;  %s7861_s5 = sshll.u32 %s12684_s22, 4  ;;  %s7862_s5 = int_to_ptr.vmem [resolvable:$true] %s7861_s5 }
 0xa77   : > { %v6514_v55 = vmul.f32 %v8527_v31, %v6502_v57  ;;  %v12674_v31 = vshrl.u32 %v7146_v53, 7  ;;  %v8564_v57 = vld [vmem:[%s13111_s15 + $0x5] ss:$0 sm:$0xff]  ;;  %v8566_v40 = vld [vmem:[%s13112_s3 + $0x7] ss:$0 sm:$0xff]  ;;  %s13114_s15 = sld [smem:[#allocation62_spill]] }
 0xa78   : > { %v9801_v42 = vpop.f32.mrf.mxu1  ;;  %s10523_s9 = scalar_lea.vmem %s7862_s5, 64 }
 0xa79   : > { %v6515_v58 = vadd.f32 %v6514_v55, %v6430_v39  ;;  %v6767_v60 = vpop.f32.mrf.mxu0  ;;  %v8568_v39 = vld [vmem:[%s13112_s3 + $0x8] ss:$0 sm:$0xff]  ;;  %v12681_v42 = vsub.s32 %v7145_v24, %v12674_v31  ;;  %p10524_p4 = scmp.ne.s32.totalorder %s7862_s5, %s10523_s9 }
 0xa7a   : > { %v6672_v2 = vpop.f32.mrf.mxu1  ;;  %v6779_v20 = vmul.f32 %v8544_v34, %v6767_v60 }
 0xa7b   : > { %v6600_v48 = vadd.f32 %v6599_v56, %v6515_v58  ;;  %v6684_v47 = vmul.f32 %v8537_v1, %v6672_v2  ;;  %v9816_v45 = vpop.f32.mrf.mxu0  ;;  %v8562_v1 = vld [vmem:[%s13112_s3 + $0x4] sm:$0x1]  ;;  %v7410_v0 = vld [vmem:[%s13113_s4 + $0x58] sm:$0xff]  ;;  %v7409_v43 = vld [vmem:[%s13113_s4 + $0x50] sm:$0xff]  ;;  %s13117_s3 = sld [smem:[#allocation72_spill]]  ;;  %p10525_p6 = pnand %p10524_p4, %p13122_p5 }
 0xa7c   : > { %v9811_v54 = vpop.f32.mrf.mxu1  ;;  %v7128_v45 = vld [vmem:[#allocation2] sm:$0x1]  ;;  %v7408_v21 = vld [vmem:[%s13113_s4 + $0x48] sm:$0xff]  ;;  %v7406_v41 = vld [vmem:[%s13113_s4 + $0x38] sm:$0xff] }
 0xa7d   : > { %v6685_v22 = vadd.f32 %v6684_v47, %v6600_v48  ;;  %v6937_v63 = vpop.f32.mrf.mxu0  ;;  %v7407_v62 = vld [vmem:[%s13113_s4 + $0x40] sm:$0xff]  ;;  %v7405_v8 = vld [vmem:[%s13113_s4 + $0x30] sm:$0xff]  ;;  %v7402_v11 = vld [vmem:[%s13113_s4 + $0x18] sm:$0xff]  ;;  %p10526_p13 = pneg %p10525_p6 }
 0xa7e   : > { %v6852_v61 = vpop.f32.mrf.mxu1  ;;  %v6949_v17 = vmul.f32 %v8554_v46, %v6937_v63  ;;  %v7401_v3 = vld [vmem:[%s13113_s4 + $0x10] sm:$0xff]  ;;  %v7399_v24 = vld [vmem:[%s13113_s4] sm:$0xff] }
 0xa7f   : > { %v6695_v4 = vadd.f32 %v6694_v7, %v6685_v22  ;;  %v6864_v5 = vmul.f32 %v8549_v49, %v6852_v61  ;;  %v9826_v10 = vpop.f32.mrf.mxu0 }
 0xa80   : > { %v9821_v36 = vpop.f32.mrf.mxu1 }
 0xa81   : > { %v6780_v52 = vadd.f32 %v6779_v20, %v6695_v4 }
 0xa82   : > { %v7022_v25 = vpop.f32.mrf.mxu1 }
 0xa83   : > { %v6865_v26 = vadd.f32 %v6864_v5, %v6780_v52  ;;  %v7034_v29 = vmul.f32 %v8559_v18, %v7022_v25  ;;  %v7310_v18 = vld [vmem:[%s13109_s2 + $0x28] sm:$0xff]  ;;  %v7309_v52 = vld [vmem:[%s13109_s2 + $0x20] sm:$0xff]  ;;  %v7307_v25 = vld [vmem:[%s13109_s2 + $0x10] sm:$0xff] }
 0xa84   : > { %v9831_v33 = vpop.f32.mrf.mxu1 }
 0xa85   : > { %v6950_v59 = vadd.f32 %v6949_v17, %v6865_v26  ;;  %v7308_v17 = vld [vmem:[%s13109_s2 + $0x18] sm:$0xff]  ;;  %v7306_v26 = vld [vmem:[%s13109_s2 + $0x8] sm:$0xff] }
 0xa86   : > { %v7414_v33 = vld [vmem:[%s13113_s4 + $0x78] sm:$0xff] }
 0xa87   : > { %v7035_v32 = vadd.f32 %v7034_v29, %v6950_v59  ;;  %v7305_v29 = vld [vmem:[%s13109_s2] sm:$0xff]  ;;  %v7413_v59 = vld [vmem:[%s13113_s4 + $0x70] sm:$0xff]  ;;  %s13115_s2 = sld [smem:[#allocation68_spill]] }
 0xa89   : > { %v7036_v13 = vmax.f32 %v7035_v32, 0.0  ;;  %v7412_v32 = vld [vmem:[%s13113_s4 + $0x68] sm:$0xff] }
 0xa8b   : > { %9849 = vmatmul.mubr.msk.f32.vlgmr.msra.gmra.mxu0 %vm3640_vm3, %v7036_v13  ;;  %v7411_v13 = vld [vmem:[%s13113_s4 + $0x60] sm:$0xff] }
 0xa8c   : > { %9902 = vmatprep.mubr.msk.f32.mxu0 %vm10731_vm6, %v10730_v23  ;;  %9871 = vmatpush3.msra.mxu0 %v7320_v15 }
 0xa8d   : > { %9872 = vmatprep.subr.mxu0 %v10730_v23 }
 0xa8e   : > { %9873 = vmatpush3.msra.mxu0 %v7319_v14  ;;  %v8570_v14 = vld [vmem:[%s13114_s15 + $0x4] sm:$0x1]  ;;  %s13116_s15 = sld [smem:[#allocation65_spill]] }
 0xa8f   : > { %9874 = vmatprep.subr.mxu0 %v10730_v23 }
 0xa90   : > { %9875 = vmatpush3.msra.mxu0 %v7318_v6 }
 0xa91   : > { %9876 = vmatprep.subr.mxu0 %v10730_v23 }
 0xa92   : > { %9877 = vmatpush3.msra.mxu0 %v7317_v28 }
 0xa93   : > { %9878 = vmatprep.subr.mxu0 %v10730_v23 }
 0xa94   : > { %9879 = vmatpush3.msra.mxu0 %v7316_v38  ;;  %v7299_v38 = vld [vmem:[#allocation7] sm:$0x1] }
 0xa95   : > { %9880 = vmatprep.subr.mxu0 %v10730_v23 }
 0xa96   : > { %9881 = vmatpush3.msra.mxu0 %v7315_v19 }
 0xa97   : > { %9882 = vmatprep.subr.mxu0 %v10730_v23 }
 0xa98   : > { %9883 = vmatpush3.msra.mxu0 %v7314_v27 }
 0xa99   : > { %9884 = vmatprep.subr.mxu0 %v10730_v23 }
 0xa9a   : > { %9885 = vmatpush3.msra.mxu0 %v7313_v44 }
 0xa9b   : > { %9886 = vmatprep.subr.mxu0 %v10730_v23 }
 0xa9c   : > { %9887 = vmatpush3.msra.mxu0 %v7312_v37  ;;  %v7404_v37 = vld [vmem:[%s13113_s4 + $0x28] sm:$0xff] }
 0xa9d   : > { %9888 = vmatprep.subr.mxu0 %v10730_v23 }
 0xa9e   : > { %9889 = vmatpush3.msra.mxu0 %v7311_v50  ;;  %v7403_v50 = vld [vmem:[%s13113_s4 + $0x20] sm:$0xff] }
 0xa9f   : > { %9890 = vmatprep.subr.mxu0 %v10730_v23 }
 0xaa0   : > { %9891 = vmatpush3.msra.mxu0 %v7310_v18  ;;  %v7600_v18 = vld [vmem:[%s13117_s3 + $0x68] sm:$0xff] }
 0xaa1   : > { %9892 = vmatprep.subr.mxu0 %v10730_v23 }
 0xaa2   : > { %9893 = vmatpush3.msra.mxu0 %v7309_v52  ;;  %v7599_v52 = vld [vmem:[%s13117_s3 + $0x60] sm:$0xff] }
 0xaa3   : > { %9894 = vmatprep.subr.mxu0 %v10730_v23 }
 0xaa4   : > { %9895 = vmatpush3.msra.mxu0 %v7308_v17  ;;  %v7598_v17 = vld [vmem:[%s13117_s3 + $0x58] sm:$0xff] }
 0xaa5   : > { %9896 = vmatprep.subr.mxu0 %v10730_v23 }
 0xaa6   : > { %9897 = vmatpush3.msra.mxu0 %v7307_v25  ;;  %v7597_v25 = vld [vmem:[%s13117_s3 + $0x50] sm:$0xff] }
 0xaa7   : > { %9898 = vmatprep.subr.mxu0 %v10730_v23 }
 0xaa8   : > { %9899 = vmatpush3.msra.mxu0 %v7306_v26  ;;  %v7596_v26 = vld [vmem:[%s13117_s3 + $0x48] sm:$0xff] }
 0xaa9   : > { %9900 = vmatprep.subr.mxu0 %v10730_v23 }
 0xaaa   : > { %9901 = vmatpush3.msra.mxu0 %v7305_v29  ;;  %v7595_v29 = vld [vmem:[%s13117_s3 + $0x40] sm:$0xff] }
 0xaab   : > { %9940 = vmatprep.subr.mxu0 %v10730_v23 }
 0xb4b   : > { %v7121_v35 = vpop.f32.mrf.mxu0 }
 0xb4c   : > { %v7122_v16 = vadd.f32 %v8560_v51, %v7121_v35  ;;  %v7400_v51 = vld [vmem:[%s13113_s4 + $0x8] sm:$0xff]  ;;  %v7508_v35 = vld [vmem:[%s13115_s2 + $0x78] sm:$0xff] }
 0xb4d   : > { %v9850_v55 = vpop.f32.mrf.mxu0 }
 0xb4e   : > { %v7125_v56 = vmax.f32 %v7122_v16, 0.0  ;;  %v7507_v16 = vld [vmem:[%s13115_s2 + $0x70] sm:$0xff] }
 0xb4f   : > { %v7503_v55 = vld [vmem:[%s13115_s2 + $0x50] sm:$0xff] }
 0xb50   : > { %v7141_v58 = vmul.f32 %v8564_v57, %v7125_v56  ;;  %v7168_v60 = vmul.f32 %v8566_v40, %v7125_v56  ;;  %v7195_v2 = vmul.f32 %v8568_v39, %v7125_v56  ;;  %7127 = vst.msk [vmem:[%s12684_s22] sm:$0xf] %vm7126_vm9, %v7125_v56  ;;  %v7131_v30 = vmul.f32 %v8562_v1, %v7125_v56  ;;  %v7506_v57 = vld [vmem:[%s13115_s2 + $0x68] sm:$0xff]  ;;  %v7505_v40 = vld [vmem:[%s13115_s2 + $0x60] sm:$0xff]  ;;  %v7504_v39 = vld [vmem:[%s13115_s2 + $0x58] sm:$0xff] }
 0xb51   : > { %v7502_v56 = vld [vmem:[%s13115_s2 + $0x48] sm:$0xff]  ;;  %v7501_v1 = vld [vmem:[%s13115_s2 + $0x40] sm:$0xff] }
 0xb52   : > { %v7149_v34 = vrot.slane %v7141_v58, %v12681_v42  ;;  %v7176_v48 = vrot.slane %v7168_v60, %v12681_v42  ;;  %v7203_v47 = vrot.slane %v7195_v2, %v12681_v42  ;;  %v7132_v7 = vadd.f32 %v7131_v30, %v7128_v45  ;;  %v7500_v58 = vld [vmem:[%s13115_s2 + $0x38] sm:$0xff]  ;;  %v7499_v60 = vld [vmem:[%s13115_s2 + $0x30] sm:$0xff]  ;;  %v7321_v2 = vld [vmem:[#allocation8] sm:$0x1] }
 0xb54   : > { %v7150_v54 = vcombine.high %v7149_v34, %v7149_v34  ;;  %v7183_v49 = vrot.slane %v7176_v48, %v12681_v42  ;;  %v7204_v22 = vcombine.high %v7203_v47, %v7203_v47  ;;  %v8571_v48 = vld [vmem:[%s13116_s15 + $0x4] sm:$0x1]  ;;  %s13118_s15 = sld [smem:[#allocation67_spill]] }
 0xb56   : > { %v7157_v20 = vrot.slane %v7150_v54, %v12681_v42  ;;  %v7211_v63 = vrot.slane %v7204_v22, %v12681_v42  ;;  %v7184_v46 = vcombine.high %v7183_v49, %v7183_v49  ;;  %v7393_v54 = vld [vmem:[#allocation10] sm:$0x1] }
 0xb58   : > { %v7159_v61 = vadd.f32 %v7157_v20, %v7132_v7  ;;  %v7212_v5 = vcombine.high %v7211_v63, %v7211_v63  ;;  %v7498_v20 = vld [vmem:[%s13115_s2 + $0x28] sm:$0xff]  ;;  %v7497_v63 = vld [vmem:[%s13115_s2 + $0x20] sm:$0xff] }
 0xb5a   : > { %v7186_v4 = vadd.f32 %v7184_v46, %v7159_v61  ;;  %v7496_v61 = vld [vmem:[%s13115_s2 + $0x18] sm:$0xff]  ;;  %v7495_v46 = vld [vmem:[%s13115_s2 + $0x10] sm:$0xff] }
 0xb5c   : > { %v7214_v10 = vadd.f32 %v7212_v5, %v7186_v4  ;;  %v7494_v4 = vld [vmem:[%s13115_s2 + $0x8] sm:$0xff]  ;;  %v7493_v5 = vld [vmem:[%s13115_s2] sm:$0xff]  ;;  %s13119_s2 = sld [smem:[#allocation74_spill]] }
 0xb5e   : > { %v7215_v36 = vmax.f32 %v7214_v10, 0.0  ;;  %v7602_v10 = vld [vmem:[%s13117_s3 + $0x78] sm:$0xff] }
 0xb60   : > { %9868 = vmatmul.mubr.msk.f32.vlgmr.msra.gmra.mxu1 %vm3640_vm3, %v7215_v36  ;;  %v7601_v36 = vld [vmem:[%s13117_s3 + $0x70] sm:$0xff] }
 0xb61   : > { %9937 = vmatprep.mubr.msk.f32.mxu1 %vm10731_vm6, %v10730_v23  ;;  %9906 = vmatpush3.msra.mxu1 %v7414_v33  ;;  %v7594_v33 = vld [vmem:[%s13117_s3 + $0x38] sm:$0xff] }
 0xb62   : > { %9907 = vmatprep.subr.mxu1 %v10730_v23 }
 0xb63   : > { %9908 = vmatpush3.msra.mxu1 %v7413_v59  ;;  %v7593_v59 = vld [vmem:[%s13117_s3 + $0x30] sm:$0xff] }
 0xb64   : > { %9909 = vmatprep.subr.mxu1 %v10730_v23 }
 0xb65   : > { %9910 = vmatpush3.msra.mxu1 %v7412_v32  ;;  %v7415_v32 = vld [vmem:[#allocation11] sm:$0x1] }
 0xb66   : > { %9911 = vmatprep.subr.mxu1 %v10730_v23 }
 0xb67   : > { %9912 = vmatpush3.msra.mxu1 %v7411_v13 }
 0xb68   : > { %9913 = vmatprep.subr.mxu1 %v10730_v23 }
 0xb69   : > { %9914 = vmatpush3.msra.mxu1 %v7410_v0 }
 0xb6a   : > { %9915 = vmatprep.subr.mxu1 %v10730_v23 }
 0xb6b   : > { %9916 = vmatpush3.msra.mxu1 %v7409_v43  ;;  %v8572_v43 = vld [vmem:[%s13118_s15 + $0x4] sm:$0x1]  ;;  %s13120_s15 = sld [smem:[#allocation70_spill]] }
 0xb6c   : > { %9917 = vmatprep.subr.mxu1 %v10730_v23 }
 0xb6d   : > { %9918 = vmatpush3.msra.mxu1 %v7408_v21 }
 0xb6e   : > { %9919 = vmatprep.subr.mxu1 %v10730_v23 }
 0xb6f   : > { %9920 = vmatpush3.msra.mxu1 %v7407_v62 }
 0xb70   : > { %9921 = vmatprep.subr.mxu1 %v10730_v23 }
 0xb71   : > { %9922 = vmatpush3.msra.mxu1 %v7406_v41  ;;  %v7487_v41 = vld [vmem:[#allocation13] sm:$0x1] }
 0xb72   : > { %9923 = vmatprep.subr.mxu1 %v10730_v23 }
 0xb73   : > { %9924 = vmatpush3.msra.mxu1 %v7405_v8 }
 0xb74   : > { %9925 = vmatprep.subr.mxu1 %v10730_v23 }
 0xb75   : > { %9926 = vmatpush3.msra.mxu1 %v7404_v37  ;;  %v7710_v37 = vld [vmem:[%s13119_s2 + $0xe8] sm:$0xff] }
 0xb76   : > { %9927 = vmatprep.subr.mxu1 %v10730_v23 }
 0xb77   : > { %9928 = vmatpush3.msra.mxu1 %v7403_v50  ;;  %v7709_v50 = vld [vmem:[%s13119_s2 + $0xe0] sm:$0xff] }
 0xb78   : > { %9929 = vmatprep.subr.mxu1 %v10730_v23 }
 0xb79   : > { %9930 = vmatpush3.msra.mxu1 %v7402_v11  ;;  %v7708_v11 = vld [vmem:[%s13119_s2 + $0xd8] sm:$0xff] }
 0xb7a   : > { %9931 = vmatprep.subr.mxu1 %v10730_v23 }
 0xb7b   : > { %9932 = vmatpush3.msra.mxu1 %v7401_v3  ;;  %v7707_v3 = vld [vmem:[%s13119_s2 + $0xd0] sm:$0xff] }
 0xb7c   : > { %9933 = vmatprep.subr.mxu1 %v10730_v23 }
 0xb7d   : > { %9934 = vmatpush3.msra.mxu1 %v7400_v51  ;;  %v7706_v51 = vld [vmem:[%s13119_s2 + $0xc8] sm:$0xff] }
 0xb7e   : > { %9935 = vmatprep.subr.mxu1 %v10730_v23 }
 0xb7f   : > { %9936 = vmatpush3.msra.mxu1 %v7399_v24  ;;  %v7705_v24 = vld [vmem:[%s13119_s2 + $0xc0] sm:$0xff] }
 0xb80   : > { %9975 = vmatprep.subr.mxu1 %v10730_v23 }
 0xc20   : > { %v7294_v12 = vpop.f32.mrf.mxu1 }
 0xc21   : > { %v7295_v15 = vadd.f32 %v7294_v12, %v7224_v9 }
 0xc22   : > { %v9869_v6 = vpop.f32.mrf.mxu1 }
 0xc23   : > { %v7298_v28 = vmax.f32 %v7295_v15, 0.0  ;;  %v7592_v15 = vld [vmem:[%s13117_s3 + $0x28] sm:$0xff]  ;;  %v7590_v6 = vld [vmem:[%s13117_s3 + $0x18] sm:$0xff] }
 0xc25   : > { %v7302_v19 = vmul.f32 %v8570_v14, %v7298_v28  ;;  %v7591_v14 = vld [vmem:[%s13117_s3 + $0x20] sm:$0xff]  ;;  %v7589_v28 = vld [vmem:[%s13117_s3 + $0x10] sm:$0xff] }
 0xc27   : > { %v7303_v27 = vadd.f32 %v7302_v19, %v7299_v38  ;;  %v7588_v38 = vld [vmem:[%s13117_s3 + $0x8] sm:$0xff]  ;;  %v7587_v19 = vld [vmem:[%s13117_s3] sm:$0xff]  ;;  %s8580_s3 = sshll.u32 %s11039_s0, 6 }
 0xc28   : > { %s12847_s4 = scalar_lea.hbm %s11011_s13, %s8580_s3 }
 0xc29   : > { %v7304_v44 = vmax.f32 %v7303_v27, 0.0  ;;  %v7712_v27 = vld [vmem:[%s13119_s2 + $0xf8] sm:$0xff] }
 0xc2b   : > { %9903 = vmatmul.mubr.f32.vlgmr.msra.gmra.mxu0 %v7304_v44  ;;  %v7711_v44 = vld [vmem:[%s13119_s2 + $0xf0] sm:$0xff] }
 0xc2c   : > { %9972 = vmatprep.mubr.msk.f32.mxu0 %vm10731_vm6, %v10730_v23  ;;  %9941 = vmatpush3.msra.mxu0 %v7508_v35  ;;  %v7704_v35 = vld [vmem:[%s13119_s2 + $0xb8] sm:$0xff] }
 0xc2d   : > { %9942 = vmatprep.subr.mxu0 %v10730_v23 }
 0xc2e   : > { %9943 = vmatpush3.msra.mxu0 %v7507_v16  ;;  %v7703_v16 = vld [vmem:[%s13119_s2 + $0xb0] sm:$0xff] }
 0xc2f   : > { %9944 = vmatprep.subr.mxu0 %v10730_v23 }
 0xc30   : > { %9945 = vmatpush3.msra.mxu0 %v7506_v57  ;;  %v7701_v57 = vld [vmem:[%s13119_s2 + $0xa0] sm:$0xff] }
 0xc31   : > { %9946 = vmatprep.subr.mxu0 %v10730_v23 }
 0xc32   : > { %9947 = vmatpush3.msra.mxu0 %v7505_v40  ;;  %v7700_v40 = vld [vmem:[%s13119_s2 + $0x98] sm:$0xff] }
 0xc33   : > { %9948 = vmatprep.subr.mxu0 %v10730_v23 }
 0xc34   : > { %9949 = vmatpush3.msra.mxu0 %v7504_v39  ;;  %v7699_v39 = vld [vmem:[%s13119_s2 + $0x90] sm:$0xff] }
 0xc35   : > { %9950 = vmatprep.subr.mxu0 %v10730_v23 }
 0xc36   : > { %9951 = vmatpush3.msra.mxu0 %v7503_v55  ;;  %v7698_v55 = vld [vmem:[%s13119_s2 + $0x88] sm:$0xff] }
 0xc37   : > { %9952 = vmatprep.subr.mxu0 %v10730_v23 }
 0xc38   : > { %9953 = vmatpush3.msra.mxu0 %v7502_v56  ;;  %v7697_v56 = vld [vmem:[%s13119_s2 + $0x80] sm:$0xff] }
 0xc39   : > { %9954 = vmatprep.subr.mxu0 %v10730_v23 }
 0xc3a   : > { %9955 = vmatpush3.msra.mxu0 %v7501_v1  ;;  %v7696_v1 = vld [vmem:[%s13119_s2 + $0x78] sm:$0xff] }
 0xc3b   : > { %9956 = vmatprep.subr.mxu0 %v10730_v23 }
 0xc3c   : > { %9957 = vmatpush3.msra.mxu0 %v7500_v58  ;;  %v7695_v58 = vld [vmem:[%s13119_s2 + $0x70] sm:$0xff] }
 0xc3d   : > { %9958 = vmatprep.subr.mxu0 %v10730_v23 }
 0xc3e   : > { %9959 = vmatpush3.msra.mxu0 %v7499_v60  ;;  %v7694_v60 = vld [vmem:[%s13119_s2 + $0x68] sm:$0xff] }
 0xc3f   : > { %9960 = vmatprep.subr.mxu0 %v10730_v23 }
 0xc40   : > { %9961 = vmatpush3.msra.mxu0 %v7498_v20 }
 0xc41   : > { %9962 = vmatprep.subr.mxu0 %v10730_v23 }
 0xc42   : > { %9963 = vmatpush3.msra.mxu0 %v7497_v63 }
 0xc43   : > { %9964 = vmatprep.subr.mxu0 %v10730_v23 }
 0xc44   : > { %9965 = vmatpush3.msra.mxu0 %v7496_v61  ;;  %v7691_v61 = vld [vmem:[%s13119_s2 + $0x50] sm:$0xff] }
 0xc45   : > { %9966 = vmatprep.subr.mxu0 %v10730_v23 }
 0xc46   : > { %9967 = vmatpush3.msra.mxu0 %v7495_v46  ;;  %v7690_v46 = vld [vmem:[%s13119_s2 + $0x48] sm:$0xff] }
 0xc47   : > { %9968 = vmatprep.subr.mxu0 %v10730_v23 }
 0xc48   : > { %9969 = vmatpush3.msra.mxu0 %v7494_v4  ;;  %v7689_v4 = vld [vmem:[%s13119_s2 + $0x40] sm:$0xff] }
 0xc49   : > { %9970 = vmatprep.subr.mxu0 %v10730_v23 }
 0xc4a   : > { %9971 = vmatpush3.msra.mxu0 %v7493_v5  ;;  %v7688_v5 = vld [vmem:[%s13119_s2 + $0x38] sm:$0xff] }
 0xc4b   : > { %7725 = vmatprep.subr.mxu0 %v7712_v27 }
 0xceb   : > { %v7388_v30 = vpop.f32.mrf.mxu0 }
 0xcec   : > { %v7389_v34 = vadd.f32 %v7388_v30, %v7321_v2  ;;  %v7693_v2 = vld [vmem:[%s13119_s2 + $0x60] sm:$0xff]  ;;  %v7692_v30 = vld [vmem:[%s13119_s2 + $0x58] sm:$0xff] }
 0xced   : > { %v9904_v47 = vpop.f32.mrf.mxu0 }
 0xcee   : > { %v7392_v45 = vmax.f32 %v7389_v34, 0.0  ;;  %v7509_v34 = vld [vmem:[#allocation14] sm:$0x1] }
 0xcf0   : > { %v7396_v49 = vmul.f32 %v8571_v48, %v7392_v45  ;;  %v8573_v45 = vld [vmem:[%s13120_s15 + $0x4] sm:$0x1]  ;;  %s13121_s15 = sld [smem:[#allocation73_spill]] }
 0xcf2   : > { %v7397_v22 = vadd.f32 %v7396_v49, %v7393_v54 }
 0xcf4   : > { %v7398_v7 = vmax.f32 %v7397_v22, 0.0  ;;  %v7581_v22 = vld [vmem:[#allocation16] sm:$0x1] }
 0xcf6   : > { %9938 = vmatmul.mubr.f32.vlgmr.msra.gmra.mxu1 %v7398_v7 }
 0xcf7   : > { %10007 = vmatprep.mubr.msk.f32.mxu1 %vm10731_vm6, %v10730_v23  ;;  %9976 = vmatpush3.msra.mxu1 %v7602_v10  ;;  %v7687_v10 = vld [vmem:[%s13119_s2 + $0x30] sm:$0xff] }
 0xcf8   : > { %9977 = vmatprep.subr.mxu1 %v10730_v23 }
 0xcf9   : > { %9978 = vmatpush3.msra.mxu1 %v7601_v36  ;;  %v7686_v36 = vld [vmem:[%s13119_s2 + $0x28] sm:$0xff] }
 0xcfa   : > { %9979 = vmatprep.subr.mxu1 %v10730_v23 }
 0xcfb   : > { %9980 = vmatpush3.msra.mxu1 %v7600_v18  ;;  %v7685_v18 = vld [vmem:[%s13119_s2 + $0x20] sm:$0xff] }
 0xcfc   : > { %9981 = vmatprep.subr.mxu1 %v10730_v23 }
 0xcfd   : > { %9982 = vmatpush3.msra.mxu1 %v7599_v52  ;;  %v7684_v52 = vld [vmem:[%s13119_s2 + $0x18] sm:$0xff] }
 0xcfe   : > { %9983 = vmatprep.subr.mxu1 %v10730_v23 }
 0xcff   : > { %9984 = vmatpush3.msra.mxu1 %v7598_v17  ;;  %v7683_v17 = vld [vmem:[%s13119_s2 + $0x10] sm:$0xff] }
 0xd00   : > { %9985 = vmatprep.subr.mxu1 %v10730_v23 }
 0xd01   : > { %9986 = vmatpush3.msra.mxu1 %v7597_v25  ;;  %v7682_v25 = vld [vmem:[%s13119_s2 + $0x8] sm:$0xff] }
 0xd02   : > { %9987 = vmatprep.subr.mxu1 %v10730_v23 }
 0xd03   : > { %9988 = vmatpush3.msra.mxu1 %v7596_v26  ;;  %v7681_v26 = vld [vmem:[%s13119_s2] sm:$0xff] }
 0xd04   : > { %9989 = vmatprep.subr.mxu1 %v10730_v23 }
 0xd05   : > { %9990 = vmatpush3.msra.mxu1 %v7595_v29  ;;  %v7603_v29 = vld [vmem:[#allocation17] sm:$0x1] }
 0xd06   : > { %9991 = vmatprep.subr.mxu1 %v10730_v23 }
 0xd07   : > { %9992 = vmatpush3.msra.mxu1 %v7594_v33 }
 0xd08   : > { %9993 = vmatprep.subr.mxu1 %v10730_v23 }
 0xd09   : > { %9994 = vmatpush3.msra.mxu1 %v7593_v59 }
 0xd0a   : > { %9995 = vmatprep.subr.mxu1 %v10730_v23 }
 0xd0b   : > { %9996 = vmatpush3.msra.mxu1 %v7592_v15 }
 0xd0c   : > { %9997 = vmatprep.subr.mxu1 %v10730_v23 }
 0xd0d   : > { %9998 = vmatpush3.msra.mxu1 %v7591_v14 }
 0xd0e   : > { %9999 = vmatprep.subr.mxu1 %v10730_v23 }
 0xd0f   : > { %10000 = vmatpush3.msra.mxu1 %v7590_v6 }
 0xd10   : > { %10001 = vmatprep.subr.mxu1 %v10730_v23 }
 0xd11   : > { %10002 = vmatpush3.msra.mxu1 %v7589_v28 }
 0xd12   : > { %10003 = vmatprep.subr.mxu1 %v10730_v23 }
 0xd13   : > { %10004 = vmatpush3.msra.mxu1 %v7588_v38 }
 0xd14   : > { %10005 = vmatprep.subr.mxu1 %v10730_v23 }
 0xd15   : > { %10006 = vmatpush3.msra.mxu1 %v7587_v19 }
 0xdb6   : > { %v7482_v13 = vpop.f32.mrf.mxu1 }
 0xdb7   : > { %v7483_v0 = vadd.f32 %v7482_v13, %v7415_v32  ;;  %v8574_v32 = vld [vmem:[%s13121_s15 + $0x4] sm:$0x1]  ;;  %s10733_s15 = smov [#allocation21]  }
 0xdb8   : > { %v9939_v21 = vpop.f32.mrf.mxu1  ;;  %s10527_s10 = sshll.u32 %s10733_s15, 4  ;;  %s10528_s10 = int_to_ptr.vmem [resolvable:$false] %s10527_s10 }
 0xdb9   : > { %v7486_v62 = vmax.f32 %v7483_v0, 0.0  ;;  %s10529_s11 = scalar_lea.vmem %s10528_s10, 128  ;;  %p10530_p10 = scmp.lt.s32.totalorder %s7862_s5, %s10528_s10 }
 0xdba   : > { %p10531_p7 = scmp.lt.s32.totalorder %s10529_s11, %s10523_s9 }
 0xdbb   : > { %v7490_v8 = vmul.f32 %v8572_v43, %v7486_v62  ;;  %v7675_v43 = vld [vmem:[#allocation19] sm:$0x1] }
 0xdbc   : > { %p10532_p12 = por %p10531_p7, %p10530_p10 }
 0xdbd   : > { %v7491_v9 = vadd.f32 %v7490_v8, %v7487_v41 }
 0xdbe   : > { %p10533_p8 = pnand %p10532_p12, %p10526_p13 }
 0xdbf   : > { %v7492_v12 = vmax.f32 %v7491_v9, 0.0 }
 0xdc1   : > { %9973 = vmatmul.mubr.f32.vlgmr.msra.gmra.mxu0 %v7492_v12 }
 0xdc2   : > { %7789 = vmatprep.mubr.f32.mxu0 %v10730_v23  ;;  %7726 = vmatpush1.msra.mxu0 %v7711_v44  ;;  %v7702_v23 = vld [vmem:[%s13119_s2 + $0xa8] sm:$0xff]  ;;  %s7826_s2 = sand.u32 1, %s11039_s0  }
 0xdc3   : > { %7727 = vmatprep.subr.mxu0 %v7710_v37  ;;  %s12851_s8 = scalar_lea.sflag [#allocation22], %s7826_s2 }
 0xdc4   : > { %7728 = vmatpush1.msra.mxu0 %v7709_v50 }
 0xdc5   : > { %7729 = vmatprep.subr.mxu0 %v7708_v11 }
 0xdc6   : > { %7730 = vmatpush1.msra.mxu0 %v7707_v3 }
 0xdc7   : > { %7731 = vmatprep.subr.mxu0 %v7706_v51 }
 0xdc8   : > { %7732 = vmatpush1.msra.mxu0 %v7705_v24 }
 0xdc9   : > { %7733 = vmatprep.subr.mxu0 %v7704_v35 }
 0xdca   : > { %7734 = vmatpush1.msra.mxu0 %v7703_v16 }
 0xdcb   : > { %7735 = vmatprep.subr.mxu0 %v7702_v23 }
 0xdcc   : > { %7736 = vmatpush1.msra.mxu0 %v7701_v57 }
 0xdcd   : > { %7737 = vmatprep.subr.mxu0 %v7700_v40 }
 0xdce   : > { %7738 = vmatpush1.msra.mxu0 %v7699_v39 }
 0xdcf   : > { %7739 = vmatprep.subr.mxu0 %v7698_v55 }
 0xdd0   : > { %7740 = vmatpush1.msra.mxu0 %v7697_v56 }
 0xdd1   : > { %7741 = vmatprep.subr.mxu0 %v7696_v1 }
 0xdd2   : > { %7742 = vmatpush1.msra.mxu0 %v7695_v58 }
 0xdd3   : > { %7743 = vmatprep.subr.mxu0 %v7694_v60 }
 0xdd4   : > { %7744 = vmatpush1.msra.mxu0 %v7693_v2 }
 0xdd5   : > { %7745 = vmatprep.subr.mxu0 %v7692_v30 }
 0xdd6   : > { %7746 = vmatpush1.msra.mxu0 %v7691_v61 }
 0xdd7   : > { %7747 = vmatprep.subr.mxu0 %v7690_v46 }
 0xdd8   : > { %7748 = vmatpush1.msra.mxu0 %v7689_v4 }
 0xdd9   : > { %7749 = vmatprep.subr.mxu0 %v7688_v5 }
 0xdda   : > { %7750 = vmatpush1.msra.mxu0 %v7687_v10 }
 0xddb   : > { %7751 = vmatprep.subr.mxu0 %v7686_v36 }
 0xddc   : > { %7752 = vmatpush1.msra.mxu0 %v7685_v18 }
 0xddd   : > { %7753 = vmatprep.subr.mxu0 %v7684_v52 }
 0xdde   : > { %7754 = vmatpush1.msra.mxu0 %v7683_v17 }
 0xddf   : > { %7755 = vmatprep.subr.mxu0 %v7682_v25 }
 0xde0   : > { %7756 = vmatpush1.msra.mxu0 %v7681_v26 }
 0xe81   : > { %v7576_v48 = vpop.f32.mrf.mxu0 }
 0xe82   : > { %v7577_v47 = vadd.f32 %v7576_v48, %v7509_v34 }
 0xe83   : > { %v9974_v54 = vpop.f32.mrf.mxu0 }
 0xe84   : > { %v7580_v49 = vmax.f32 %v7577_v47, 0.0 }
 0xe86   : > { %v7584_v7 = vmul.f32 %v8573_v45, %v7580_v49 }
 0xe88   : > { %v7585_v20 = vadd.f32 %v7584_v7, %v7581_v22 }
 0xe8a   : > { %v7586_v63 = vmax.f32 %v7585_v20, 0.0 }
 0xe8c   : > { %10008 = vmatmul.mubr.f32.vlgmr.msra.gmra.mxu1 %v7586_v63 }
 0xf4c   : > { %v7670_v33 = vpop.f32.mrf.mxu1 }
 0xf4d   : > { %v7671_v59 = vadd.f32 %v7670_v33, %v7603_v29 }
 0xf4e   : > { %v10009_v13 = vpop.f32.mrf.mxu1 }
 0xf4f   : > { %v7674_v0 = vmax.f32 %v7671_v59, 0.0 }
 0xf51   : > { %v7678_v21 = vmul.f32 %v8574_v32, %v7674_v0 }
 0xf53   : > { %v7679_v62 = vadd.f32 %v7678_v21, %v7675_v43 }
 0xf55   : > { %v7680_v41 = vmax.f32 %v7679_v62, 0.0 }
 0xf57   : > { %7790 = vmatmul.mubr.f32.vlgmr.msra.gmra.mxu0 %v7680_v41 }
 0xf58   : > { %10536 = shalt.err (!%p10533_p8)
}
 0xf59   : > { %s10537_s2 = scalar_lea.hbm %s12847_s4, 64  ;;  %s10541_s3 = scalar_lea.hbm %s11011_s13, 128 }
 0xf5a   : > { %p10538_p11 = scmp.ne.s32.totalorder %s12847_s4, %s10537_s2  ;;  %p10542_p2 = scmp.lt.s32.totalorder %s12847_s4, %s11011_s13 }
 0xf5b   : > { %p10543_p3 = scmp.lt.s32.totalorder %s10541_s3, %s10537_s2 }
 0xf5c   : > { %p10539_p0 = pnand %p10538_p11, %p13122_p5 }
 0xf5d   : > { %p10544_p9 = por %p10543_p3, %p10542_p2 }
 0xf5e   : > { %p10540_p1 = pneg %p10539_p0 }
 0xf60   : > { %p10545_p4 = pnand %p10544_p9, %p10540_p1 }
 0xf62   : > { %10548 = shalt.err (!%p10545_p4)
}
 0xf63   : > { %10063 = dma.vmem_to_hbm [thread:$0]  (%p13122_p5), %s7862_s5, 64, %s12847_s4, %s12851_s8  }
 0xf64   : > { %s12867_s9 = scalar_lea.hbm %s11006_s27, %s8586_s6  ;;  %s7845_s10 = sshll.u32 %s12467_s1, 4  ;;  %s12870_s10 = int_to_ptr.vmem [resolvable:$true] %s7845_s10 }
 0xf65   : > { %s7822_s11 = scalar_lea.sflag [#allocation4], %s12462_s18  ;;  %s10549_s22 = scalar_lea.vmem %s12870_s10, 256 }
 0xf66   : > { %p10550_p6 = scmp.ne.s32.totalorder %s12870_s10, %s10549_s22  ;;  %s10734_s15 = smov [#allocation20]  }
 0xf67   : > { %s10553_s2 = sshll.u32 %s10734_s15, 4  ;;  %s10554_s2 = int_to_ptr.vmem [resolvable:$false] %s10553_s2 }
 0xf68   : > { %p10551_p13 = pnand %p10550_p6, %p13122_p5  ;;  %s10555_s3 = scalar_lea.vmem %s10554_s2, 512 }
 0xf69   : > { %p10556_p7 = scmp.lt.s32.totalorder %s12870_s10, %s10554_s2  ;;  %p10557_p12 = scmp.lt.s32.totalorder %s10555_s3, %s10549_s22 }
 0xf6a   : > { %p10552_p10 = pneg %p10551_p13 }
 0xf6b   : > { %p10558_p8 = por %p10557_p12, %p10556_p7 }
 0xf6d   : > { %p10559_p11 = pnand %p10558_p8, %p10552_p10 }
 0xf6f   : > { %10562 = shalt.err (!%p10559_p11)
}
 0xf70   : > { %s10563_s5 = scalar_lea.hbm %s12867_s9, 256  ;;  %s10567_s6 = scalar_lea.hbm %s11006_s27, 512 }
 0xf71   : > { %p10564_p0 = scmp.ne.s32.totalorder %s12867_s9, %s10563_s5  ;;  %p10568_p3 = scmp.lt.s32.totalorder %s12867_s9, %s11006_s27 }
 0xf72   : > { %p10569_p9 = scmp.lt.s32.totalorder %s10567_s6, %s10563_s5 }
 0xf73   : > { %p10565_p1 = pnand %p10564_p0, %p13122_p5 }
 0xf74   : > { %p10570_p4 = por %p10569_p9, %p10568_p3 }
 0xf75   : > { %p10566_p2 = pneg %p10565_p1 }
 0xf77   : > { %p10571_p6 = pnand %p10570_p4, %p10566_p2 }
 0xf79   : > { %10574 = shalt.err (!%p10571_p6)
}
 0xf7a   : > { %s10735_s1 = smov 128   ;;  %s10736_s4 = smov 8   ;;  %v7717_v8 = vsub.s32 0, %v12674_v31  ;;  %v7713_v9 = vld [vmem:[%s11001_s21] sm:$0x3]  ;;  %v7721_v12 = vsub.s32 1, %v12674_v31 }
 0xf7b   : > { %10062 = dma.vmem_to_hbm [thread:$0]  (%p13122_p5), %s12870_s10, 256, %s12867_s9, %s7822_s11, %s10735_s1, %s10735_s1, %s10736_s4   ;;  %vm7818_vm10 = vcmp.lt.s32.totalorder %v7146_v53, 256 }
 0xf7c   : > { %v7718_v15 = vrot.slane %v7713_v9, %v7717_v8  ;;  %v7722_v14 = vrot.slane %v7713_v9, %v7721_v12  ;;  %s8184_s22 = sshll.u32 %s12462_s18, 1  ;;  %s8587_s15 = sshll.u32 %s11039_s0, 5 }
 0xf7d   : > { %s1751_s2 = scalar_lea.vmem [#allocation23], %s8184_s22  ;;  %s7873_s10 = scalar_lea.hbm %s11016_s12, %s8587_s15 }
 0xf7e   : > { %s7875_s9 = sshll.u32 %s1751_s2, 4  ;;  %s10737_s18 = smov [#allocation23]   ;;  %s7876_s9 = int_to_ptr.vmem [resolvable:$true] %s7875_s9 }
 0xf7f   : > { %s10575_s11 = scalar_lea.vmem %s7876_s9, 32  ;;  %s10579_s3 = sshll.u32 %s10737_s18, 4  ;;  %s10580_s3 = int_to_ptr.vmem [resolvable:$false] %s10579_s3 }
 0xf80   : > { %p10576_p13 = scmp.ne.s32.totalorder %s7876_s9, %s10575_s11  ;;  %s10581_s0 = scalar_lea.vmem %s10580_s3, 64 }
 0xf81   : > { %p10582_p12 = scmp.lt.s32.totalorder %s7876_s9, %s10580_s3  ;;  %p10583_p8 = scmp.lt.s32.totalorder %s10581_s0, %s10575_s11 }
 0xf82   : > { %p10577_p10 = pnand %p10576_p13, %p13122_p5 }
 0xf83   : > { %p10584_p11 = por %p10583_p8, %p10582_p12 }
 0xf84   : > { %p10578_p7 = pneg %p10577_p10 }
 0xf86   : > { %p10585_p0 = pnand %p10584_p11, %p10578_p7 }
0x1017   : > { %v7791_v6 = vpop.f32.mrf.mxu0 }
0x1018   : > { %v7792_v28 = vadd.f32 %v7791_v6, %v7718_v15 }
0x1019   : > { %v7793_v38 = vpop.f32.mrf.mxu0 }
0x101a   : > { %v7794_v19 = vadd.f32 %v7793_v38, %v7722_v14  ;;  %v7796_v27 = vmax.f32 %v7792_v28, 0.0 }
0x101c   : > { %v7797_v44 = vmax.f32 %v7794_v19, 0.0 }
0x101e   : > { %v7800_v37 = vcombine.low %v7796_v27, %v7797_v44 }
0x1020   : > { %v7807_v50 = vrot.slane %v7800_v37, %v12681_v42 }
0x1022   : > { %v7814_v31 = vrot.slane %v7807_v50, %v12681_v42 }
0x1024   : > { %7820 = vst.msk [vmem:[%s1751_s2] sm:$0x3] %vm7818_vm10, %v7814_v31 }
0x1025   : > { %10588 = shalt.err (!%p10585_p0)
}
0x1026   : > { %s10589_s5 = scalar_lea.hbm %s7873_s10, 32  ;;  %s10593_s6 = scalar_lea.hbm %s11016_s12, 64 }
0x1027   : > { %p10590_p1 = scmp.ne.s32.totalorder %s7873_s10, %s10589_s5  ;;  %p10594_p9 = scmp.lt.s32.totalorder %s7873_s10, %s11016_s12 }
0x1028   : > { %p10595_p4 = scmp.lt.s32.totalorder %s10593_s6, %s10589_s5 }
0x1029   : > { %p10591_p2 = pnand %p10590_p1, %p13122_p5 }
0x102a   : > { %p10596_p6 = por %p10595_p4, %p10594_p9 }
0x102b   : > { %p10592_p3 = pneg %p10591_p2 }
0x102d   : > { %p10597_p13 = pnand %p10596_p6, %p10592_p3 }
0x102f   : > { %10600 = shalt.err (!%p10597_p13)
}
0x1030   : > { %10064 = dma.vmem_to_hbm [thread:$0]  (%p13122_p5), %s7876_s9, 32, %s7873_s10, %s12851_s8  }
0x1031 PF: > { %s13123_s1 = sld [smem:[#allocation77_spill]] }
0x1032   : > { %s13124_s4 = sld [smem:[#allocation75_spill]] }
0x1033   : > { %s13125_s22 = sld [smem:[#allocation80_spill]] }
0x1037   : > { %p10134_p10 = scmp.ge.s32.totalorder %s13123_s1, 2 }
0x1038   : > { %s7887_s15 = sand.u32 1, %s13124_s4  }
0x1039   : > { %p13126_p7 = scmp.ne.s32.totalorder %s13125_s22, 0  ;;  %s7888_s2 = scalar_lea.sflag [#allocation4], %s7887_s15 }
0x103b   : > { %p10103_p12 = pnand %p10134_p10, %p13126_p7 }
0x103d   : > { %p10104_p8 = pneg %p10103_p12 }
0x103f   : > { %10642 = dma.done.wait (%p10104_p8), %s7888_s2, 256  }
0x1040   : > { %10644 = vsyncadd (%p10104_p8), %s7888_s2, 4294967040  ;;  %s13127_s11 = sadd.s32 4294967294, %s13123_s1  }
0x1041   : > { %s7896_s18 = sand.u32 1, %s13127_s11  }
0x1042   : > { %s7897_s3 = scalar_lea.sflag [#allocation22], %s7896_s18 }
0x1043   : > { %10646 = dma.done.wait (%p10104_p8), %s7897_s3, 96  }
0x1044   : > { %10648 = vsyncadd (%p10104_p8), %s7897_s3, 4294967200  ;;  %s13128_s22 = sld [smem:[#allocation78_spill]]  ;;  %s13131_s15 = smov %s10655_s16 }
0x1045   : > { %s13129_s8 = sld [smem:[#allocation76_spill]] }
0x1046   : > { %s13130_s18 = sld [smem:[#allocation79_spill]] }
0x104a   : > { %p129_p5 = scmp.ge.s32.totalorder %s13128_s22, 4  }
0x104b   : > { %s13132_s16 = smov %s13129_s8 }
0x104c   :  { %131 = sbr.rel (!%p129_p5) target bundleno = 115 (0x73), region = 481 }
0x1051   :  { %7911 = vsyncpa [#allocation3], 1 }
0x1052   :  { %7913 = vsyncpa [#allocation3 + $0x1], 1 }
0x1053   :  { %7914 = vsyncpa [#allocation6], 1 }
0x1054   :  { %7915 = vsyncpa [#allocation9], 1 }
0x1055   :  { %7916 = vsyncpa [#allocation12], 1 }
0x1056   :  { %7917 = vsyncpa [#allocation15], 1 }
0x1057   :  { %7918 = vsyncpa [#allocation18], 1 }
0x1058   :  { %7919 = vsyncpa [#allocation4], 1 }
0x1059   :  { %7921 = vsyncpa [#allocation4 + $0x1], 1 }
0x105a   :  { %7922 = vsyncpa [#allocation22], 1 }
0x105b   :  { %7924 = vsyncpa [#allocation22 + $0x1], 1 }

</bundles_post_ra>
